<compile_context>
chip_gen: v5e
topology: v5e:2x2
jax: 0.10.0
libtpu: 0.0.40
codegen_flags: <defaults>
</compile_context>

<pallas_src>
import jax
import jax.numpy as jnp
from jax.experimental import pallas as pl
from jax.experimental.pallas import tpu as pltpu


def _decodercp_kernel(z_ref, w1_ref, b1_ref, w2_ref, b2_ref, w3_ref, b3_ref,
                      out_ref):
    # fc1: Linear + LeakyReLU(0.01)   (dropout is identity in eval)
    h = jnp.dot(z_ref[...], w1_ref[...],
                preferred_element_type=jnp.float32) + b1_ref[...]
    h = jnp.maximum(h, 0.01 * h)               # LeakyReLU, f32 VPU math

    # fc2: Linear + LeakyReLU(0.01)   (dropout is identity in eval)
    h = jnp.dot(h.astype(jnp.bfloat16), w2_ref[...],
                preferred_element_type=jnp.float32) + b2_ref[...]
    h = jnp.maximum(h, 0.01 * h)

    # fc3: Linear + ReLU
    h = jnp.dot(h.astype(jnp.bfloat16), w3_ref[...],
                preferred_element_type=jnp.float32) + b3_ref[...]
    out_ref[...] = jnp.maximum(h, 0.0).astype(out_ref.dtype)


def decodercp_forward(z, params, *, batch_tile=None):
    """Fused 3-layer MLP decoder. z: [B, z_dim] float32 -> [B, out_dim] f32."""
    w1, b1, w2, b2, w3, b3 = params
    B, z_dim = z.shape
    hidden = w1.shape[1]
    out_dim = w3.shape[1]

    # Hardware-aware default M tile: v5e MXU is 128-wide (M=128 already fills
    # it); v6e/v7x MXUs are 256x256, so a 256-row tile doubles utilization.
    if batch_tile is None:
        kind = jax.devices()[0].device_kind.lower()
        batch_tile = 128 if "v5" in kind else 256

    # bf16 inputs to the MXU: halves z + weight DMA; f32 accumulation.
    z = z.astype(jnp.bfloat16)
    w1 = w1.astype(jnp.bfloat16)
    w2 = w2.astype(jnp.bfloat16)
    w3 = w3.astype(jnp.bfloat16)
    b1 = b1.astype(jnp.float32)
    b2 = b2.astype(jnp.float32)
    b3 = b3.astype(jnp.float32)

    # Pad out_dim to a multiple of 128 -> unmasked lane-dense output stores.
    out_pad = (-out_dim) % 128
    if out_pad:
        w3 = jnp.pad(w3, ((0, 0), (0, out_pad)))
        b3 = jnp.pad(b3, ((0, 0), (0, out_pad)))
    out_dim_p = out_dim + out_pad

    # Balanced batch tile: split B into nb ~equal tiles, round rows up to the
    # 8-sublane multiple.  Avoids padding B=129 up to 256 etc.
    nb_target = max(1, -(-B // batch_tile))
    tb = -(-B // nb_target)                 # balanced rows per tile
    tb = -(-tb // 8) * 8                    # sublane multiple
    tb = min(tb, -(-batch_tile // 8) * 8)
    b_pad = (-B) % tb
    if b_pad:
        z = jnp.pad(z, ((0, b_pad), (0, 0)))
    B_p = B + b_pad
    nb = B_p // tb

    # Megacore gate (v7x): only split the batch axis across cores when there
    # are enough tiles that compute dominates; otherwise "parallel" just
    # duplicates the weight DMA into each core's private VMEM.
    dim_sem = ("parallel",) if nb >= 4 else ("arbitrary",)

    flops = 2 * B_p * (z_dim * hidden + hidden * hidden + hidden * out_dim_p)
    bytes_accessed = (z.size * 2                           # bf16 activations in
                      + (w1.size + w2.size + w3.size) * 2  # bf16 weights
                      + (b1.size + b2.size + b3.size) * 4  # f32 biases
                      + B_p * out_dim_p * 4)               # f32 output

    # Constant weight/bias blocks: index_map never changes -> DMA'd once and
    # held resident in VMEM across batch tiles (footprint ~3 MiB incl. the
    # pipeline's second buffer, well under the 16 MiB scoped limit).
    const = lambda arr: pl.BlockSpec(arr.shape, lambda i: (0,) * arr.ndim)

    out = pl.pallas_call(
        _decodercp_kernel,
        out_shape=jax.ShapeDtypeStruct((B_p, out_dim_p), jnp.float32),
        grid_spec=pltpu.PrefetchScalarGridSpec(
            num_scalar_prefetch=0,
            grid=(nb,),
            in_specs=[
                pl.BlockSpec((tb, z_dim), lambda i: (i, 0)),
                const(w1), const(b1),
                const(w2), const(b2),
                const(w3), const(b3),
            ],
            out_specs=pl.BlockSpec((tb, out_dim_p), lambda i: (i, 0)),
        ),
        compiler_params=pltpu.CompilerParams(
            dimension_semantics=dim_sem,
            vmem_limit_bytes=16 << 20,
        ),
        cost_estimate=pl.CostEstimate(
            flops=flops, transcendentals=0, bytes_accessed=bytes_accessed),
    )(z, w1, b1, w2, b2, w3, b3)

    return out[:B, :out_dim]


def init_params(key, z_dim, output_dim, hidden=800):
    """Deterministic parameter init (Kaiming-uniform-ish, like nn.Linear)."""
    ks = jax.random.split(key, 6)

    def linear(kw, kb, fan_in, fan_out):
        bound = 1.0 / jnp.sqrt(fan_in)
        # PyTorch stores W as (out, in); we store the transposed (in, out).
        w = jax.random.uniform(kw, (fan_in, fan_out), jnp.float32, -bound, bound)
        b = jax.random.uniform(kb, (1, fan_out), jnp.float32, -bound, bound)
        return w, b

    w1, b1 = linear(ks[0], ks[1], z_dim, hidden)
    w2, b2 = linear(ks[2], ks[3], hidden, hidden)
    w3, b3 = linear(ks[4], ks[5], hidden, output_dim)
    return (w1, b1, w2, b2, w3, b3)


def decodercp_reference(z, params):
    """Pure-JAX reference with matching bf16-input / f32-accumulate math."""
    w1, b1, w2, b2, w3, b3 = params

    def mm(x, w):
        return jax.lax.dot(x.astype(jnp.bfloat16), w.astype(jnp.bfloat16),
                           preferred_element_type=jnp.float32)

    h = mm(z, w1) + b1
    h = jnp.maximum(h, 0.01 * h)
    h = mm(h, w2) + b2
    h = jnp.maximum(h, 0.01 * h)
    h = mm(h, w3) + b3
    return jnp.maximum(h, 0.0)


if __name__ == "__main__":
    key = jax.random.PRNGKey(0)
    k_param, k_z = jax.random.split(key)

    # Small shapes consistent with the module; OUT_DIM=100 exercises the
    # lane-padding path, B=2 exercises the sublane-padding path.
    B, Z_DIM, OUT_DIM = 2, 32, 100
    params = init_params(k_param, Z_DIM, OUT_DIM)
    z = jax.random.normal(k_z, (B, Z_DIM), jnp.float32)

    out = decodercp_forward(z, params)
    out = jax.block_until_ready(out)

    ref = decodercp_reference(z, params)
    assert out.shape == (B, OUT_DIM), out.shape
    assert jnp.allclose(out, ref, atol=1e-3, rtol=1e-3), (
        float(jnp.max(jnp.abs(out - ref))))

    print("KERNEL_OK")
</pallas_src>

<mosaic_0001>
module attributes {stable_mosaic.version = 11 : i64} {
  func.func @_decodercp_kernel(%arg0: i32, %arg1: memref<8x32xbf16, #tpu.memory_space<vmem>>, %arg2: memref<32x800xbf16, #tpu.memory_space<vmem>>, %arg3: memref<1x800xf32, #tpu.memory_space<vmem>>, %arg4: memref<800x800xbf16, #tpu.memory_space<vmem>>, %arg5: memref<1x800xf32, #tpu.memory_space<vmem>>, %arg6: memref<800x128xbf16, #tpu.memory_space<vmem>>, %arg7: memref<1x128xf32, #tpu.memory_space<vmem>>, %arg8: memref<8x128xf32, #tpu.memory_space<vmem>>) attributes {dimension_semantics = [#tpu.dimension_semantics<arbitrary>], iteration_bounds = array<i64: 1>, scalar_prefetch = 0 : i64, scratch_operands = 0 : i64, tpu.core_type = #tpu.core_type<tc>, window_params = [{transform_indices = @transform_0, window_bounds = array<i64: 8, 32>}, {pipeline_mode = #tpu.pipeline_mode<synchronous>, transform_indices = @transform_1, window_bounds = array<i64: 32, 800>}, {pipeline_mode = #tpu.pipeline_mode<synchronous>, transform_indices = @transform_2, window_bounds = array<i64: 1, 800>}, {pipeline_mode = #tpu.pipeline_mode<synchronous>, transform_indices = @transform_3, window_bounds = array<i64: 800, 800>}, {pipeline_mode = #tpu.pipeline_mode<synchronous>, transform_indices = @transform_4, window_bounds = array<i64: 1, 800>}, {pipeline_mode = #tpu.pipeline_mode<synchronous>, transform_indices = @transform_5, window_bounds = array<i64: 800, 128>}, {pipeline_mode = #tpu.pipeline_mode<synchronous>, transform_indices = @transform_6, window_bounds = array<i64: 1, 128>}, {transform_indices = @transform_7, window_bounds = array<i64: 8, 128>}]} {
    %c0 = arith.constant 0 : index
    %c0_0 = arith.constant 0 : index
    %0 = vector.load %arg1[%c0, %c0_0] : memref<8x32xbf16, #tpu.memory_space<vmem>>, vector<8x32xbf16>
    %c0_1 = arith.constant 0 : index
    %c0_2 = arith.constant 0 : index
    %1 = vector.load %arg2[%c0_1, %c0_2] : memref<32x800xbf16, #tpu.memory_space<vmem>>, vector<32x800xbf16>
    %cst = arith.constant dense<0.000000e+00> : vector<8x800xf32>
    %2 = tpu.matmul %0, %1, %cst {dimension_numbers = #tpu.dot_dimension_numbers<[1], [0], [0], [1], [0, 0, 1, 1], [], []>} : vector<8x32xbf16>, vector<32x800xbf16>, vector<8x800xf32> -> vector<8x800xf32>
    %c0_3 = arith.constant 0 : index
    %c0_4 = arith.constant 0 : index
    %3 = vector.load %arg3[%c0_3, %c0_4] : memref<1x800xf32, #tpu.memory_space<vmem>>, vector<1x800xf32>
    %4 = vector.broadcast %3 : vector<1x800xf32> to vector<8x800xf32>
    %5 = arith.addf %2, %4 : vector<8x800xf32>
    %cst_5 = arith.constant 0.00999999977 : f32
    %6 = vector.broadcast %cst_5 : f32 to vector<8x800xf32>
    %7 = arith.mulf %6, %5 : vector<8x800xf32>
    %8 = arith.maximumf %5, %7 : vector<8x800xf32>
    %9 = arith.truncf %8 : vector<8x800xf32> to vector<8x800xbf16>
    %c0_6 = arith.constant 0 : index
    %c0_7 = arith.constant 0 : index
    %10 = vector.load %arg4[%c0_6, %c0_7] : memref<800x800xbf16, #tpu.memory_space<vmem>>, vector<800x800xbf16>
    %cst_8 = arith.constant dense<0.000000e+00> : vector<8x800xf32>
    %11 = tpu.matmul %9, %10, %cst_8 {dimension_numbers = #tpu.dot_dimension_numbers<[1], [0], [0], [1], [0, 0, 1, 1], [], []>} : vector<8x800xbf16>, vector<800x800xbf16>, vector<8x800xf32> -> vector<8x800xf32>
    %c0_9 = arith.constant 0 : index
    %c0_10 = arith.constant 0 : index
    %12 = vector.load %arg5[%c0_9, %c0_10] : memref<1x800xf32, #tpu.memory_space<vmem>>, vector<1x800xf32>
    %13 = vector.broadcast %12 : vector<1x800xf32> to vector<8x800xf32>
    %14 = arith.addf %11, %13 : vector<8x800xf32>
    %cst_11 = arith.constant 0.00999999977 : f32
    %15 = vector.broadcast %cst_11 : f32 to vector<8x800xf32>
    %16 = arith.mulf %15, %14 : vector<8x800xf32>
    %17 = arith.maximumf %14, %16 : vector<8x800xf32>
    %18 = arith.truncf %17 : vector<8x800xf32> to vector<8x800xbf16>
    %c0_12 = arith.constant 0 : index
    %c0_13 = arith.constant 0 : index
    %19 = vector.load %arg6[%c0_12, %c0_13] : memref<800x128xbf16, #tpu.memory_space<vmem>>, vector<800x128xbf16>
    %cst_14 = arith.constant dense<0.000000e+00> : vector<8x128xf32>
    %20 = tpu.matmul %18, %19, %cst_14 {dimension_numbers = #tpu.dot_dimension_numbers<[1], [0], [0], [1], [0, 0, 1, 1], [], []>} : vector<8x800xbf16>, vector<800x128xbf16>, vector<8x128xf32> -> vector<8x128xf32>
    %c0_15 = arith.constant 0 : index
    %c0_16 = arith.constant 0 : index
    %21 = vector.load %arg7[%c0_15, %c0_16] : memref<1x128xf32, #tpu.memory_space<vmem>>, vector<1x128xf32>
    %22 = vector.broadcast %21 : vector<1x128xf32> to vector<8x128xf32>
    %23 = arith.addf %20, %22 : vector<8x128xf32>
    %cst_17 = arith.constant 0.000000e+00 : f32
    %24 = vector.broadcast %cst_17 : f32 to vector<8x128xf32>
    %25 = arith.maximumf %23, %24 : vector<8x128xf32>
    %c0_18 = arith.constant 0 : index
    %c0_19 = arith.constant 0 : index
    %26 = vector.load %arg8[%c0_18, %c0_19] : memref<8x128xf32, #tpu.memory_space<vmem>>, vector<8x128xf32>
    tpu.vector_store %arg8[%c0_18, %c0_19], %25 {strides = array<i32>} : memref<8x128xf32, #tpu.memory_space<vmem>>, vector<8x128xf32>,
    return
  }
  func.func @transform_0(%arg0: i32) -> (i32, i32) {
    %c0_i32 = arith.constant 0 : i32
    %c0_i32_0 = arith.constant 0 : i32
    return %arg0, %c0_i32 : i32, i32
  }
  func.func @transform_1(%arg0: i32) -> (i32, i32) {
    %c0_i32 = arith.constant 0 : i32
    %c0_i32_0 = arith.constant 0 : i32
    %c0_i32_1 = arith.constant 0 : i32
    return %c0_i32, %c0_i32_0 : i32, i32
  }
  func.func @transform_2(%arg0: i32) -> (i32, i32) {
    %c0_i32 = arith.constant 0 : i32
    %c0_i32_0 = arith.constant 0 : i32
    %c0_i32_1 = arith.constant 0 : i32
    return %c0_i32, %c0_i32_0 : i32, i32
  }
  func.func @transform_3(%arg0: i32) -> (i32, i32) {
    %c0_i32 = arith.constant 0 : i32
    %c0_i32_0 = arith.constant 0 : i32
    %c0_i32_1 = arith.constant 0 : i32
    return %c0_i32, %c0_i32_0 : i32, i32
  }
  func.func @transform_4(%arg0: i32) -> (i32, i32) {
    %c0_i32 = arith.constant 0 : i32
    %c0_i32_0 = arith.constant 0 : i32
    %c0_i32_1 = arith.constant 0 : i32
    return %c0_i32, %c0_i32_0 : i32, i32
  }
  func.func @transform_5(%arg0: i32) -> (i32, i32) {
    %c0_i32 = arith.constant 0 : i32
    %c0_i32_0 = arith.constant 0 : i32
    %c0_i32_1 = arith.constant 0 : i32
    return %c0_i32, %c0_i32_0 : i32, i32
  }
  func.func @transform_6(%arg0: i32) -> (i32, i32) {
    %c0_i32 = arith.constant 0 : i32
    %c0_i32_0 = arith.constant 0 : i32
    %c0_i32_1 = arith.constant 0 : i32
    return %c0_i32, %c0_i32_0 : i32, i32
  }
  func.func @transform_7(%arg0: i32) -> (i32, i32) {
    %c0_i32 = arith.constant 0 : i32
    %c0_i32_0 = arith.constant 0 : i32
    return %arg0, %c0_i32 : i32, i32
  }
}

</mosaic_0001>

<bundles_post_ra>
// kernel: tpu_custom_call.1
= control target key start
LH: loop header
LB: loop body
LE: loop exit
PB: predicated region body
PF: predicated region fallthrough
CT: control target
= control target key end

     0   :  { %12 = vsyncpa [#allocation3], 0  ;;  %s6276_s0 = inlined_call_operand.hbm [shape: bf16[8,32], index: 0, kind: input, shape index: {}]   ;;  %s6277_s1 = inlined_call_operand.hbm [shape: bf16[32,800], index: 1, kind: input, shape index: {}]   ;;  %s6278_s2 = inlined_call_operand.hbm [shape: f32[1,800], index: 2, kind: input, shape index: {}]   ;;  %s6279_s3 = inlined_call_operand.hbm [shape: bf16[800,800], index: 3, kind: input, shape index: {}]   ;;  %s6280_s4 = inlined_call_operand.hbm [shape: f32[1,800], index: 4, kind: input, shape index: {}]   ;;  %s6281_s5 = inlined_call_operand.hbm [shape: bf16[800,128], index: 5, kind: input, shape index: {}]   ;;  %s6282_s6 = inlined_call_operand.hbm [shape: f32[1,128], index: 6, kind: input, shape index: {}]   ;;  %s6283_s7 = inlined_call_operand.hbm [shape: f32[8,128], index: 7, kind: output, shape index: {}]  }
   0x1   :  { %13 = vsyncpa [#allocation6], 0 }
   0x2   :  { %14 = vsyncpa [#allocation9], 0 }
   0x3   :  { %15 = vsyncpa [#allocation12], 0  ;;  %s32_s26 = sshll.u32 %s6277_s1, 4  ;;  %s33_s26 = int_to_ptr.hbm [resolvable:$true] %s32_s26 }
   0x4   :  { %16 = vsyncpa [#allocation4], 0  ;;  %s6048_s27 = smov [#allocation5]   ;;  %s56_s8 = sshll.u32 %s6279_s3, 4  ;;  %s57_s8 = int_to_ptr.hbm [resolvable:$true] %s56_s8 }
   0x5   :  { %s34_s28 = sshll.u32 %s6048_s27, 4  ;;  %s6049_s9 = smov 448   ;;  %s35_s28 = int_to_ptr.vmem [resolvable:$true] %s34_s28 }
   0x6   :  { %s6050_s10 = smov 28   ;;  %s6051_s11 = smov [#allocation8]  }
   0x7   :  { %40 = dma.hbm_to_vmem [thread:$0]  %s33_s26, 1792, %s35_s28, [#allocation6], %s6049_s9, %s6049_s9, %s6050_s10  }
   0x8   :  { %s58_s12 = sshll.u32 %s6051_s11, 4  ;;  %s80_s15 = sshll.u32 %s6281_s5, 4  ;;  %s59_s12 = int_to_ptr.vmem [resolvable:$true] %s58_s12  ;;  %s81_s15 = int_to_ptr.hbm [resolvable:$true] %s80_s15 }
   0x9   :  { %64 = dma.hbm_to_vmem [thread:$0]  %s57_s8, 44800, %s59_s12, [#allocation9], %s6049_s9, %s6049_s9, %s6050_s10  }
   0xa   :  { %s6052_s1 = smov [#allocation11]   ;;  %s22_s3 = sshll.u32 %s6276_s0, 4  ;;  %s23_s3 = int_to_ptr.hbm [resolvable:$true] %s22_s3 }
   0xb   :  { %s82_s16 = sshll.u32 %s6052_s1, 4  ;;  %s6053_s19 = smov 64   ;;  %s83_s16 = int_to_ptr.vmem [resolvable:$true] %s82_s16 }
   0xc   :  { %s6054_s20 = smov 4   ;;  %s6055_s21 = smov [#allocation2]  }
   0xd   :  { %88 = dma.hbm_to_vmem [thread:$0]  %s81_s15, 6400, %s83_s16, [#allocation12], %s6053_s19, %s6053_s19, %s6054_s20  }
   0xe   :  { %s24_s22 = sshll.u32 %s6055_s21, 4  ;;  %s46_s5 = sshll.u32 %s6278_s2, 4  ;;  %s25_s22 = int_to_ptr.vmem [resolvable:$true] %s24_s22  ;;  %s47_s5 = int_to_ptr.hbm [resolvable:$true] %s46_s5 }
   0xf   :  { %27 = dma.hbm_to_vmem [thread:$0]  %s23_s3, 64, %s25_s22, [#allocation3]  }
  0x10   :  { %s70_s27 = sshll.u32 %s6280_s4, 4  ;;  %s6056_s28 = smov [#allocation7]   ;;  %s71_s27 = int_to_ptr.hbm [resolvable:$true] %s70_s27 }
  0x11   :  { %s48_s29 = sshll.u32 %s6056_s28, 4  ;;  %s6057_s0 = smov [#allocation10]   ;;  %s49_s29 = int_to_ptr.vmem [resolvable:$true] %s48_s29 }
  0x12   :  { %51 = dma.hbm_to_vmem [thread:$0]  %s47_s5, 112, %s49_s29, [#allocation6]  }
  0x13   :  { %s72_s30 = sshll.u32 %s6057_s0, 4  ;;  %s94_s10 = sshll.u32 %s6282_s6, 4  ;;  %s73_s30 = int_to_ptr.vmem [resolvable:$true] %s72_s30  ;;  %s95_s10 = int_to_ptr.hbm [resolvable:$true] %s94_s10 }
  0x14   :  { %75 = dma.hbm_to_vmem [thread:$0]  %s71_s27, 112, %s73_s30, [#allocation9]  }
  0x15   :  { %s6058_s2 = smov [#allocation13]  }
  0x16   :  { %s96_s11 = sshll.u32 %s6058_s2, 4  ;;  %s97_s11 = int_to_ptr.vmem [resolvable:$true] %s96_s11 }
  0x17   :  { %99 = dma.hbm_to_vmem [thread:$0]  %s95_s10, 16, %s97_s11, [#allocation12]  }
  0x18   :  { %6038 = dma.done.wait [#allocation3], 64  }
  0x19   :  { %6039 = vsyncadd [#allocation3], 4294967232 }
  0x1a   :  { %6040 = dma.done.wait [#allocation6], 1904  }
  0x1b   :  { %6041 = vsyncadd [#allocation6], 4294965392 }
  0x1c   :  { %6042 = dma.done.wait [#allocation9], 44912  }
  0x1d   :  { %6043 = vsyncadd [#allocation9], 4294922384 }
  0x1e   :  { %6044 = dma.done.wait [#allocation12], 6416  }
  0x1f   :  { %6045 = vsyncadd [#allocation12], 4294960880  ;;  %vm234_vm0 = vcmask 261120   ;;  %v3777_v0 = vld [vmem:[#allocation5 + $0x38] sm:$0xf]  ;;  %s6059_s4 = smov [#allocation14]  }
  0x20   :  { %v5428_v1 = vld [vmem:[#allocation5 + $0x50] sm:$0xf0]  ;;  %v5425_v2 = vld [vmem:[#allocation5 + $0x3c] sm:$0xf]  ;;  %v3779_v4 = vld [vmem:[#allocation5 + $0x54] sm:$0xf0] }
  0x21   :  { %v3778_v3 = vor.u32 %v5428_v1, %v3777_v0  ;;  %v3785_v5 = vld [vmem:[#allocation5 + $0x40] sm:$0xf]  ;;  %v5429_v6 = vld [vmem:[#allocation5 + $0x58] sm:$0xf0]  ;;  %v3782_v7 = vor.u32 %v5425_v2, %v3779_v4  ;;  %v5426_v9 = vld [vmem:[#allocation5 + $0x44] sm:$0xf] }
  0x22   :  { %v3786_v8 = vor.u32 %v5429_v6, %v3785_v5  ;;  %v3787_v10 = vld [vmem:[#allocation5 + $0x5c] sm:$0xf0]  ;;  %v5421_v13 = vld [vmem:[#allocation5 + $0x18] sm:$0xf0]  ;;  %v5418_v14 = vld [vmem:[#allocation5 + $0x4] sm:$0xf] }
  0x23   :  { %v3749_v11 = vld [vmem:[#allocation5] sm:$0xf]  ;;  %244 = vmatpush.bf16.msra.mxu0 %v3778_v3  ;;  %v3790_v12 = vor.u32 %v5426_v9, %v3787_v10  ;;  %257 = vmatpush.bf16.msra.mxu1 %v3782_v7  ;;  %v3757_v18 = vld [vmem:[#allocation5 + $0x8] sm:$0xf]  ;;  %v5422_v19 = vld [vmem:[#allocation5 + $0x20] sm:$0xf0] }
  0x24   :  { %v3751_v15 = vld [vmem:[#allocation5 + $0x1c] sm:$0xf0]  ;;  %270 = vmatpush.bf16.msra.mxu2 %v3786_v8  ;;  %v3750_v16 = vor.u32 %v5421_v13, %v3749_v11  ;;  %v5419_v20 = vld [vmem:[#allocation5 + $0xc] sm:$0xf]  ;;  %v3758_v21 = vor.u32 %v5422_v19, %v3757_v18  ;;  %v3759_v22 = vld [vmem:[#allocation5 + $0x24] sm:$0xf0] }
  0x25   :  { %v3754_v17 = vor.u32 %v5418_v14, %v3751_v15  ;;  %283 = vmatpush.bf16.msra.mxu3 %v3790_v12  ;;  %v6121_v23 = vld [vmem:[#allocation2] sm:$0xf]  ;;  %v3793_v24 = vld [vmem:[#allocation5 + $0x48] sm:$0xf]  ;;  %v3762_v25 = vor.u32 %v5419_v20, %v3759_v22  ;;  %v5430_v26 = vld [vmem:[#allocation5 + $0x60] sm:$0xf0] }
  0x26   :  { %v5427_v27 = vld [vmem:[#allocation5 + $0x4c] sm:$0xf]  ;;  %v3795_v28 = vld [vmem:[#allocation5 + $0x64] sm:$0xf0]  ;;  %v3794_v29 = vor.u32 %v5430_v26, %v3793_v24  ;;  %v3801_v31 = vld [vmem:[#allocation5 + $0x50] sm:$0xf] }
  0x27   :  { %245 = vmatpush.bf16.msra.mxu0 %v3750_v16  ;;  %v3798_v30 = vor.u32 %v5427_v27, %v3795_v28  ;;  %v5431_v32 = vld [vmem:[#allocation5 + $0x68] sm:$0xf0]  ;;  %v3765_v33 = vld [vmem:[#allocation5 + $0x10] sm:$0xf]  ;;  %258 = vmatpush.bf16.msra.mxu1 %v3754_v17  ;;  %v5420_v36 = vld [vmem:[#allocation5 + $0x14] sm:$0xf] }
  0x28   :  { %271 = vmatpush.bf16.msra.mxu2 %v3758_v21  ;;  %v3802_v34 = vor.u32 %v5431_v32, %v3801_v31  ;;  %v5423_v35 = vld [vmem:[#allocation5 + $0x28] sm:$0xf0]  ;;  %v3767_v37 = vld [vmem:[#allocation5 + $0x2c] sm:$0xf0]  ;;  %v3773_v39 = vld [vmem:[#allocation5 + $0x18] sm:$0xf] }
  0x29   :  { %284 = vmatpush.bf16.msra.mxu3 %v3762_v25  ;;  %v3766_v38 = vor.u32 %v5423_v35, %v3765_v33  ;;  %v5424_v40 = vld [vmem:[#allocation5 + $0x30] sm:$0xf0]  ;;  %v4008_v41 = vld [vmem:[#allocation8 + $0x188] sm:$0xf]  ;;  %v3770_v42 = vor.u32 %v5420_v36, %v3767_v37  ;;  %v5484_v43 = vld [vmem:[#allocation8 + $0x1a0] sm:$0xf0] }
  0x2a   :  { %3803 = vmatmul.msk.bf16.vlgmr.msra.gmra.mxu0 %vm234_vm0, %v6121_v23  ;;  %v4232_v44 = vld [vmem:[#allocation8 + $0x348] sm:$0xf]  ;;  %v5540_v45 = vld [vmem:[#allocation8 + $0x360] sm:$0xf0]  ;;  %3804 = vmatmul.msk.bf16.vlgmr.msra.gmra.mxu1 %vm234_vm0, %v6121_v23  ;;  %v4009_v46 = vor.u32 %v5484_v43, %v4008_v41  ;;  %v3980_v48 = vld [vmem:[#allocation8 + $0x150] sm:$0xf]  ;;  %v3774_v51 = vor.u32 %v5424_v40, %v3773_v39 }
  0x2b   :  { %296 = vmatpush.bf16.msrb.mxu0 %v3794_v29  ;;  %309 = vmatpush.bf16.msrb.mxu1 %v3798_v30  ;;  %v4233_v47 = vor.u32 %v5540_v45, %v4232_v44  ;;  %v5477_v49 = vld [vmem:[#allocation8 + $0x168] sm:$0xf0]  ;;  %v4204_v50 = vld [vmem:[#allocation8 + $0x310] sm:$0xf]  ;;  %v4680_v53 = vld [vmem:[#allocation8 + $0x6c8] sm:$0xf] }
  0x2c   :  { %3805 = vmatmul.msk.bf16.vlgmr.msra.gmra.mxu2 %vm234_vm0, %v6121_v23  ;;  %3806 = vmatmul.msk.bf16.vlgmr.msra.gmra.mxu3 %vm234_vm0, %v6121_v23  ;;  %v5533_v52 = vld [vmem:[#allocation8 + $0x328] sm:$0xf0]  ;;  %v5652_v54 = vld [vmem:[#allocation8 + $0x6e0] sm:$0xf0]  ;;  %v3981_v55 = vor.u32 %v5477_v49, %v3980_v48  ;;  %v3952_v57 = vld [vmem:[#allocation8 + $0x118] sm:$0xf] }
  0x2d   :  { %322 = vmatpush.bf16.msrb.mxu2 %v3802_v34  ;;  %2569 = vmatpush.bf16.msrb.mxu3 %v4009_v46  ;;  %v4681_v56 = vor.u32 %v5652_v54, %v4680_v53  ;;  %v4205_v58 = vor.u32 %v5533_v52, %v4204_v50  ;;  %v5470_v59 = vld [vmem:[#allocation8 + $0x130] sm:$0xf0]  ;;  %v4652_v60 = vld [vmem:[#allocation8 + $0x690] sm:$0xf]  ;;  %v5645_v61 = vld [vmem:[#allocation8 + $0x6a8] sm:$0xf0] }
  0x2e   :  { %v4176_v62 = vld [vmem:[#allocation8 + $0x2d8] sm:$0xf]  ;;  %v5526_v63 = vld [vmem:[#allocation8 + $0x2f0] sm:$0xf0]  ;;  %v3953_v0 = vor.u32 %v5470_v59, %v3952_v57  ;;  %v4653_v1 = vor.u32 %v5645_v61, %v4652_v60  ;;  %v3924_v2 = vld [vmem:[#allocation8 + $0xe0] sm:$0xf] }
  0x2f   :  { %297 = vmatpush.bf16.msrb.mxu0 %v3766_v38  ;;  %310 = vmatpush.bf16.msrb.mxu1 %v3770_v42  ;;  %v4177_v3 = vor.u32 %v5526_v63, %v4176_v62  ;;  %v5463_v4 = vld [vmem:[#allocation8 + $0xf8] sm:$0xf0]  ;;  %v4624_v5 = vld [vmem:[#allocation8 + $0x658] sm:$0xf]  ;;  %v5638_v6 = vld [vmem:[#allocation8 + $0x670] sm:$0xf0] }
  0x30   :  { %v3925_v7 = vor.u32 %v5463_v4, %v3924_v2  ;;  %v4148_v8 = vld [vmem:[#allocation8 + $0x2a0] sm:$0xf]  ;;  %v5519_v9 = vld [vmem:[#allocation8 + $0x2b8] sm:$0xf0]  ;;  %v4625_v10 = vor.u32 %v5638_v6, %v4624_v5  ;;  %v3896_v11 = vld [vmem:[#allocation8 + $0xa8] sm:$0xf] }
  0x31   :  { %323 = vmatpush.bf16.msrb.mxu2 %v3774_v51  ;;  %2570 = vmatpush.bf16.msrb.mxu3 %v3981_v55  ;;  %v5456_v12 = vld [vmem:[#allocation8 + $0xc0] sm:$0xf0]  ;;  %v4596_v13 = vld [vmem:[#allocation8 + $0x620] sm:$0xf]  ;;  %v5631_v14 = vld [vmem:[#allocation8 + $0x638] sm:$0xf0]  ;;  %v4149_v15 = vor.u32 %v5519_v9, %v4148_v8 }
  0x32   :  { %v4120_v16 = vld [vmem:[#allocation8 + $0x268] sm:$0xf]  ;;  %v5512_v17 = vld [vmem:[#allocation8 + $0x280] sm:$0xf0]  ;;  %v3897_v18 = vor.u32 %v5456_v12, %v3896_v11  ;;  %v4597_v19 = vor.u32 %v5631_v14, %v4596_v13  ;;  %v3868_v20 = vld [vmem:[#allocation8 + $0x70] sm:$0xf] }
  0x33   :  { %2582 = vmatpush.bf16.msra.mxu0 %v4233_v47  ;;  %v5449_v21 = vld [vmem:[#allocation8 + $0x88] sm:$0xf0]  ;;  %v4456_v22 = vld [vmem:[#allocation8 + $0x508] sm:$0xf]  ;;  %v5624_v25 = vld [vmem:[#allocation8 + $0x600] sm:$0xf0]  ;;  %v4121_v28 = vor.u32 %v5512_v17, %v4120_v16 }
  0x34   :  { %v4568_v24 = vld [vmem:[#allocation8 + $0x5e8] sm:$0xf]  ;;  %v5596_v26 = vld [vmem:[#allocation8 + $0x520] sm:$0xf0]  ;;  %v4428_v29 = vld [vmem:[#allocation8 + $0x4d0] sm:$0xf]  ;;  %v3869_v31 = vor.u32 %v5449_v21, %v3868_v20 }
  0x35   :  { %2608 = vmatpush.bf16.msra.mxu2 %v4681_v56  ;;  %2571 = vmatpush.bf16.msrb.mxu3 %v3953_v0  ;;  %v4457_v27 = vor.u32 %v5596_v26, %v4456_v22  ;;  %v5589_v30 = vld [vmem:[#allocation8 + $0x4e8] sm:$0xf0]  ;;  %v4092_v32 = vld [vmem:[#allocation8 + $0x230] sm:$0xf]  ;;  %v4569_v34 = vor.u32 %v5624_v25, %v4568_v24  ;;  %v3840_v35 = vld [vmem:[#allocation8 + $0x38] sm:$0xf] }
  0x36   :  { %v5505_v33 = vld [vmem:[#allocation8 + $0x248] sm:$0xf0]  ;;  %v5442_v36 = vld [vmem:[#allocation8 + $0x50] sm:$0xf0]  ;;  %v4540_v37 = vld [vmem:[#allocation8 + $0x5b0] sm:$0xf]  ;;  %v4429_v39 = vor.u32 %v5589_v30, %v4428_v29 }
  0x37   :  { %2583 = vmatpush.bf16.msra.mxu0 %v4205_v58  ;;  %v5617_v38 = vld [vmem:[#allocation8 + $0x5c8] sm:$0xf0]  ;;  %2595 = vmatpush.bf16.msra.mxu1 %v4457_v27  ;;  %v4400_v40 = vld [vmem:[#allocation8 + $0x498] sm:$0xf]  ;;  %v5582_v42 = vld [vmem:[#allocation8 + $0x4b0] sm:$0xf0]  ;;  %v3841_v43 = vor.u32 %v5442_v36, %v3840_v35 }
  0x38   :  { %v4064_v41 = vld [vmem:[#allocation8 + $0x1f8] sm:$0xf]  ;;  %v5498_v44 = vld [vmem:[#allocation8 + $0x210] sm:$0xf0]  ;;  %v4541_v45 = vor.u32 %v5617_v38, %v4540_v37  ;;  %v3812_v46 = vld [vmem:[#allocation8] sm:$0xf]  ;;  %v4401_v51 = vor.u32 %v5582_v42, %v4400_v40 }
  0x39   :  { %2609 = vmatpush.bf16.msra.mxu2 %v4653_v1  ;;  %2572 = vmatpush.bf16.msrb.mxu3 %v3925_v7  ;;  %v5435_v47 = vld [vmem:[#allocation8 + $0x18] sm:$0xf0]  ;;  %v4904_v48 = vld [vmem:[#allocation8 + $0x888] sm:$0xf]  ;;  %v4512_v49 = vld [vmem:[#allocation8 + $0x578] sm:$0xf]  ;;  %v4065_v55 = vor.u32 %v5498_v44, %v4064_v41 }
  0x3a   :  { %3807 = vmatmul.msk.bf16.vlgmr.msrb.gmra.mxu0 %vm234_vm0, %v6121_v23  ;;  %3808 = vmatmul.msk.bf16.vlgmr.msrb.gmra.mxu1 %vm234_vm0, %v6121_v23  ;;  %v5610_v50 = vld [vmem:[#allocation8 + $0x590] sm:$0xf0]  ;;  %v5708_v52 = vld [vmem:[#allocation8 + $0x8a0] sm:$0xf0]  ;;  %v4372_v53 = vld [vmem:[#allocation8 + $0x460] sm:$0xf]  ;;  %v3813_v58 = vor.u32 %v5435_v47, %v3812_v46 }
  0x3b   :  { %2584 = vmatpush.bf16.msra.mxu0 %v4177_v3  ;;  %2596 = vmatpush.bf16.msra.mxu1 %v4429_v39  ;;  %v5575_v54 = vld [vmem:[#allocation8 + $0x478] sm:$0xf0]  ;;  %v4036_v56 = vld [vmem:[#allocation8 + $0x1c0] sm:$0xf]  ;;  %v5128_v59 = vld [vmem:[#allocation8 + $0xa48] sm:$0xf]  ;;  %v4513_v61 = vor.u32 %v5610_v50, %v4512_v49  ;;  %v4905_v63 = vor.u32 %v5708_v52, %v4904_v48 }
  0x3c   :  { %3809 = vmatmul.msk.bf16.vlgmr.msrb.gmra.mxu2 %vm234_vm0, %v6121_v23  ;;  %v4093_v23 = vor.u32 %v5505_v33, %v4092_v32  ;;  %v5491_v57 = vld [vmem:[#allocation8 + $0x1d8] sm:$0xf0]  ;;  %v5764_v60 = vld [vmem:[#allocation8 + $0xa60] sm:$0xf0]  ;;  %v4876_v62 = vld [vmem:[#allocation8 + $0x850] sm:$0xf]  ;;  %v4373_v2 = vor.u32 %v5575_v54, %v4372_v53 }
  0x3d   :  { %2610 = vmatpush.bf16.msra.mxu2 %v4625_v10  ;;  %2573 = vmatpush.bf16.msrb.mxu3 %v3897_v18  ;;  %v4484_v0 = vld [vmem:[#allocation8 + $0x540] sm:$0xf]  ;;  %v5603_v1 = vld [vmem:[#allocation8 + $0x558] sm:$0xf0]  ;;  %v5701_v3 = vld [vmem:[#allocation8 + $0x868] sm:$0xf0]  ;;  %v4037_v6 = vor.u32 %v5491_v57, %v4036_v56  ;;  %v5129_v9 = vor.u32 %v5764_v60, %v5128_v59 }
  0x3e   :  { %v5481_v4 = vld [vmem:[#allocation8 + $0x18c] sm:$0xf]  ;;  %v4010_v5 = vld [vmem:[#allocation8 + $0x1a4] sm:$0xf0]  ;;  %v5568_v8 = vld [vmem:[#allocation8 + $0x440] sm:$0xf0]  ;;  %v4485_v10 = vor.u32 %v5603_v1, %v4484_v0  ;;  %v4877_v11 = vor.u32 %v5701_v3, %v4876_v62 }
  0x3f   :  { %2585 = vmatpush.bf16.msra.mxu0 %v4149_v15  ;;  %2597 = vmatpush.bf16.msra.mxu1 %v4401_v51  ;;  %v4344_v7 = vld [vmem:[#allocation8 + $0x428] sm:$0xf]  ;;  %v5100_v12 = vld [vmem:[#allocation8 + $0xa10] sm:$0xf]  ;;  %v5757_v13 = vld [vmem:[#allocation8 + $0xa28] sm:$0xf0]  ;;  %v4013_v14 = vor.u32 %v5481_v4, %v4010_v5 }
  0x40   :  { %v4848_v15 = vld [vmem:[#allocation8 + $0x818] sm:$0xf]  ;;  %v5694_v16 = vld [vmem:[#allocation8 + $0x830] sm:$0xf0]  ;;  %v3982_v18 = vld [vmem:[#allocation8 + $0x16c] sm:$0xf0]  ;;  %v5101_v20 = vor.u32 %v5757_v13, %v5100_v12 }
  0x41   :  { %2611 = vmatpush.bf16.msra.mxu2 %v4597_v19  ;;  %2574 = vmatpush.bf16.msrb.mxu3 %v3869_v31  ;;  %v5474_v17 = vld [vmem:[#allocation8 + $0x154] sm:$0xf]  ;;  %v4345_v19 = vor.u32 %v5568_v8, %v4344_v7  ;;  %v4849_v21 = vor.u32 %v5694_v16, %v4848_v15  ;;  %v5072_v22 = vld [vmem:[#allocation8 + $0x9d8] sm:$0xf]  ;;  %v4820_v26 = vld [vmem:[#allocation8 + $0x7e0] sm:$0xf] }
  0x42   :  { %v5750_v24 = vld [vmem:[#allocation8 + $0x9f0] sm:$0xf0]  ;;  %v3985_v25 = vor.u32 %v5474_v17, %v3982_v18  ;;  %v5687_v27 = vld [vmem:[#allocation8 + $0x7f8] sm:$0xf0]  ;;  %v3954_v29 = vld [vmem:[#allocation8 + $0x134] sm:$0xf0] }
  0x43   :  { %2586 = vmatpush.bf16.msra.mxu0 %v4121_v28  ;;  %2598 = vmatpush.bf16.msra.mxu1 %v4373_v2  ;;  %v5467_v28 = vld [vmem:[#allocation8 + $0x11c] sm:$0xf]  ;;  %v5073_v30 = vor.u32 %v5750_v24, %v5072_v22  ;;  %v4821_v31 = vor.u32 %v5687_v27, %v4820_v26  ;;  %v5044_v32 = vld [vmem:[#allocation8 + $0x9a0] sm:$0xf]  ;;  %v4792_v35 = vld [vmem:[#allocation8 + $0x7a8] sm:$0xf] }
  0x44   :  { %v5743_v33 = vld [vmem:[#allocation8 + $0x9b8] sm:$0xf0]  ;;  %v5680_v36 = vld [vmem:[#allocation8 + $0x7c0] sm:$0xf0]  ;;  %v3926_v38 = vld [vmem:[#allocation8 + $0xfc] sm:$0xf0] }
  0x45   :  { %2612 = vmatpush.bf16.msra.mxu2 %v4569_v34  ;;  %2575 = vmatpush.bf16.msrb.mxu3 %v3841_v43  ;;  %v3957_v34 = vor.u32 %v5467_v28, %v3954_v29  ;;  %v5460_v37 = vld [vmem:[#allocation8 + $0xe4] sm:$0xf]  ;;  %v5045_v39 = vor.u32 %v5743_v33, %v5044_v32  ;;  %v4793_v40 = vor.u32 %v5680_v36, %v4792_v35  ;;  %v4764_v44 = vld [vmem:[#allocation8 + $0x770] sm:$0xf]  ;;  %v5729_v48 = vld [vmem:[#allocation8 + $0x948] sm:$0xf0] }
  0x46   :  { %v5736_v41 = vld [vmem:[#allocation8 + $0x980] sm:$0xf0]  ;;  %v3929_v42 = vor.u32 %v5460_v37, %v3926_v38  ;;  %v4988_v46 = vld [vmem:[#allocation8 + $0x930] sm:$0xf]  ;;  %v5561_v50 = vld [vmem:[#allocation8 + $0x408] sm:$0xf0] }
  0x47   :  { %2587 = vmatpush.bf16.msra.mxu0 %v4093_v23  ;;  %2599 = vmatpush.bf16.msra.mxu1 %v4345_v19  ;;  %v5016_v23 = vld [vmem:[#allocation8 + $0x968] sm:$0xf]  ;;  %v4316_v49 = vld [vmem:[#allocation8 + $0x3f0] sm:$0xf]  ;;  %v4989_v51 = vor.u32 %v5729_v48, %v4988_v46  ;;  %v5453_v53 = vld [vmem:[#allocation8 + $0xac] sm:$0xf] }
  0x48   :  { %v5017_v43 = vor.u32 %v5736_v41, %v5016_v23  ;;  %v4317_v52 = vor.u32 %v5561_v50, %v4316_v49  ;;  %v3898_v54 = vld [vmem:[#allocation8 + $0xc4] sm:$0xf0]  ;;  %v4736_v56 = vld [vmem:[#allocation8 + $0x738] sm:$0xf]  ;;  %v5666_v57 = vld [vmem:[#allocation8 + $0x750] sm:$0xf0] }
  0x49   :  { %2613 = vmatpush.bf16.msra.mxu2 %v4541_v45  ;;  %2576 = vmatpush.bf16.msrb.mxu3 %v3813_v58  ;;  %v5673_v45 = vld [vmem:[#allocation8 + $0x788] sm:$0xf0]  ;;  %v4960_v58 = vld [vmem:[#allocation8 + $0x8f8] sm:$0xf]  ;;  %v4737_v59 = vor.u32 %v5666_v57, %v4736_v56  ;;  %v5722_v60 = vld [vmem:[#allocation8 + $0x910] sm:$0xf0] }
  0x4a   :  { %v4765_v47 = vor.u32 %v5673_v45, %v4764_v44  ;;  %v5554_v62 = vld [vmem:[#allocation8 + $0x3d0] sm:$0xf0]  ;;  %v3870_v2 = vld [vmem:[#allocation8 + $0x8c] sm:$0xf0]  ;;  %v4708_v4 = vld [vmem:[#allocation8 + $0x700] sm:$0xf] }
  0x4b   :  { %2588 = vmatpush.bf16.msra.mxu0 %v4065_v55  ;;  %v3901_v55 = vor.u32 %v5453_v53, %v3898_v54  ;;  %2600 = vmatpush.bf16.msra.mxu1 %v4317_v52  ;;  %v5446_v1 = vld [vmem:[#allocation8 + $0x74] sm:$0xf]  ;;  %v5659_v5 = vld [vmem:[#allocation8 + $0x718] sm:$0xf0]  ;;  %v4932_v7 = vld [vmem:[#allocation8 + $0x8c0] sm:$0xf] }
  0x4c   :  { %v3873_v3 = vor.u32 %v5446_v1, %v3870_v2  ;;  %v5715_v8 = vld [vmem:[#allocation8 + $0x8d8] sm:$0xf0]  ;;  %v5184_v13 = vld [vmem:[#allocation8 + $0xab8] sm:$0xf]  ;;  %v5156_v19 = vld [vmem:[#allocation8 + $0xa80] sm:$0xf] }
  0x4d   :  { %2614 = vmatpush.bf16.msra.mxu2 %v4513_v61  ;;  %2621 = vmatpush.bf16.msra.mxu3 %v4905_v63  ;;  %v4288_v61 = vld [vmem:[#allocation8 + $0x3b8] sm:$0xf]  ;;  %v4961_v63 = vor.u32 %v5722_v60, %v4960_v58  ;;  %v5439_v15 = vld [vmem:[#allocation8 + $0x3c] sm:$0xf]  ;;  %v5432_v22 = vld [vmem:[#allocation8 + $0x4] sm:$0xf] }
  0x4e   :  { %v4289_v0 = vor.u32 %v5554_v62, %v4288_v61  ;;  %v3842_v16 = vld [vmem:[#allocation8 + $0x54] sm:$0xf0]  ;;  %v3814_v24 = vld [vmem:[#allocation8 + $0x1c] sm:$0xf0]  ;;  %v5593_v35 = vld [vmem:[#allocation8 + $0x50c] sm:$0xf] }
  0x4f   :  { %2589 = vmatpush.bf16.msra.mxu0 %v4037_v6  ;;  %v4709_v6 = vor.u32 %v5659_v5, %v4708_v4  ;;  %v3845_v18 = vor.u32 %v5439_v15, %v3842_v16  ;;  %v6137_v26 = vld [vmem:[#allocation7] sm:$0x7f]  ;;  %v4458_v36 = vld [vmem:[#allocation8 + $0x524] sm:$0xf0]  ;;  %v5649_v38 = vld [vmem:[#allocation8 + $0x6cc] sm:$0xf] }
  0x50   :  { %2601 = vmatpush.bf16.msra.mxu1 %v4289_v0  ;;  %v148_v27 = vperm.slane %v6137_v26, 0  ;;  %v149_v28 = vperm.slane %v6137_v26, 1  ;;  %v150_v33 = vperm.slane %v6137_v26, 2  ;;  %v151_v23 = vperm.slane %v6137_v26, 3  ;;  %v5586_v46 = vld [vmem:[#allocation8 + $0x4d4] sm:$0xf] }
  0x51   :  { %2615 = vmatpush.bf16.msra.mxu2 %v4485_v10  ;;  %2622 = vmatpush.bf16.msra.mxu3 %v4877_v11  ;;  %v4933_v10 = vor.u32 %v5715_v8, %v4932_v7  ;;  %v5547_v11 = vld [vmem:[#allocation8 + $0x398] sm:$0xf0]  ;;  %v5642_v52 = vld [vmem:[#allocation8 + $0x694] sm:$0xf]  ;;  %v4654_v53 = vld [vmem:[#allocation8 + $0x6ac] sm:$0xf0] }
  0x52   :  { %v5537_v56 = vld [vmem:[#allocation8 + $0x34c] sm:$0xf]  ;;  %v4234_v57 = vld [vmem:[#allocation8 + $0x364] sm:$0xf0]  ;;  %v5579_v0 = vld [vmem:[#allocation8 + $0x49c] sm:$0xf] }
  0x53   :  { %2634 = vmatpush.bf16.msrb.mxu0 %v5129_v9  ;;  %v4260_v9 = vld [vmem:[#allocation8 + $0x380] sm:$0xf]  ;;  %v5705_v60 = vld [vmem:[#allocation8 + $0x88c] sm:$0xf]  ;;  %v4906_v61 = vld [vmem:[#allocation8 + $0x8a4] sm:$0xf0] }
  0x54   :  { %v4261_v12 = vor.u32 %v5547_v11, %v4260_v9  ;;  %v4402_v1 = vld [vmem:[#allocation8 + $0x4b4] sm:$0xf0]  ;;  %v152_v7 = vperm.slane %v6137_v26, 4  ;;  %v153_v8 = vperm.slane %v6137_v26, 5  ;;  %s3732_s6 = sshll.u32 %s6059_s4, 4  ;;  %s3734_s14 = sshll.u32 %s6283_s7, 4  ;;  %s3733_s6 = int_to_ptr.vmem [resolvable:$true] %s3732_s6  ;;  %s3735_s14 = int_to_ptr.hbm [resolvable:$true] %s3734_s14 }
  0x55   :  { %2660 = vmatpush.bf16.msrb.mxu2 %v4013_v14  ;;  %2623 = vmatpush.bf16.msra.mxu3 %v4849_v21  ;;  %v5778_v14 = vld [vmem:[#allocation8 + $0xad0] sm:$0xf0]  ;;  %v4626_v4 = vld [vmem:[#allocation8 + $0x674] sm:$0xf0]  ;;  %v4405_v11 = vor.u32 %v5579_v0, %v4402_v1 }
  0x56   :  { %2602 = vmatpush.bf16.msra.mxu1 %v4261_v12  ;;  %v5185_v17 = vor.u32 %v5778_v14, %v5184_v13  ;;  %v5530_v12 = vld [vmem:[#allocation8 + $0x314] sm:$0xf]  ;;  %v4206_v13 = vld [vmem:[#allocation8 + $0x32c] sm:$0xf0] }
  0x57   :  { %2635 = vmatpush.bf16.msrb.mxu0 %v5101_v20  ;;  %v5771_v20 = vld [vmem:[#allocation8 + $0xa98] sm:$0xf0]  ;;  %v5698_v14 = vld [vmem:[#allocation8 + $0x854] sm:$0xf] }
  0x58   :  { %v5157_v21 = vor.u32 %v5771_v20, %v5156_v19  ;;  %v5572_v19 = vld [vmem:[#allocation8 + $0x464] sm:$0xf]  ;;  %v4374_v20 = vld [vmem:[#allocation8 + $0x47c] sm:$0xf0] }
  0x59   :  { %2661 = vmatpush.bf16.msrb.mxu2 %v3985_v25  ;;  %2624 = vmatpush.bf16.msra.mxu3 %v4821_v31  ;;  %v3817_v25 = vor.u32 %v5432_v22, %v3814_v24  ;;  %v5628_v24 = vld [vmem:[#allocation8 + $0x624] sm:$0xf] }
  0x5a   :  { %2653 = vmatpush.bf16.msrb.mxu1 %v5185_v17 }
  0x5b   :  { %2636 = vmatpush.bf16.msrb.mxu0 %v5073_v30 }
  0x5d   :  { %2662 = vmatpush.bf16.msrb.mxu2 %v3957_v34  ;;  %2625 = vmatpush.bf16.msra.mxu3 %v4793_v40 }
  0x5e   :  { %2654 = vmatpush.bf16.msrb.mxu1 %v5157_v21 }
  0x5f   :  { %2637 = vmatpush.bf16.msrb.mxu0 %v5045_v39  ;;  %v4682_v39 = vld [vmem:[#allocation8 + $0x6e4] sm:$0xf0] }
  0x60   :  { %v4685_v45 = vor.u32 %v5649_v38, %v4682_v39 }
  0x61   :  { %2663 = vmatpush.bf16.msrb.mxu2 %v3929_v42  ;;  %2626 = vmatpush.bf16.msra.mxu3 %v4765_v47  ;;  %v4461_v42 = vor.u32 %v5593_v35, %v4458_v36  ;;  %v4430_v47 = vld [vmem:[#allocation8 + $0x4ec] sm:$0xf0]  ;;  %v154_v35 = vperm.slane %v6137_v26, 6  ;;  %v5691_v36 = vld [vmem:[#allocation8 + $0x81c] sm:$0xf] }
  0x63   :  { %2638 = vmatpush.bf16.msrb.mxu0 %v5017_v43 }
  0x65   :  { %2664 = vmatpush.bf16.msrb.mxu2 %v3901_v55  ;;  %2627 = vmatpush.bf16.msra.mxu3 %v4737_v59  ;;  %v4433_v59 = vor.u32 %v5586_v46, %v4430_v47 }
  0x67   :  { %2639 = vmatpush.bf16.msrb.mxu0 %v4989_v51 }
  0x69   :  { %2665 = vmatpush.bf16.msrb.mxu2 %v3873_v3  ;;  %2628 = vmatpush.bf16.msra.mxu3 %v4709_v6  ;;  %v5635_v3 = vld [vmem:[#allocation8 + $0x65c] sm:$0xf]  ;;  %v4237_v6 = vor.u32 %v5537_v56, %v4234_v57  ;;  %v4822_v56 = vld [vmem:[#allocation8 + $0x7fc] sm:$0xf0]  ;;  %v5558_v57 = vld [vmem:[#allocation8 + $0x3f4] sm:$0xf] }
  0x6a   :  { %v4629_v17 = vor.u32 %v5635_v3, %v4626_v4  ;;  %v5509_v4 = vld [vmem:[#allocation8 + $0x26c] sm:$0xf] }
  0x6b   :  { %2640 = vmatpush.bf16.msrb.mxu0 %v4961_v63  ;;  %v4657_v63 = vor.u32 %v5642_v52, %v4654_v53 }
  0x6d   :  { %2666 = vmatpush.bf16.msrb.mxu2 %v3845_v18  ;;  %v4878_v18 = vld [vmem:[#allocation8 + $0x86c] sm:$0xf0] }
  0x6f   :  { %2641 = vmatpush.bf16.msrb.mxu0 %v4933_v10  ;;  %v4909_v10 = vor.u32 %v5705_v60, %v4906_v61  ;;  %v4318_v60 = vld [vmem:[#allocation8 + $0x40c] sm:$0xf0]  ;;  %v5614_v61 = vld [vmem:[#allocation8 + $0x5b4] sm:$0xf] }
  0x71   :  { %2667 = vmatpush.bf16.msrb.mxu2 %v3817_v25  ;;  %v4598_v25 = vld [vmem:[#allocation8 + $0x63c] sm:$0xf0] }
  0x72   :  { %v4601_v39 = vor.u32 %v5628_v24, %v4598_v25 }
  0xa7   :  { %v247_v29 = vpop.f32.mrf.mxu0  ;;  %v260_v31 = vpop.f32.mrf.mxu1 }
  0xa8   :  { %v248_v30 = vadd.f32 %v247_v29, %v148_v27  ;;  %v261_v32 = vadd.f32 %v260_v31, %v149_v28  ;;  %v4209_v29 = vor.u32 %v5530_v12, %v4206_v13  ;;  %v4178_v31 = vld [vmem:[#allocation8 + $0x2f4] sm:$0xf0] }
  0xa9   :  { %v4290_v13 = vld [vmem:[#allocation8 + $0x3d4] sm:$0xf0] }
  0xaa   :  { %v329_v34 = vmul.f32 0.01, %v248_v30  ;;  %v330_v37 = vmul.f32 0.01, %v261_v32 }
  0xac   :  { %v336_v40 = vmax.f32 %v248_v30, %v329_v34  ;;  %v337_v41 = vmax.f32 %v261_v32, %v330_v37  ;;  %v5523_v30 = vld [vmem:[#allocation8 + $0x2dc] sm:$0xf]  ;;  %v4377_v34 = vor.u32 %v5572_v19, %v4374_v20  ;;  %v4850_v37 = vld [vmem:[#allocation8 + $0x834] sm:$0xf0]  ;;  %v5502_v20 = vld [vmem:[#allocation8 + $0x234] sm:$0xf] }
  0xad   :  { %v4181_v46 = vor.u32 %v5523_v30, %v4178_v31  ;;  %v4262_v30 = vld [vmem:[#allocation8 + $0x39c] sm:$0xf0]  ;;  %v5600_v31 = vld [vmem:[#allocation8 + $0x544] sm:$0xf] }
  0xae   :  { %v6143_v43 = vpack.c.bf16 %v336_v40, %v336_v40  ;;  %v6145_v48 = vpack.c.bf16 %v337_v41, %v337_v41  ;;  %v5565_v40 = vld [vmem:[#allocation8 + $0x42c] sm:$0xf] }
  0xaf   :  { %v273_v44 = vpop.f32.mrf.mxu2  ;;  %v286_v50 = vpop.f32.mrf.mxu3 }
  0xb0   :  { %v274_v49 = vadd.f32 %v273_v44, %v150_v33  ;;  %v249_v51 = vpop.f32.mrf.mxu0  ;;  %v287_v54 = vadd.f32 %v286_v50, %v151_v23  ;;  %v262_v55 = vpop.f32.mrf.mxu1  ;;  %2577 = vmatmul.bf16.vlgmr.msrb.gmra.mxu3 %v6143_v43  ;;  %2590 = vmatmul.bf16.vlgmr.msra.gmra.mxu0 %v6145_v48  ;;  %v4881_v33 = vor.u32 %v5698_v14, %v4878_v18  ;;  %v4346_v23 = vld [vmem:[#allocation8 + $0x444] sm:$0xf0]  ;;  %v5516_v50 = vld [vmem:[#allocation8 + $0x2a4] sm:$0xf]  ;;  %v5607_v14 = vld [vmem:[#allocation8 + $0x57c] sm:$0xf] }
  0xb1   :  { %2686 = vmatpush.bf16.msrb.mxu3 %v4461_v42  ;;  %2699 = vmatpush.bf16.msra.mxu0 %v4685_v45  ;;  %v5621_v42 = vld [vmem:[#allocation8 + $0x5ec] sm:$0xf]  ;;  %v4570_v44 = vld [vmem:[#allocation8 + $0x604] sm:$0xf0]  ;;  %v4150_v51 = vld [vmem:[#allocation8 + $0x2bc] sm:$0xf0]  ;;  %v4349_v53 = vor.u32 %v5565_v40, %v4346_v23 }
  0xb2   :  { %v331_v58 = vmul.f32 0.01, %v274_v49  ;;  %v332_v62 = vmul.f32 0.01, %v287_v54  ;;  %v5684_v55 = vld [vmem:[#allocation8 + $0x7e4] sm:$0xf]  ;;  %v4153_v0 = vor.u32 %v5516_v50, %v4150_v51 }
  0xb3   :  { %v4825_v3 = vor.u32 %v5684_v55, %v4822_v56  ;;  %v4066_v40 = vld [vmem:[#allocation8 + $0x214] sm:$0xf0]  ;;  %v5656_v56 = vld [vmem:[#allocation8 + $0x704] sm:$0xf] }
  0xb4   :  { %v338_v2 = vmax.f32 %v274_v49, %v331_v58  ;;  %v339_v5 = vmax.f32 %v287_v54, %v332_v62  ;;  %v4853_v49 = vor.u32 %v5691_v36, %v4850_v37  ;;  %v4573_v54 = vor.u32 %v5621_v42, %v4570_v44  ;;  %v4542_v62 = vld [vmem:[#allocation8 + $0x5cc] sm:$0xf0]  ;;  %v5485_v37 = vld [vmem:[#allocation8 + $0x1a8] sm:$0xf0]  ;;  %v5663_v42 = vld [vmem:[#allocation8 + $0x73c] sm:$0xf] }
  0xb5   :  { %2687 = vmatpush.bf16.msrb.mxu3 %v4433_v59  ;;  %2700 = vmatpush.bf16.msra.mxu0 %v4657_v63  ;;  %v4016_v36 = vld [vmem:[#allocation8 + $0x190] sm:$0xf]  ;;  %v4738_v44 = vld [vmem:[#allocation8 + $0x754] sm:$0xf0] }
  0xb6   :  { %v6151_v9 = vpack.c.bf16 %v338_v2, %v338_v2  ;;  %v6153_v15 = vpack.c.bf16 %v339_v5, %v339_v5  ;;  %v4122_v5 = vld [vmem:[#allocation8 + $0x284] sm:$0xf0]  ;;  %v3988_v50 = vld [vmem:[#allocation8 + $0x158] sm:$0xf]  ;;  %v4741_v55 = vor.u32 %v5663_v42, %v4738_v44 }
  0xb7   :  { %v275_v16 = vpop.f32.mrf.mxu2  ;;  %v288_v21 = vpop.f32.mrf.mxu3  ;;  %v4156_v44 = vld [vmem:[#allocation8 + $0x2a8] sm:$0xf] }
  0xb8   :  { %2603 = vmatmul.bf16.vlgmr.msra.gmra.mxu1 %v6151_v9  ;;  %v299_v22 = vpop.f32.mrf.mxu0  ;;  %2616 = vmatmul.bf16.vlgmr.msra.gmra.mxu2 %v6153_v15  ;;  %v312_v28 = vpop.f32.mrf.mxu1  ;;  %v4514_v16 = vld [vmem:[#allocation8 + $0x594] sm:$0xf0]  ;;  %v4094_v21 = vld [vmem:[#allocation8 + $0x24c] sm:$0xf0] }
  0xb9   :  { %2673 = vmatpush.bf16.msra.mxu1 %v4237_v6  ;;  %v300_v27 = vadd.f32 %v299_v22, %v152_v7  ;;  %2712 = vmatpush.bf16.msra.mxu2 %v4909_v10  ;;  %v313_v32 = vadd.f32 %v312_v28, %v153_v8  ;;  %v4321_v6 = vor.u32 %v5558_v57, %v4318_v60  ;;  %v5677_v8 = vld [vmem:[#allocation8 + $0x7ac] sm:$0xf]  ;;  %v4794_v10 = vld [vmem:[#allocation8 + $0x7c4] sm:$0xf0]  ;;  %v5670_v22 = vld [vmem:[#allocation8 + $0x774] sm:$0xf] }
  0xba   :  { %2688 = vmatpush.bf16.msrb.mxu3 %v4405_v11  ;;  %2701 = vmatpush.bf16.msra.mxu0 %v4629_v17  ;;  %v4545_v7 = vor.u32 %v5614_v61, %v4542_v62  ;;  %v5551_v11 = vld [vmem:[#allocation8 + $0x3bc] sm:$0xf]  ;;  %v4125_v17 = vor.u32 %v5509_v4, %v4122_v5  ;;  %v4797_v19 = vor.u32 %v5677_v8, %v4794_v10  ;;  %v4464_v57 = vld [vmem:[#allocation8 + $0x510] sm:$0xf]  ;;  %v4710_v60 = vld [vmem:[#allocation8 + $0x71c] sm:$0xf0] }
  0xbb   :  { %v333_v38 = vmul.f32 0.01, %v300_v27  ;;  %v334_v41 = vmul.f32 0.01, %v313_v32  ;;  %v4293_v24 = vor.u32 %v5551_v11, %v4290_v13  ;;  %v4517_v25 = vor.u32 %v5607_v14, %v4514_v16  ;;  %v5761_v61 = vld [vmem:[#allocation8 + $0xa4c] sm:$0xf] }
  0xbc   :  { %v5130_v62 = vld [vmem:[#allocation8 + $0xa64] sm:$0xf0]  ;;  %v3960_v5 = vld [vmem:[#allocation8 + $0x120] sm:$0xf]  ;;  %v4436_v10 = vld [vmem:[#allocation8 + $0x4d8] sm:$0xf] }
  0xbd   :  { %v340_v45 = vmax.f32 %v300_v27, %v333_v38  ;;  %2674 = vmatpush.bf16.msra.mxu1 %v4209_v29  ;;  %v341_v47 = vmax.f32 %v313_v32, %v334_v41  ;;  %2713 = vmatpush.bf16.msra.mxu2 %v4881_v33  ;;  %v4766_v27 = vld [vmem:[#allocation8 + $0x78c] sm:$0xf0]  ;;  %v5544_v29 = vld [vmem:[#allocation8 + $0x384] sm:$0xf]  ;;  %v4486_v32 = vld [vmem:[#allocation8 + $0x55c] sm:$0xf0]  ;;  %v5133_v8 = vor.u32 %v5761_v61, %v5130_v62 }
  0xbe   :  { %2689 = vmatpush.bf16.msrb.mxu3 %v4377_v34  ;;  %2702 = vmatpush.bf16.msra.mxu0 %v4601_v39  ;;  %v5775_v33 = vld [vmem:[#allocation8 + $0xabc] sm:$0xf]  ;;  %v4097_v34 = vor.u32 %v5502_v20, %v4094_v21  ;;  %v4769_v38 = vor.u32 %v5670_v22, %v4766_v27  ;;  %v4265_v23 = vor.u32 %v5544_v29, %v4262_v30  ;;  %v5590_v11 = vld [vmem:[#allocation8 + $0x4f0] sm:$0xf0]  ;;  %v5102_v14 = vld [vmem:[#allocation8 + $0xa2c] sm:$0xf0] }
  0xbf   :  { %v6158_v26 = vpack.c.bf16 %v340_v45, %v340_v45  ;;  %v325_v52 = vpop.f32.mrf.mxu2  ;;  %v6160_v58 = vpack.c.bf16 %v341_v47, %v341_v47  ;;  %v5495_v39 = vld [vmem:[#allocation8 + $0x1fc] sm:$0xf]  ;;  %v4489_v41 = vor.u32 %v5600_v31, %v4486_v32  ;;  %v5768_v47 = vld [vmem:[#allocation8 + $0xa84] sm:$0xf]  ;;  %v5754_v13 = vld [vmem:[#allocation8 + $0xa14] sm:$0xf]  ;;  %v4437_v20 = vor.u32 %v5590_v11, %v4436_v10 }
  0xc0   :  { %v326_v59 = vadd.f32 %v325_v52, %v154_v35  ;;  %v301_v63 = vpop.f32.mrf.mxu0  ;;  %v314_v1 = vpop.f32.mrf.mxu1  ;;  %v5186_v35 = vld [vmem:[#allocation8 + $0xad4] sm:$0xf0]  ;;  %v4069_v51 = vor.u32 %v5495_v39, %v4066_v40  ;;  %v5478_v52 = vld [vmem:[#allocation8 + $0x170] sm:$0xf0]  ;;  %v3932_v21 = vld [vmem:[#allocation8 + $0xe8] sm:$0xf] }
  0xc1   :  { %2675 = vmatpush.bf16.msra.mxu1 %v4181_v46  ;;  %2629 = vmatmul.bf16.vlgmr.msra.gmra.mxu3 %v6158_v26  ;;  %v5189_v45 = vor.u32 %v5775_v33, %v5186_v35  ;;  %v4017_v46 = vor.u32 %v5485_v37, %v4016_v36  ;;  %v4240_v1 = vld [vmem:[#allocation8 + $0x350] sm:$0xf]  ;;  %v5464_v22 = vld [vmem:[#allocation8 + $0x100] sm:$0xf0]  ;;  %v5583_v27 = vld [vmem:[#allocation8 + $0x4b8] sm:$0xf0] }
  0xc2   :  { %v335_v2 = vmul.f32 0.01, %v326_v59  ;;  %2714 = vmatpush.bf16.msra.mxu2 %v4853_v49  ;;  %2642 = vmatmul.bf16.vlgmr.msrb.gmra.mxu0 %v6160_v58  ;;  %v5158_v49 = vld [vmem:[#allocation8 + $0xa9c] sm:$0xf0]  ;;  %v5747_v29 = vld [vmem:[#allocation8 + $0x9dc] sm:$0xf]  ;;  %v3933_v31 = vor.u32 %v5464_v22, %v3932_v21 }
  0xc3   :  { %2690 = vmatpush.bf16.msrb.mxu3 %v4349_v53  ;;  %2703 = vmatpush.bf16.msra.mxu0 %v4573_v54  ;;  %v5488_v53 = vld [vmem:[#allocation8 + $0x1c4] sm:$0xf]  ;;  %v4038_v54 = vld [vmem:[#allocation8 + $0x1dc] sm:$0xf0]  ;;  %v5161_v63 = vor.u32 %v5768_v47, %v5158_v49  ;;  %v5074_v30 = vld [vmem:[#allocation8 + $0x9f4] sm:$0xf0] }
  0xc4   :  { %v342_v12 = vmax.f32 %v326_v59, %v335_v2  ;;  %v5597_v59 = vld [vmem:[#allocation8 + $0x528] sm:$0xf0]  ;;  %v4184_v32 = vld [vmem:[#allocation8 + $0x2e0] sm:$0xf]  ;;  %v5527_v33 = vld [vmem:[#allocation8 + $0x2f8] sm:$0xf0]  ;;  %v5077_v37 = vor.u32 %v5747_v29, %v5074_v30 }
  0xc5   :  { %2676 = vmatpush.bf16.msra.mxu1 %v4153_v0  ;;  %v3989_v0 = vor.u32 %v5478_v52, %v3988_v50  ;;  %v5541_v2 = vld [vmem:[#allocation8 + $0x368] sm:$0xf0]  ;;  %v4465_v4 = vor.u32 %v5597_v59, %v4464_v57  ;;  %v3904_v35 = vld [vmem:[#allocation8 + $0xb0] sm:$0xf]  ;;  %v5576_v39 = vld [vmem:[#allocation8 + $0x480] sm:$0xf0]  ;;  %v4185_v40 = vor.u32 %v5527_v33, %v4184_v32 }
  0xc6   :  { %v6164_v18 = vpack.c.bf16 %v342_v12, %v342_v12  ;;  %2715 = vmatpush.bf16.msra.mxu2 %v4825_v3  ;;  %v4041_v3 = vor.u32 %v5488_v53, %v4038_v54  ;;  %v4241_v12 = vor.u32 %v5541_v2, %v4240_v1  ;;  %v5457_v36 = vld [vmem:[#allocation8 + $0xc8] sm:$0xf0]  ;;  %v3876_v47 = vld [vmem:[#allocation8 + $0x78] sm:$0xf]  ;;  %v5450_v49 = vld [vmem:[#allocation8 + $0x90] sm:$0xf0] }
  0xc7   :  { %2691 = vmatpush.bf16.msrb.mxu3 %v4321_v6  ;;  %2704 = vmatpush.bf16.msra.mxu0 %v4545_v7  ;;  %v327_v28 = vpop.f32.mrf.mxu2  ;;  %v5471_v6 = vld [vmem:[#allocation8 + $0x138] sm:$0xf0]  ;;  %v4713_v7 = vor.u32 %v5656_v56, %v4710_v60  ;;  %v3905_v42 = vor.u32 %v5457_v36, %v3904_v35  ;;  %v5569_v52 = vld [vmem:[#allocation8 + $0x448] sm:$0xf0]  ;;  %v3877_v56 = vor.u32 %v5450_v49, %v3876_v47  ;;  %v4128_v57 = vld [vmem:[#allocation8 + $0x270] sm:$0xf] }
  0xc8   :  { %5210 = vmatmul.msk.bf16.vlgmr.msrb.gmra.mxu1 %vm234_vm0, %v6164_v18  ;;  %2668 = vmatmul.bf16.vlgmr.msrb.gmra.mxu2 %v6143_v43  ;;  %v3961_v16 = vor.u32 %v5471_v6, %v3960_v5  ;;  %v5733_v54 = vld [vmem:[#allocation8 + $0x96c] sm:$0xf]  ;;  %v3848_v61 = vld [vmem:[#allocation8 + $0x40] sm:$0xf]  ;;  %v5443_v62 = vld [vmem:[#allocation8 + $0x58] sm:$0xf0] }
  0xc9   :  { %2677 = vmatpush.bf16.msra.mxu1 %v4125_v17  ;;  %v4212_v17 = vld [vmem:[#allocation8 + $0x318] sm:$0xf]  ;;  %v5513_v59 = vld [vmem:[#allocation8 + $0x288] sm:$0xf0]  ;;  %v5562_v1 = vld [vmem:[#allocation8 + $0x410] sm:$0xf0]  ;;  %v3849_v5 = vor.u32 %v5443_v62, %v3848_v61 }
  0xca   :  { %2716 = vmatpush.bf16.msra.mxu2 %v4797_v19  ;;  %v5534_v19 = vld [vmem:[#allocation8 + $0x330] sm:$0xf0]  ;;  %v4129_v2 = vor.u32 %v5513_v59, %v4128_v57  ;;  %v4100_v6 = vld [vmem:[#allocation8 + $0x238] sm:$0xf]  ;;  %v3820_v10 = vld [vmem:[#allocation8 + $0x8] sm:$0xf] }
  0xcb   :  { %2692 = vmatpush.bf16.msrb.mxu3 %v4293_v24  ;;  %2705 = vmatpush.bf16.msra.mxu0 %v4517_v25  ;;  %v5105_v24 = vor.u32 %v5754_v13, %v5102_v14  ;;  %v4408_v25 = vld [vmem:[#allocation8 + $0x4a0] sm:$0xf]  ;;  %v4213_v28 = vor.u32 %v5534_v19, %v4212_v17  ;;  %v5436_v11 = vld [vmem:[#allocation8 + $0x20] sm:$0xf0]  ;;  %v5555_v14 = vld [vmem:[#allocation8 + $0x3d8] sm:$0xf0] }
  0xcc   :  { %v5709_v17 = vld [vmem:[#allocation8 + $0x8a8] sm:$0xf0]  ;;  %v4962_v21 = vld [vmem:[#allocation8 + $0x914] sm:$0xf0]  ;;  %v3821_v22 = vor.u32 %v5436_v11, %v3820_v10  ;;  %v4268_v29 = vld [vmem:[#allocation8 + $0x388] sm:$0xf] }
  0xcd   :  { %2678 = vmatpush.bf16.msra.mxu1 %v4097_v34  ;;  %v4409_v34 = vor.u32 %v5583_v27, %v4408_v25  ;;  %v5499_v25 = vld [vmem:[#allocation8 + $0x218] sm:$0xf0]  ;;  %v5548_v30 = vld [vmem:[#allocation8 + $0x3a0] sm:$0xf0]  ;;  %v5702_v33 = vld [vmem:[#allocation8 + $0x870] sm:$0xf0] }
  0xce   :  { %2717 = vmatpush.bf16.msra.mxu2 %v4769_v38  ;;  %v4380_v38 = vld [vmem:[#allocation8 + $0x468] sm:$0xf]  ;;  %v4934_v35 = vld [vmem:[#allocation8 + $0x8dc] sm:$0xf0]  ;;  %v5646_v59 = vld [vmem:[#allocation8 + $0x6b0] sm:$0xf0] }
  0xcf   :  { %2693 = vmatpush.bf16.msrb.mxu3 %v4265_v23  ;;  %2706 = vmatpush.bf16.msra.mxu0 %v4489_v41  ;;  %v5740_v23 = vld [vmem:[#allocation8 + $0x9a4] sm:$0xf]  ;;  %v5046_v41 = vld [vmem:[#allocation8 + $0x9bc] sm:$0xf0]  ;;  %v4242_v61 = vld [vmem:[#allocation8 + $0x36c] sm:$0xf0] }
  0xd0   :  { %v5049_v50 = vor.u32 %v5740_v23, %v5046_v41  ;;  %v4688_v23 = vld [vmem:[#allocation8 + $0x6d0] sm:$0xf]  ;;  %v5653_v41 = vld [vmem:[#allocation8 + $0x6e8] sm:$0xf0]  ;;  %v5531_v10 = vld [vmem:[#allocation8 + $0x31c] sm:$0xf] }
  0xd1   :  { %2679 = vmatpush.bf16.msra.mxu1 %v4069_v51  ;;  %v4352_v51 = vld [vmem:[#allocation8 + $0x430] sm:$0xf]  ;;  %v4214_v11 = vld [vmem:[#allocation8 + $0x334] sm:$0xf0] }
  0xd2   :  { %2718 = vmatpush.bf16.msra.mxu2 %v4741_v55  ;;  %2694 = vmatmul.bf16.vlgmr.msrb.gmra.mxu3 %v6151_v9  ;;  %v5018_v55 = vld [vmem:[#allocation8 + $0x984] sm:$0xf0]  ;;  %v4353_v60 = vor.u32 %v5569_v52, %v4352_v51  ;;  %v5695_v51 = vld [vmem:[#allocation8 + $0x838] sm:$0xf0] }
  0xd3   :  { %2744 = vmatpush.bf16.msra.mxu3 %v5189_v45  ;;  %2751 = vmatpush.bf16.msrb.mxu0 %v4017_v46  ;;  %v5520_v45 = vld [vmem:[#allocation8 + $0x2c0] sm:$0xf0]  ;;  %v4381_v46 = vor.u32 %v5576_v39, %v4380_v38  ;;  %v5192_v38 = vld [vmem:[#allocation8 + $0xac0] sm:$0xf]  ;;  %v5779_v39 = vld [vmem:[#allocation8 + $0xad8] sm:$0xf0] }
  0xd4   :  { %2707 = vmatmul.bf16.vlgmr.msra.gmra.mxu0 %v6153_v15  ;;  %v4157_v53 = vor.u32 %v5520_v45, %v4156_v44  ;;  %v5136_v45 = vld [vmem:[#allocation8 + $0xa50] sm:$0xf]  ;;  %v5193_v49 = vor.u32 %v5779_v39, %v5192_v38  ;;  %v5517_v38 = vld [vmem:[#allocation8 + $0x2ac] sm:$0xf]  ;;  %v4158_v39 = vld [vmem:[#allocation8 + $0x2c4] sm:$0xf0] }
  0xd5   :  { %2680 = vmatpush.bf16.msra.mxu1 %v4041_v3  ;;  %v5726_v3 = vld [vmem:[#allocation8 + $0x934] sm:$0xf] }
  0xd6   :  { %2719 = vmatpush.bf16.msra.mxu2 %v4713_v7  ;;  %v5506_v7 = vld [vmem:[#allocation8 + $0x250] sm:$0xf0] }
  0xd7   :  { %2745 = vmatpush.bf16.msra.mxu3 %v5161_v63  ;;  %2752 = vmatpush.bf16.msrb.mxu0 %v3989_v0  ;;  %v5021_v63 = vor.u32 %v5733_v54, %v5018_v55  ;;  %v4324_v0 = vld [vmem:[#allocation8 + $0x3f8] sm:$0xf]  ;;  %v4101_v19 = vor.u32 %v5506_v7, %v4100_v6  ;;  %v5164_v54 = vld [vmem:[#allocation8 + $0xa88] sm:$0xf]  ;;  %v5772_v55 = vld [vmem:[#allocation8 + $0xaa0] sm:$0xf0] }
  0xd8   :  { %2681 = vmatmul.bf16.vlgmr.msra.gmra.mxu1 %v6145_v48  ;;  %v4632_v6 = vld [vmem:[#allocation8 + $0x660] sm:$0xf] }
  0xd9   :  { %2725 = vmatpush.bf16.msrb.mxu1 %v5133_v8  ;;  %2720 = vmatmul.bf16.vlgmr.msra.gmra.mxu2 %v6158_v26  ;;  %v4325_v8 = vor.u32 %v5562_v1, %v4324_v0  ;;  %v5758_v0 = vld [vmem:[#allocation8 + $0xa30] sm:$0xf0]  ;;  %v5165_v1 = vor.u32 %v5772_v55, %v5164_v54  ;;  %v4996_v54 = vld [vmem:[#allocation8 + $0x938] sm:$0xf] }
  0xda   :  { %2764 = vmatpush.bf16.msrb.mxu2 %v4241_v12  ;;  %v4296_v12 = vld [vmem:[#allocation8 + $0x3c0] sm:$0xf]  ;;  %v5730_v55 = vld [vmem:[#allocation8 + $0x950] sm:$0xf0] }
  0xdb   :  { %2777 = vmatpush.bf16.msrb.mxu3 %v4465_v4  ;;  %2753 = vmatpush.bf16.msrb.mxu0 %v3961_v16  ;;  %v4990_v4 = vld [vmem:[#allocation8 + $0x94c] sm:$0xf0]  ;;  %v4297_v27 = vor.u32 %v5555_v14, %v4296_v12  ;;  %v5751_v14 = vld [vmem:[#allocation8 + $0x9f8] sm:$0xf0] }
  0xdc   :  { %v4993_v13 = vor.u32 %v5726_v3, %v4990_v4  ;;  %v4912_v16 = vld [vmem:[#allocation8 + $0x890] sm:$0xf]  ;;  %v5688_v3 = vld [vmem:[#allocation8 + $0x800] sm:$0xf0] }
  0xdd   :  { %2726 = vmatpush.bf16.msrb.mxu1 %v5105_v24  ;;  %v4072_v24 = vld [vmem:[#allocation8 + $0x200] sm:$0xf] }
  0xde   :  { %2765 = vmatpush.bf16.msrb.mxu2 %v4213_v28  ;;  %v4913_v28 = vor.u32 %v5709_v17, %v4912_v16  ;;  %v4073_v36 = vor.u32 %v5499_v25, %v4072_v24  ;;  %v4800_v16 = vld [vmem:[#allocation8 + $0x7b0] sm:$0xf]  ;;  %v5681_v17 = vld [vmem:[#allocation8 + $0x7c8] sm:$0xf0]  ;;  %v5632_v24 = vld [vmem:[#allocation8 + $0x640] sm:$0xf0] }
  0xdf   :  { %2778 = vmatpush.bf16.msrb.mxu3 %v4437_v20  ;;  %2754 = vmatpush.bf16.msrb.mxu0 %v3933_v31  ;;  %v5719_v20 = vld [vmem:[#allocation8 + $0x8fc] sm:$0xf]  ;;  %v4884_v31 = vld [vmem:[#allocation8 + $0x858] sm:$0xf]  ;;  %v5524_v25 = vld [vmem:[#allocation8 + $0x2e4] sm:$0xf] }
  0xe0   :  { %v4965_v32 = vor.u32 %v5719_v20, %v4962_v21  ;;  %v4885_v44 = vor.u32 %v5702_v33, %v4884_v31  ;;  %v4217_v20 = vor.u32 %v5531_v10, %v4214_v11  ;;  %v4604_v21 = vld [vmem:[#allocation8 + $0x628] sm:$0xf]  ;;  %v4772_v31 = vld [vmem:[#allocation8 + $0x778] sm:$0xf] }
  0xe1   :  { %2727 = vmatpush.bf16.msrb.mxu1 %v5077_v37  ;;  %v4044_v37 = vld [vmem:[#allocation8 + $0x1c8] sm:$0xf]  ;;  %v4605_v33 = vor.u32 %v5632_v24, %v4604_v21  ;;  %v5716_v21 = vld [vmem:[#allocation8 + $0x8e0] sm:$0xf0]  ;;  %v4018_v24 = vld [vmem:[#allocation8 + $0x1ac] sm:$0xf0] }
  0xe2   :  { %2766 = vmatpush.bf16.msrb.mxu2 %v4185_v40  ;;  %5211 = vmatmul.msk.bf16.vlgmr.msra.gmra.mxu3 %vm234_vm0, %v6164_v18  ;;  %v5492_v40 = vld [vmem:[#allocation8 + $0x1e0] sm:$0xf0] }
  0xe3   :  { %2779 = vmatpush.bf16.msrb.mxu3 %v4409_v34  ;;  %2755 = vmatpush.bf16.msrb.mxu0 %v3905_v42  ;;  %v5712_v34 = vld [vmem:[#allocation8 + $0x8c4] sm:$0xf]  ;;  %v4269_v42 = vor.u32 %v5548_v30, %v4268_v29  ;;  %v4045_v52 = vor.u32 %v5492_v40, %v4044_v37  ;;  %v5052_v29 = vld [vmem:[#allocation8 + $0x9a8] sm:$0xf]  ;;  %v5625_v37 = vld [vmem:[#allocation8 + $0x608] sm:$0xf0] }
  0xe4   :  { %v4937_v47 = vor.u32 %v5712_v34, %v4934_v35  ;;  %v5744_v30 = vld [vmem:[#allocation8 + $0x9c0] sm:$0xf0]  ;;  %v4576_v35 = vld [vmem:[#allocation8 + $0x5f0] sm:$0xf] }
  0xe5   :  { %2728 = vmatpush.bf16.msrb.mxu1 %v5049_v50  ;;  %v4856_v50 = vld [vmem:[#allocation8 + $0x820] sm:$0xf] }
  0xe6   :  { %2767 = vmatpush.bf16.msrb.mxu2 %v4157_v53  ;;  %v4689_v53 = vor.u32 %v5653_v41, %v4688_v23  ;;  %v4857_v62 = vor.u32 %v5695_v51, %v4856_v50  ;;  %v5024_v23 = vld [vmem:[#allocation8 + $0x970] sm:$0xf]  ;;  %v5737_v41 = vld [vmem:[#allocation8 + $0x988] sm:$0xf0]  ;;  %v5618_v50 = vld [vmem:[#allocation8 + $0x5d0] sm:$0xf0] }
  0xe7   :  { %2780 = vmatpush.bf16.msrb.mxu3 %v4381_v46  ;;  %2756 = vmatpush.bf16.msrb.mxu0 %v3877_v56  ;;  %v5765_v46 = vld [vmem:[#allocation8 + $0xa68] sm:$0xf0]  ;;  %v4660_v56 = vld [vmem:[#allocation8 + $0x698] sm:$0xf]  ;;  %v5510_v51 = vld [vmem:[#allocation8 + $0x274] sm:$0xf] }
  0xe8   :  { %v5137_v57 = vor.u32 %v5765_v46, %v5136_v45  ;;  %v4661_v4 = vor.u32 %v5646_v59, %v4660_v56  ;;  %v4577_v45 = vor.u32 %v5625_v37, %v4576_v35  ;;  %v4161_v46 = vor.u32 %v5517_v38, %v4158_v39  ;;  %v4716_v56 = vld [vmem:[#allocation8 + $0x708] sm:$0xf]  ;;  %v5489_v35 = vld [vmem:[#allocation8 + $0x1cc] sm:$0xf]  ;;  %v5475_v37 = vld [vmem:[#allocation8 + $0x15c] sm:$0xf] }
  0xe9   :  { %2729 = vmatpush.bf16.msrb.mxu1 %v5021_v63  ;;  %v5108_v63 = vld [vmem:[#allocation8 + $0xa18] sm:$0xf] }
  0xea   :  { %2768 = vmatpush.bf16.msrb.mxu2 %v4129_v2  ;;  %v4828_v2 = vld [vmem:[#allocation8 + $0x7e8] sm:$0xf]  ;;  %v5109_v7 = vor.u32 %v5758_v0, %v5108_v63  ;;  %v4520_v63 = vld [vmem:[#allocation8 + $0x580] sm:$0xf]  ;;  %v4997_v0 = vor.u32 %v5730_v55, %v4996_v54  ;;  %v3990_v39 = vld [vmem:[#allocation8 + $0x174] sm:$0xf0] }
  0xeb   :  { %2781 = vmatpush.bf16.msrb.mxu3 %v4353_v60  ;;  %2757 = vmatpush.bf16.msrb.mxu0 %v3849_v5  ;;  %v5538_v60 = vld [vmem:[#allocation8 + $0x354] sm:$0xf]  ;;  %v4829_v12 = vor.u32 %v5688_v3, %v4828_v2  ;;  %v5503_v2 = vld [vmem:[#allocation8 + $0x23c] sm:$0xf]  ;;  %v4102_v3 = vld [vmem:[#allocation8 + $0x254] sm:$0xf0] }
  0xec   :  { %v4245_v5 = vor.u32 %v5538_v60, %v4242_v61  ;;  %v5594_v61 = vld [vmem:[#allocation8 + $0x514] sm:$0xf]  ;;  %v4105_v11 = vor.u32 %v5503_v2, %v4102_v3  ;;  %v5755_v54 = vld [vmem:[#allocation8 + $0xa1c] sm:$0xf]  ;;  %v5110_v55 = vld [vmem:[#allocation8 + $0xa34] sm:$0xf0] }
  0xed   :  { %2730 = vmatpush.bf16.msrb.mxu1 %v4993_v13  ;;  %v5080_v13 = vld [vmem:[#allocation8 + $0x9e0] sm:$0xf]  ;;  %v3934_v2 = vld [vmem:[#allocation8 + $0x104] sm:$0xf0]  ;;  %v5748_v3 = vld [vmem:[#allocation8 + $0x9e4] sm:$0xf] }
  0xee   :  { %2769 = vmatpush.bf16.msrb.mxu2 %v4101_v19 }
  0xef   :  { %2782 = vmatpush.bf16.msrb.mxu3 %v4325_v8  ;;  %2758 = vmatpush.bf16.msrb.mxu0 %v3821_v22  ;;  %v5639_v8 = vld [vmem:[#allocation8 + $0x678] sm:$0xf0]  ;;  %v5081_v22 = vor.u32 %v5751_v14, %v5080_v13  ;;  %v4492_v13 = vld [vmem:[#allocation8 + $0x548] sm:$0xf]  ;;  %v5604_v14 = vld [vmem:[#allocation8 + $0x560] sm:$0xf0] }
  0xf0   :  { %v4633_v19 = vor.u32 %v5639_v8, %v4632_v6  ;;  %v5723_v6 = vld [vmem:[#allocation8 + $0x918] sm:$0xf0] }
  0xf1   :  { %2731 = vmatpush.bf16.msrb.mxu1 %v4965_v32  ;;  %v5674_v32 = vld [vmem:[#allocation8 + $0x790] sm:$0xf0]  ;;  %v5587_v8 = vld [vmem:[#allocation8 + $0x4dc] sm:$0xf] }
  0xf2   :  { %2770 = vmatpush.bf16.msrb.mxu2 %v4073_v36  ;;  %2759 = vmatmul.bf16.vlgmr.msrb.gmra.mxu0 %v6143_v43  ;;  %v5053_v36 = vor.u32 %v5744_v30, %v5052_v29  ;;  %v4773_v40 = vor.u32 %v5674_v32, %v4772_v31  ;;  %v4493_v29 = vor.u32 %v5604_v14, %v4492_v13  ;;  %v5580_v31 = vld [vmem:[#allocation8 + $0x4a4] sm:$0xf]  ;;  %v4410_v32 = vld [vmem:[#allocation8 + $0x4bc] sm:$0xf0]  ;;  %v5454_v13 = vld [vmem:[#allocation8 + $0xb4] sm:$0xf] }
  0xf3   :  { %2783 = vmatpush.bf16.msrb.mxu3 %v4297_v27  ;;  %2803 = vmatpush.bf16.msra.mxu0 %v4913_v28  ;;  %v4186_v27 = vld [vmem:[#allocation8 + $0x2fc] sm:$0xf0]  ;;  %v4801_v28 = vor.u32 %v5681_v17, %v4800_v16  ;;  %v4940_v17 = vld [vmem:[#allocation8 + $0x8c8] sm:$0xf] }
  0xf4   :  { %v4189_v34 = vor.u32 %v5524_v25, %v4186_v27  ;;  %v5650_v27 = vld [vmem:[#allocation8 + $0x6d4] sm:$0xf] }
  0xf5   :  { %2732 = vmatpush.bf16.msrb.mxu1 %v4937_v47  ;;  %v4548_v47 = vld [vmem:[#allocation8 + $0x5b8] sm:$0xf] }
  0xf6   :  { %2771 = vmatpush.bf16.msrb.mxu2 %v4045_v52  ;;  %v4130_v52 = vld [vmem:[#allocation8 + $0x28c] sm:$0xf0]  ;;  %v4549_v59 = vor.u32 %v5618_v50, %v4548_v47  ;;  %v4382_v47 = vld [vmem:[#allocation8 + $0x484] sm:$0xf0] }
  0xf7   :  { %2784 = vmatpush.bf16.msrb.mxu3 %v4269_v42  ;;  %2804 = vmatpush.bf16.msra.mxu0 %v4885_v44  ;;  %v4744_v42 = vld [vmem:[#allocation8 + $0x740] sm:$0xf]  ;;  %v5667_v44 = vld [vmem:[#allocation8 + $0x758] sm:$0xf0]  ;;  %v4133_v60 = vor.u32 %v5510_v51, %v4130_v52  ;;  %v5468_v51 = vld [vmem:[#allocation8 + $0x124] sm:$0xf] }
  0xf8   :  { %2733 = vmatmul.bf16.vlgmr.msrb.gmra.mxu1 %v6160_v58 }
  0xf9   :  { %2790 = vmatpush.bf16.msra.mxu1 %v4689_v53  ;;  %2772 = vmatmul.bf16.vlgmr.msrb.gmra.mxu2 %v6145_v48  ;;  %v4745_v53 = vor.u32 %v5667_v44, %v4744_v42  ;;  %v5643_v42 = vld [vmem:[#allocation8 + $0x69c] sm:$0xf]  ;;  %v4662_v44 = vld [vmem:[#allocation8 + $0x6b4] sm:$0xf0] }
  0xfa   :  { %2816 = vmatpush.bf16.msra.mxu2 %v5137_v57  ;;  %2785 = vmatmul.bf16.vlgmr.msrb.gmra.mxu3 %v6151_v9  ;;  %v5660_v57 = vld [vmem:[#allocation8 + $0x720] sm:$0xf0]  ;;  %v4665_v52 = vor.u32 %v5643_v42, %v4662_v44 }
  0xfb   :  { %2835 = vmatpush.bf16.msra.mxu3 %v5193_v49  ;;  %2805 = vmatpush.bf16.msra.mxu0 %v4857_v62  ;;  %v5025_v49 = vor.u32 %v5737_v41, %v5024_v23  ;;  %v4466_v62 = vld [vmem:[#allocation8 + $0x52c] sm:$0xf0]  ;;  %v4413_v41 = vor.u32 %v5580_v31, %v4410_v32  ;;  %v3878_v31 = vld [vmem:[#allocation8 + $0x94] sm:$0xf0]  ;;  %v5734_v32 = vld [vmem:[#allocation8 + $0x974] sm:$0xf] }
  0xfc   :  { %v5138_v23 = vld [vmem:[#allocation8 + $0xa6c] sm:$0xf0]  ;;  %v5440_v42 = vld [vmem:[#allocation8 + $0x44] sm:$0xf] }
  0xfd   :  { %2791 = vmatpush.bf16.msra.mxu1 %v4661_v4  ;;  %v4717_v4 = vor.u32 %v5660_v57, %v4716_v56  ;;  %v5636_v57 = vld [vmem:[#allocation8 + $0x664] sm:$0xf] }
  0xfe   :  { %2817 = vmatpush.bf16.msra.mxu2 %v5109_v7  ;;  %v4469_v7 = vor.u32 %v5594_v61, %v4466_v62  ;;  %v4354_v61 = vld [vmem:[#allocation8 + $0x44c] sm:$0xf0] }
  0xff   :  { %2836 = vmatpush.bf16.msra.mxu3 %v5165_v1  ;;  %2806 = vmatpush.bf16.msra.mxu0 %v4829_v12  ;;  %v5611_v1 = vld [vmem:[#allocation8 + $0x598] sm:$0xf0]  ;;  %v4438_v12 = vld [vmem:[#allocation8 + $0x4f4] sm:$0xf0] }
 0x100   :  { %v4521_v10 = vor.u32 %v5611_v1, %v4520_v63  ;;  %v4441_v25 = vor.u32 %v5587_v8, %v4438_v12  ;;  %v5113_v63 = vor.u32 %v5755_v54, %v5110_v55  ;;  %v5559_v8 = vld [vmem:[#allocation8 + $0x3fc] sm:$0xf]  ;;  %v5166_v54 = vld [vmem:[#allocation8 + $0xaa4] sm:$0xf0] }
 0x101   :  { %2792 = vmatpush.bf16.msra.mxu1 %v4633_v19  ;;  %v5496_v19 = vld [vmem:[#allocation8 + $0x204] sm:$0xf] }
 0x102   :  { %2818 = vmatpush.bf16.msra.mxu2 %v5081_v22  ;;  %v5482_v22 = vld [vmem:[#allocation8 + $0x194] sm:$0xf] }
 0x103   :  { %2855 = vmatpush.bf16.msrb.mxu3 %v4245_v5  ;;  %2807 = vmatpush.bf16.msra.mxu0 %v4801_v28  ;;  %v4968_v5 = vld [vmem:[#allocation8 + $0x900] sm:$0xf]  ;;  %v4690_v28 = vld [vmem:[#allocation8 + $0x6ec] sm:$0xf0] }
 0x104   :  { %v4969_v16 = vor.u32 %v5723_v6, %v4968_v5  ;;  %v4693_v38 = vor.u32 %v5650_v27, %v4690_v28  ;;  %v5629_v6 = vld [vmem:[#allocation8 + $0x62c] sm:$0xf] }
 0x105   :  { %2793 = vmatpush.bf16.msra.mxu1 %v4605_v33  ;;  %v4941_v33 = vor.u32 %v5716_v21, %v4940_v17  ;;  %v5741_v17 = vld [vmem:[#allocation8 + $0x9ac] sm:$0xf]  ;;  %v5622_v21 = vld [vmem:[#allocation8 + $0x5f4] sm:$0xf] }
 0x106   :  { %2819 = vmatpush.bf16.msra.mxu2 %v5053_v36  ;;  %v4046_v36 = vld [vmem:[#allocation8 + $0x1e4] sm:$0xf0] }
 0x107   :  { %2856 = vmatpush.bf16.msrb.mxu3 %v4217_v20  ;;  %2808 = vmatpush.bf16.msra.mxu0 %v4773_v40  ;;  %v4074_v20 = vld [vmem:[#allocation8 + $0x21c] sm:$0xf0]  ;;  %v5762_v40 = vld [vmem:[#allocation8 + $0xa54] sm:$0xf] }
 0x108   :  { %v4077_v30 = vor.u32 %v5496_v19, %v4074_v20  ;;  %v5141_v50 = vor.u32 %v5762_v40, %v5138_v23  ;;  %v5054_v19 = vld [vmem:[#allocation8 + $0x9c4] sm:$0xf0]  ;;  %v5776_v23 = vld [vmem:[#allocation8 + $0xac4] sm:$0xf] }
 0x109   :  { %2794 = vmatpush.bf16.msra.mxu1 %v4577_v45  ;;  %v4049_v45 = vor.u32 %v5489_v35, %v4046_v36  ;;  %v5057_v28 = vor.u32 %v5741_v17, %v5054_v19  ;;  %v5615_v35 = vld [vmem:[#allocation8 + $0x5bc] sm:$0xf]  ;;  %v4550_v36 = vld [vmem:[#allocation8 + $0x5d4] sm:$0xf0] }
 0x10a   :  { %2820 = vmatpush.bf16.msra.mxu2 %v5025_v49  ;;  %5212 = vmatmul.msk.bf16.vlgmr.msra.gmra.mxu3 %vm234_vm0, %v6164_v18  ;;  %v3993_v49 = vor.u32 %v5475_v37, %v3990_v39  ;;  %v5545_v37 = vld [vmem:[#allocation8 + $0x38c] sm:$0xf]  ;;  %v4553_v44 = vor.u32 %v5615_v35, %v4550_v36  ;;  %v5535_v17 = vld [vmem:[#allocation8 + $0x338] sm:$0xf0] }
 0x10b   :  { %2857 = vmatpush.bf16.msrb.mxu3 %v4189_v34  ;;  %2809 = vmatpush.bf16.msra.mxu0 %v4745_v53  ;;  %v4021_v34 = vor.u32 %v5482_v22, %v4018_v24  ;;  %v3962_v53 = vld [vmem:[#allocation8 + $0x13c] sm:$0xf0]  ;;  %v4578_v22 = vld [vmem:[#allocation8 + $0x60c] sm:$0xf0]  ;;  %v5552_v24 = vld [vmem:[#allocation8 + $0x3c4] sm:$0xf] }
 0x10c   :  { %v3965_v62 = vor.u32 %v5468_v51, %v3962_v53  ;;  %v4522_v51 = vld [vmem:[#allocation8 + $0x59c] sm:$0xf0]  ;;  %v5769_v53 = vld [vmem:[#allocation8 + $0xa8c] sm:$0xf] }
 0x10d   :  { %2795 = vmatpush.bf16.msra.mxu1 %v4549_v59  ;;  %v4634_v59 = vld [vmem:[#allocation8 + $0x67c] sm:$0xf0] }
 0x10e   :  { %2821 = vmatpush.bf16.msra.mxu2 %v4997_v0  ;;  %v5461_v0 = vld [vmem:[#allocation8 + $0xec] sm:$0xf]  ;;  %v4637_v1 = vor.u32 %v5636_v57, %v4634_v59  ;;  %v3822_v59 = vld [vmem:[#allocation8 + $0x24] sm:$0xf0] }
 0x10f   :  { %2858 = vmatpush.bf16.msrb.mxu3 %v4161_v46  ;;  %2810 = vmatpush.bf16.msra.mxu0 %v4717_v4  ;;  %v5573_v46 = vld [vmem:[#allocation8 + $0x46c] sm:$0xf]  ;;  %v5082_v4 = vld [vmem:[#allocation8 + $0x9fc] sm:$0xf0] }
 0x110   :  { %v4385_v56 = vor.u32 %v5573_v46, %v4382_v47  ;;  %v5085_v12 = vor.u32 %v5748_v3, %v5082_v4  ;;  %v5727_v46 = vld [vmem:[#allocation8 + $0x93c] sm:$0xf]  ;;  %v4998_v47 = vld [vmem:[#allocation8 + $0x954] sm:$0xf0]  ;;  %v5433_v57 = vld [vmem:[#allocation8 + $0xc] sm:$0xf]  ;;  %v5169_v4 = vor.u32 %v5769_v53, %v5166_v54 }
 0x111   :  { %2796 = vmatpush.bf16.msra.mxu1 %v4521_v10  ;;  %v4326_v10 = vld [vmem:[#allocation8 + $0x414] sm:$0xf0]  ;;  %v5706_v3 = vld [vmem:[#allocation8 + $0x894] sm:$0xf]  ;;  %v5640_v53 = vld [vmem:[#allocation8 + $0x680] sm:$0xf0] }
 0x112   :  { %2822 = vmatpush.bf16.msra.mxu2 %v4969_v16  ;;  %2811 = vmatmul.bf16.vlgmr.msra.gmra.mxu0 %v6158_v26  ;;  %v3906_v16 = vld [vmem:[#allocation8 + $0xcc] sm:$0xf0]  ;;  %v4329_v20 = vor.u32 %v5559_v8, %v4326_v10  ;;  %v3825_v8 = vor.u32 %v5433_v57, %v3822_v59  ;;  %v5685_v54 = vld [vmem:[#allocation8 + $0x7ec] sm:$0xf] }
 0x113   :  { %2859 = vmatpush.bf16.msrb.mxu3 %v4133_v60  ;;  %2868 = vmatpush.bf16.msrb.mxu0 %v4469_v7  ;;  %v5566_v60 = vld [vmem:[#allocation8 + $0x434] sm:$0xf]  ;;  %v4606_v7 = vld [vmem:[#allocation8 + $0x644] sm:$0xf0]  ;;  %v3909_v27 = vor.u32 %v5454_v13, %v3906_v16  ;;  %v4220_v16 = vld [vmem:[#allocation8 + $0x320] sm:$0xf] }
 0x114   :  { %v4357_v5 = vor.u32 %v5566_v60, %v4354_v61  ;;  %v4609_v14 = vor.u32 %v5629_v6, %v4606_v7  ;;  %v5601_v60 = vld [vmem:[#allocation8 + $0x54c] sm:$0xf]  ;;  %v4024_v6 = vld [vmem:[#allocation8 + $0x198] sm:$0xf]  ;;  %v5486_v7 = vld [vmem:[#allocation8 + $0x1b0] sm:$0xf0] }
 0x115   :  { %2797 = vmatpush.bf16.msra.mxu1 %v4493_v29  ;;  %v5447_v29 = vld [vmem:[#allocation8 + $0x7c] sm:$0xf]  ;;  %v3940_v57 = vld [vmem:[#allocation8 + $0xf0] sm:$0xf]  ;;  %v5465_v59 = vld [vmem:[#allocation8 + $0x108] sm:$0xf0] }
 0x116   :  { %2823 = vmatpush.bf16.msra.mxu2 %v4941_v33  ;;  %v5026_v33 = vld [vmem:[#allocation8 + $0x98c] sm:$0xf0]  ;;  %v3881_v39 = vor.u32 %v5447_v29, %v3878_v31 }
 0x117   :  { %2860 = vmatpush.bf16.msrb.mxu3 %v4105_v11  ;;  %2869 = vmatpush.bf16.msrb.mxu0 %v4441_v25  ;;  %v3937_v11 = vor.u32 %v5461_v0, %v3934_v2  ;;  %v4298_v25 = vld [vmem:[#allocation8 + $0x3dc] sm:$0xf0]  ;;  %v5029_v40 = vor.u32 %v5734_v32, %v5026_v33  ;;  %v5542_v2 = vld [vmem:[#allocation8 + $0x370] sm:$0xf0]  ;;  %v4192_v32 = vld [vmem:[#allocation8 + $0x2e8] sm:$0xf] }
 0x118   :  { %2798 = vmatmul.bf16.vlgmr.msra.gmra.mxu1 %v6153_v15  ;;  %v4970_v0 = vld [vmem:[#allocation8 + $0x91c] sm:$0xf0]  ;;  %v5528_v33 = vld [vmem:[#allocation8 + $0x300] sm:$0xf0] }
 0x119   :  { %2842 = vmatpush.bf16.msrb.mxu1 %v4021_v34  ;;  %2824 = vmatmul.bf16.vlgmr.msra.gmra.mxu2 %v6160_v58  ;;  %v4301_v34 = vor.u32 %v5552_v24, %v4298_v25  ;;  %v5654_v24 = vld [vmem:[#allocation8 + $0x6f0] sm:$0xf0]  ;;  %v4886_v25 = vld [vmem:[#allocation8 + $0x874] sm:$0xf0] }
 0x11a   :  { %2881 = vmatpush.bf16.msrb.mxu2 %v4693_v38  ;;  %v4270_v38 = vld [vmem:[#allocation8 + $0x3a4] sm:$0xf0] }
 0x11b   :  { %2861 = vmatpush.bf16.msrb.mxu3 %v4077_v30  ;;  %2870 = vmatpush.bf16.msrb.mxu0 %v4413_v41  ;;  %v4581_v30 = vor.u32 %v5622_v21, %v4578_v22  ;;  %v5194_v41 = vld [vmem:[#allocation8 + $0xadc] sm:$0xf0]  ;;  %v5699_v21 = vld [vmem:[#allocation8 + $0x85c] sm:$0xf]  ;;  %v4696_v22 = vld [vmem:[#allocation8 + $0x6d8] sm:$0xf] }
 0x11c   :  { %v4697_v31 = vor.u32 %v5654_v24, %v4696_v22  ;;  %v4889_v35 = vor.u32 %v5699_v21, %v4886_v25  ;;  %v4584_v21 = vld [vmem:[#allocation8 + $0x5f8] sm:$0xf]  ;;  %v5626_v22 = vld [vmem:[#allocation8 + $0x610] sm:$0xf0]  ;;  %v5671_v25 = vld [vmem:[#allocation8 + $0x77c] sm:$0xf] }
 0x11d   :  { %2843 = vmatpush.bf16.msrb.mxu1 %v3993_v49  ;;  %v4273_v49 = vor.u32 %v5545_v37, %v4270_v38  ;;  %v4668_v37 = vld [vmem:[#allocation8 + $0x6a0] sm:$0xf]  ;;  %v5647_v38 = vld [vmem:[#allocation8 + $0x6b8] sm:$0xf0] }
 0x11e   :  { %2882 = vmatpush.bf16.msrb.mxu2 %v4665_v52  ;;  %v5197_v52 = vor.u32 %v5776_v23, %v5194_v41  ;;  %v4858_v23 = vld [vmem:[#allocation8 + $0x83c] sm:$0xf0]  ;;  %v3968_v41 = vld [vmem:[#allocation8 + $0x128] sm:$0xf] }
 0x11f   :  { %2862 = vmatpush.bf16.msrb.mxu3 %v4049_v45  ;;  %2871 = vmatpush.bf16.msrb.mxu0 %v4385_v56  ;;  %v3850_v45 = vld [vmem:[#allocation8 + $0x5c] sm:$0xf0]  ;;  %v5001_v56 = vor.u32 %v5727_v46, %v4998_v47  ;;  %v4164_v47 = vld [vmem:[#allocation8 + $0x2b0] sm:$0xf] }
 0x120   :  { %v3853_v55 = vor.u32 %v5440_v42, %v3850_v45  ;;  %v5472_v42 = vld [vmem:[#allocation8 + $0x140] sm:$0xf0]  ;;  %v4669_v45 = vor.u32 %v5647_v38, %v4668_v37 }
 0x121   :  { %2844 = vmatpush.bf16.msrb.mxu1 %v3965_v62  ;;  %v4494_v62 = vld [vmem:[#allocation8 + $0x564] sm:$0xf0]  ;;  %v5500_v38 = vld [vmem:[#allocation8 + $0x220] sm:$0xf0] }
 0x122   :  { %2863 = vmatmul.bf16.vlgmr.msrb.gmra.mxu3 %v6145_v48  ;;  %2883 = vmatpush.bf16.msrb.mxu2 %v4637_v1  ;;  %v4248_v1 = vld [vmem:[#allocation8 + $0x358] sm:$0xf] }
 0x123   :  { %2907 = vmatpush.bf16.msra.mxu3 %v5141_v50  ;;  %2872 = vmatpush.bf16.msrb.mxu0 %v4357_v5  ;;  %v5608_v50 = vld [vmem:[#allocation8 + $0x584] sm:$0xf]  ;;  %v4914_v5 = vld [vmem:[#allocation8 + $0x8ac] sm:$0xf0]  ;;  %v4249_v13 = vor.u32 %v5542_v2, %v4248_v1  ;;  %v5514_v2 = vld [vmem:[#allocation8 + $0x290] sm:$0xf0] }
 0x124   :  { %v4525_v61 = vor.u32 %v5608_v50, %v4522_v51  ;;  %v4917_v19 = vor.u32 %v5706_v3, %v4914_v5  ;;  %v3969_v50 = vor.u32 %v5472_v42, %v3968_v41  ;;  %v5521_v51 = vld [vmem:[#allocation8 + $0x2c8] sm:$0xf0]  ;;  %v4612_v3 = vld [vmem:[#allocation8 + $0x630] sm:$0xf] }
 0x125   :  { %2845 = vmatpush.bf16.msrb.mxu1 %v3937_v11  ;;  %v5713_v11 = vld [vmem:[#allocation8 + $0x8cc] sm:$0xf] }
 0x126   :  { %2884 = vmatpush.bf16.msrb.mxu2 %v4609_v14  ;;  %v4942_v14 = vld [vmem:[#allocation8 + $0x8e4] sm:$0xf0] }
 0x127   :  { %2908 = vmatpush.bf16.msra.mxu3 %v5113_v63  ;;  %2873 = vmatpush.bf16.msrb.mxu0 %v4329_v20  ;;  %v5720_v63 = vld [vmem:[#allocation8 + $0x904] sm:$0xf]  ;;  %v4025_v20 = vor.u32 %v5486_v7, %v4024_v6  ;;  %v4945_v29 = vor.u32 %v5713_v11, %v4942_v14  ;;  %v3941_v7 = vor.u32 %v5465_v59, %v3940_v57  ;;  %v3912_v11 = vld [vmem:[#allocation8 + $0xb8] sm:$0xf] }
 0x128   :  { %v4973_v10 = vor.u32 %v5720_v63, %v4970_v0  ;;  %v4136_v0 = vld [vmem:[#allocation8 + $0x278] sm:$0xf]  ;;  %v5612_v57 = vld [vmem:[#allocation8 + $0x5a0] sm:$0xf0] }
 0x129   :  { %2846 = vmatpush.bf16.msrb.mxu1 %v3909_v27  ;;  %v3996_v27 = vld [vmem:[#allocation8 + $0x160] sm:$0xf]  ;;  %v4137_v14 = vor.u32 %v5514_v2, %v4136_v0  ;;  %v4472_v2 = vld [vmem:[#allocation8 + $0x518] sm:$0xf] }
 0x12a   :  { %2885 = vmatpush.bf16.msrb.mxu2 %v4581_v30  ;;  %v4221_v30 = vor.u32 %v5535_v17, %v4220_v16  ;;  %v4108_v17 = vld [vmem:[#allocation8 + $0x240] sm:$0xf] }
 0x12b   :  { %2909 = vmatpush.bf16.msra.mxu3 %v5085_v12  ;;  %2874 = vmatpush.bf16.msrb.mxu0 %v4301_v34  ;;  %v4497_v12 = vor.u32 %v5601_v60, %v4494_v62  ;;  %v5692_v34 = vld [vmem:[#allocation8 + $0x824] sm:$0xf]  ;;  %v4165_v62 = vor.u32 %v5521_v51, %v4164_v47  ;;  %v4052_v51 = vld [vmem:[#allocation8 + $0x1d0] sm:$0xf] }
 0x12c   :  { %v5444_v47 = vld [vmem:[#allocation8 + $0x60] sm:$0xf0] }
 0x12d   :  { %2847 = vmatpush.bf16.msrb.mxu1 %v3881_v39  ;;  %v6186_v39 = vld [vmem:[#allocation10] sm:$0x7f] }
 0x12e   :  { %2886 = vmatpush.bf16.msrb.mxu2 %v4553_v44  ;;  %v4193_v44 = vor.u32 %v5528_v33, %v4192_v32  ;;  %v752_v46 = vperm.slane %v6186_v39, 0 }
 0x12f   :  { %2910 = vmatpush.bf16.msra.mxu3 %v5057_v28  ;;  %2875 = vmatpush.bf16.msrb.mxu0 %v4273_v49  ;;  %v5479_v28 = vld [vmem:[#allocation8 + $0x178] sm:$0xf0]  ;;  %v4861_v49 = vor.u32 %v5692_v34, %v4858_v23 }
 0x130   :  { %v3997_v36 = vor.u32 %v5479_v28, %v3996_v27  ;;  %v4774_v27 = vld [vmem:[#allocation8 + $0x794] sm:$0xf0]  ;;  %v5619_v23 = vld [vmem:[#allocation8 + $0x5d8] sm:$0xf0] }
 0x131   :  { %2848 = vmatpush.bf16.msrb.mxu1 %v3853_v55  ;;  %v4830_v55 = vld [vmem:[#allocation8 + $0x804] sm:$0xf0]  ;;  %v4777_v37 = vor.u32 %v5671_v25, %v4774_v27  ;;  %v5591_v27 = vld [vmem:[#allocation8 + $0x4f8] sm:$0xf0] }
 0x132   :  { %2887 = vmatpush.bf16.msrb.mxu2 %v4525_v61  ;;  %2876 = vmatmul.bf16.vlgmr.msrb.gmra.mxu0 %v6151_v9  ;;  %v4833_v1 = vor.u32 %v5685_v54, %v4830_v55  ;;  %v4718_v55 = vld [vmem:[#allocation8 + $0x724] sm:$0xf0] }
 0x133   :  { %2911 = vmatpush.bf16.msra.mxu3 %v5029_v40  ;;  %2926 = vmatpush.bf16.msra.mxu0 %v5197_v52  ;;  %v2591_v40 = vpop.f32.mrf.mxu0  ;;  %v4640_v52 = vld [vmem:[#allocation8 + $0x668] sm:$0xf] }
 0x134   :  { %v4641_v63 = vor.u32 %v5640_v53, %v4640_v52  ;;  %v5493_v52 = vld [vmem:[#allocation8 + $0x1e8] sm:$0xf0] }
 0x135   :  { %2849 = vmatpush.bf16.msrb.mxu1 %v3825_v8  ;;  %v2604_v61 = vpop.f32.mrf.mxu1  ;;  %v5678_v8 = vld [vmem:[#allocation8 + $0x7b4] sm:$0xf]  ;;  %v5657_v53 = vld [vmem:[#allocation8 + $0x70c] sm:$0xf] }
 0x136   :  { %2888 = vmatpush.bf16.msrb.mxu2 %v4497_v12  ;;  %v5458_v12 = vld [vmem:[#allocation8 + $0xd0] sm:$0xf0] }
 0x137   :  { %2912 = vmatpush.bf16.msra.mxu3 %v5001_v56  ;;  %2927 = vmatpush.bf16.msra.mxu0 %v5169_v4  ;;  %v2578_v56 = vpop.f32.mrf.mxu3  ;;  %v5633_v4 = vld [vmem:[#allocation8 + $0x648] sm:$0xf0]  ;;  %v3913_v24 = vor.u32 %v5458_v12, %v3912_v11  ;;  %v4721_v11 = vor.u32 %v5657_v53, %v4718_v55  ;;  %v5060_v55 = vld [vmem:[#allocation8 + $0x9b0] sm:$0xf] }
 0x138   :  { %2850 = vmatmul.bf16.vlgmr.msrb.gmra.mxu1 %v6143_v43  ;;  %v2579_v60 = vadd.f32 %v2578_v56, %v752_v46  ;;  %v4613_v16 = vor.u32 %v5633_v4, %v4612_v3  ;;  %v3856_v46 = vld [vmem:[#allocation8 + $0x48] sm:$0xf]  ;;  %v5598_v3 = vld [vmem:[#allocation8 + $0x530] sm:$0xf0] }
 0x139   :  { %2894 = vmatpush.bf16.msra.mxu1 %v4917_v19  ;;  %2889 = vmatmul.bf16.vlgmr.msrb.gmra.mxu2 %v6153_v15  ;;  %v4528_v56 = vld [vmem:[#allocation8 + $0x588] sm:$0xf]  ;;  %v3857_v59 = vor.u32 %v5444_v47, %v3856_v46  ;;  %v3998_v46 = vld [vmem:[#allocation8 + $0x17c] sm:$0xf0] }
 0x13a   :  { %2933 = vmatpush.bf16.msra.mxu2 %v4025_v20  ;;  %v2592_v5 = vadd.f32 %v2591_v40, %v2579_v60  ;;  %v5507_v20 = vld [vmem:[#allocation8 + $0x258] sm:$0xf0]  ;;  %v4556_v40 = vld [vmem:[#allocation8 + $0x5c0] sm:$0xf]  ;;  %v3828_v60 = vld [vmem:[#allocation8 + $0x10] sm:$0xf] }
 0x13b   :  { %2913 = vmatpush.bf16.msra.mxu3 %v4973_v10  ;;  %2946 = vmatpush.bf16.msrb.mxu0 %v4249_v13  ;;  %v2593_v6 = vpop.f32.mrf.mxu0  ;;  %v4802_v10 = vld [vmem:[#allocation8 + $0x7cc] sm:$0xf0]  ;;  %v2617_v28 = vpop.f32.mrf.mxu2  ;;  %v4109_v34 = vor.u32 %v5507_v20, %v4108_v17  ;;  %v4473_v20 = vor.u32 %v5598_v3, %v4472_v2 }
 0x13c   :  { %v2605_v13 = vadd.f32 %v2604_v61, %v2592_v5  ;;  %v4805_v19 = vor.u32 %v5678_v8, %v4802_v10  ;;  %v5144_v61 = vld [vmem:[#allocation8 + $0xa58] sm:$0xf]  ;;  %v4053_v6 = vor.u32 %v5493_v52, %v4052_v51  ;;  %v5710_v10 = vld [vmem:[#allocation8 + $0x8b0] sm:$0xf0]  ;;  %v753_v51 = vperm.slane %v6186_v39, 1 }
 0x13d   :  { %2895 = vmatpush.bf16.msra.mxu1 %v4889_v35  ;;  %v2606_v33 = vpop.f32.mrf.mxu1  ;;  %v4585_v35 = vor.u32 %v5626_v22, %v4584_v21  ;;  %v4920_v8 = vld [vmem:[#allocation8 + $0x898] sm:$0xf]  ;;  %v5116_v21 = vld [vmem:[#allocation8 + $0xa20] sm:$0xf]  ;;  %v5759_v22 = vld [vmem:[#allocation8 + $0xa38] sm:$0xf0] }
 0x13e   :  { %2934 = vmatpush.bf16.msra.mxu2 %v3997_v36  ;;  %v2618_v32 = vadd.f32 %v2617_v28, %v2605_v13  ;;  %v4080_v36 = vld [vmem:[#allocation8 + $0x208] sm:$0xf]  ;;  %v4500_v13 = vld [vmem:[#allocation8 + $0x550] sm:$0xf]  ;;  %v4921_v25 = vor.u32 %v5710_v10, %v4920_v8  ;;  %v5483_v28 = vld [vmem:[#allocation8 + $0x19c] sm:$0xf] }
 0x13f   :  { %2914 = vmatpush.bf16.msra.mxu3 %v4945_v29  ;;  %2947 = vmatpush.bf16.msrb.mxu0 %v4221_v30  ;;  %v2580_v29 = vpop.f32.mrf.mxu3  ;;  %v3884_v30 = vld [vmem:[#allocation8 + $0x80] sm:$0xf]  ;;  %v5703_v33 = vld [vmem:[#allocation8 + $0x878] sm:$0xf0] }
 0x140   :  { %v4026_v29 = vld [vmem:[#allocation8 + $0x1b4] sm:$0xf0] }
 0x141   :  { %2896 = vmatpush.bf16.msra.mxu1 %v4861_v49  ;;  %v4081_v49 = vor.u32 %v5500_v38, %v4080_v36  ;;  %v4029_v36 = vor.u32 %v5483_v28, %v4026_v29  ;;  %v5752_v38 = vld [vmem:[#allocation8 + $0xa00] sm:$0xf0]  ;;  %v5731_v28 = vld [vmem:[#allocation8 + $0x958] sm:$0xf0]  ;;  %v4332_v29 = vld [vmem:[#allocation8 + $0x400] sm:$0xf] }
 0x142   :  { %2915 = vmatmul.bf16.vlgmr.msra.gmra.mxu3 %v6160_v58  ;;  %2935 = vmatpush.bf16.msra.mxu2 %v3969_v50  ;;  %v4557_v50 = vor.u32 %v5619_v23, %v4556_v40  ;;  %v4416_v40 = vld [vmem:[#allocation8 + $0x4a8] sm:$0xf] }
 0x143   :  { %2972 = vmatpush.bf16.msrb.mxu3 %v4697_v31  ;;  %2948 = vmatpush.bf16.msrb.mxu0 %v4193_v44  ;;  %v5451_v31 = vld [vmem:[#allocation8 + $0x98] sm:$0xf0]  ;;  %v2643_v41 = vpop.f32.mrf.mxu0  ;;  %v5664_v44 = vld [vmem:[#allocation8 + $0x744] sm:$0xf] }
 0x144   :  { %5213 = vmatmul.msk.bf16.vlgmr.msra.gmra.mxu0 %vm234_vm0, %v6164_v18  ;;  %v3885_v42 = vor.u32 %v5451_v31, %v3884_v30 }
 0x145   :  { %2897 = vmatpush.bf16.msra.mxu1 %v4833_v1  ;;  %v5437_v1 = vld [vmem:[#allocation8 + $0x28] sm:$0xf0]  ;;  %v2656_v5 = vpop.f32.mrf.mxu1 }
 0x146   :  { %2936 = vmatpush.bf16.msra.mxu2 %v3941_v7  ;;  %v4529_v7 = vor.u32 %v5612_v57, %v4528_v56  ;;  %v5745_v56 = vld [vmem:[#allocation8 + $0x9c8] sm:$0xf0]  ;;  %v4388_v57 = vld [vmem:[#allocation8 + $0x470] sm:$0xf] }
 0x147   :  { %2973 = vmatpush.bf16.msrb.mxu3 %v4669_v45  ;;  %2949 = vmatpush.bf16.msrb.mxu0 %v4165_v62  ;;  %v4746_v45 = vld [vmem:[#allocation8 + $0x75c] sm:$0xf0]  ;;  %v5766_v62 = vld [vmem:[#allocation8 + $0xa70] sm:$0xf0]  ;;  %v2630_v0 = vpop.f32.mrf.mxu3  ;;  %v5061_v2 = vor.u32 %v5745_v56, %v5060_v55  ;;  %v4752_v56 = vld [vmem:[#allocation8 + $0x748] sm:$0xf] }
 0x148   :  { %v4749_v54 = vor.u32 %v5664_v44, %v4746_v45  ;;  %v2631_v4 = vadd.f32 %v2630_v0, %v2618_v32  ;;  %v5145_v12 = vor.u32 %v5766_v62, %v5144_v61  ;;  %v4892_v32 = vld [vmem:[#allocation8 + $0x860] sm:$0xf]  ;;  %v5584_v44 = vld [vmem:[#allocation8 + $0x4c0] sm:$0xf0]  ;;  %v5577_v61 = vld [vmem:[#allocation8 + $0x488] sm:$0xf0] }
 0x149   :  { %2898 = vmatpush.bf16.msra.mxu1 %v4805_v19  ;;  %v3829_v19 = vor.u32 %v5437_v1, %v3828_v60  ;;  %v5476_v45 = vld [vmem:[#allocation8 + $0x164] sm:$0xf]  ;;  %v4417_v53 = vor.u32 %v5584_v44, %v4416_v40  ;;  %v5469_v62 = vld [vmem:[#allocation8 + $0x12c] sm:$0xf]  ;;  %v4836_v0 = vld [vmem:[#allocation8 + $0x7f0] sm:$0xf]  ;;  %v4389_v3 = vor.u32 %v5577_v61, %v4388_v57 }
 0x14a   :  { %2937 = vmatpush.bf16.msra.mxu2 %v3913_v24  ;;  %v4444_v24 = vld [vmem:[#allocation8 + $0x4e0] sm:$0xf]  ;;  %v5689_v1 = vld [vmem:[#allocation8 + $0x808] sm:$0xf0]  ;;  %v4976_v44 = vld [vmem:[#allocation8 + $0x908] sm:$0xf] }
 0x14b   :  { %2974 = vmatpush.bf16.msrb.mxu3 %v4641_v63  ;;  %2950 = vmatpush.bf16.msrb.mxu0 %v4137_v14  ;;  %v2619_v63 = vpop.f32.mrf.mxu2  ;;  %v5605_v14 = vld [vmem:[#allocation8 + $0x568] sm:$0xf0]  ;;  %v2645_v17 = vpop.f32.mrf.mxu0  ;;  %v5668_v57 = vld [vmem:[#allocation8 + $0x760] sm:$0xf0] }
 0x14c   :  { %v4501_v31 = vor.u32 %v5605_v14, %v4500_v13  ;;  %v3970_v63 = vld [vmem:[#allocation8 + $0x144] sm:$0xf0]  ;;  %v5462_v13 = vld [vmem:[#allocation8 + $0xf4] sm:$0xf]  ;;  %v3942_v14 = vld [vmem:[#allocation8 + $0x10c] sm:$0xf0] }
 0x14d   :  { %2899 = vmatpush.bf16.msra.mxu1 %v4777_v37  ;;  %v5088_v37 = vld [vmem:[#allocation8 + $0x9e8] sm:$0xf]  ;;  %v2658_v47 = vpop.f32.mrf.mxu1  ;;  %v5717_v61 = vld [vmem:[#allocation8 + $0x8e8] sm:$0xf0] }
 0x14e   :  { %2938 = vmatpush.bf16.msra.mxu2 %v3885_v42  ;;  %v4893_v42 = vor.u32 %v5703_v33, %v4892_v32  ;;  %v5089_v52 = vor.u32 %v5752_v38, %v5088_v37  ;;  %v4780_v37 = vld [vmem:[#allocation8 + $0x780] sm:$0xf]  ;;  %v5675_v38 = vld [vmem:[#allocation8 + $0x798] sm:$0xf0] }
 0x14f   :  { %2975 = vmatpush.bf16.msrb.mxu3 %v4613_v16  ;;  %2951 = vmatpush.bf16.msrb.mxu0 %v4109_v34  ;;  %v2644_v16 = vadd.f32 %v2643_v41, %v2631_v4  ;;  %v5117_v34 = vor.u32 %v5759_v22, %v5116_v21  ;;  %v2632_v41 = vpop.f32.mrf.mxu3  ;;  %v3973_v4 = vor.u32 %v5469_v62, %v3970_v63 }
 0x151   :  { %2900 = vmatpush.bf16.msra.mxu1 %v4749_v54  ;;  %v6194_v30 = vadd.f32 %v2656_v5, %v2644_v16  ;;  %v4001_v54 = vor.u32 %v5476_v45, %v3998_v46  ;;  %v5032_v5 = vld [vmem:[#allocation8 + $0x978] sm:$0xf]  ;;  %v5724_v45 = vld [vmem:[#allocation8 + $0x920] sm:$0xf0]  ;;  %v4304_v46 = vld [vmem:[#allocation8 + $0x3c8] sm:$0xf] }
 0x152   :  { %2939 = vmatpush.bf16.msra.mxu2 %v3857_v59 }
 0x153   :  { %2976 = vmatpush.bf16.msrb.mxu3 %v4585_v35  ;;  %2952 = vmatpush.bf16.msrb.mxu0 %v4081_v49  ;;  %v4445_v35 = vor.u32 %v5591_v27, %v4444_v24  ;;  %v2669_v23 = vpop.f32.mrf.mxu2  ;;  %v4864_v49 = vld [vmem:[#allocation8 + $0x828] sm:$0xf]  ;;  %v2708_v59 = vpop.f32.mrf.mxu0  ;;  %v5004_v27 = vld [vmem:[#allocation8 + $0x940] sm:$0xf] }
 0x154   :  { %v2670_v8 = vadd.f32 %v2669_v23, %v753_v51  ;;  %v5005_v23 = vor.u32 %v5731_v28, %v5004_v27  ;;  %v5448_v51 = vld [vmem:[#allocation8 + $0x84] sm:$0xf]  ;;  %v4670_v27 = vld [vmem:[#allocation8 + $0x6bc] sm:$0xf0] }
 0x155   :  { %2901 = vmatpush.bf16.msra.mxu1 %v4721_v11  ;;  %v4837_v11 = vor.u32 %v5689_v1, %v4836_v0  ;;  %v2682_v16 = vpop.f32.mrf.mxu1  ;;  %v4276_v0 = vld [vmem:[#allocation8 + $0x390] sm:$0xf]  ;;  %v5549_v1 = vld [vmem:[#allocation8 + $0x3a8] sm:$0xf0] }
 0x156   :  { %2940 = vmatpush.bf16.msra.mxu2 %v3829_v19  ;;  %v4808_v19 = vld [vmem:[#allocation8 + $0x7b8] sm:$0xf]  ;;  %v2683_v21 = vadd.f32 %v2682_v16, %v2670_v8  ;;  %v4277_v16 = vor.u32 %v5549_v1, %v4276_v0  ;;  %v4614_v0 = vld [vmem:[#allocation8 + $0x64c] sm:$0xf0]  ;;  %v5693_v1 = vld [vmem:[#allocation8 + $0x82c] sm:$0xf] }
 0x157   :  { %2977 = vmatpush.bf16.msrb.mxu3 %v4557_v50  ;;  %2953 = vmatpush.bf16.msrb.mxu0 %v4053_v6  ;;  %v5696_v50 = vld [vmem:[#allocation8 + $0x840] sm:$0xf0]  ;;  %v5738_v6 = vld [vmem:[#allocation8 + $0x990] sm:$0xf0]  ;;  %v2695_v17 = vpop.f32.mrf.mxu3  ;;  %v4698_v8 = vld [vmem:[#allocation8 + $0x6f4] sm:$0xf0] }
 0x158   :  { %2902 = vmatmul.bf16.vlgmr.msra.gmra.mxu1 %v6158_v26  ;;  %v4865_v60 = vor.u32 %v5696_v50, %v4864_v49  ;;  %v5033_v22 = vor.u32 %v5738_v6, %v5032_v5  ;;  %v4781_v49 = vor.u32 %v5675_v38, %v4780_v37  ;;  %v5556_v50 = vld [vmem:[#allocation8 + $0x3e0] sm:$0xf0]  ;;  %v5441_v5 = vld [vmem:[#allocation8 + $0x4c] sm:$0xf]  ;;  %v3858_v6 = vld [vmem:[#allocation8 + $0x64] sm:$0xf0] }
 0x159   :  { %2959 = vmatpush.bf16.msrb.mxu1 %v4473_v20  ;;  %2941 = vmatmul.bf16.vlgmr.msra.gmra.mxu2 %v6143_v43  ;;  %v5682_v20 = vld [vmem:[#allocation8 + $0x7d0] sm:$0xf0]  ;;  %v4305_v62 = vor.u32 %v5556_v50, %v4304_v46  ;;  %v4446_v37 = vld [vmem:[#allocation8 + $0x4fc] sm:$0xf0] }
 0x15a   :  { %2985 = vmatpush.bf16.msrb.mxu2 %v4921_v25  ;;  %2954 = vmatmul.bf16.vlgmr.msrb.gmra.mxu0 %v6145_v48  ;;  %v3945_v25 = vor.u32 %v5462_v13, %v3942_v14  ;;  %v4809_v33 = vor.u32 %v5682_v20, %v4808_v19  ;;  %v5595_v13 = vld [vmem:[#allocation8 + $0x51c] sm:$0xf]  ;;  %v4474_v14 = vld [vmem:[#allocation8 + $0x534] sm:$0xf0]  ;;  %v5434_v19 = vld [vmem:[#allocation8 + $0x14] sm:$0xf] }
 0x15b   :  { %2978 = vmatpush.bf16.msrb.mxu3 %v4529_v7  ;;  %2998 = vmatpush.bf16.msra.mxu0 %v5145_v12  ;;  %v4360_v7 = vld [vmem:[#allocation8 + $0x438] sm:$0xf]  ;;  %v2671_v10 = vpop.f32.mrf.mxu2  ;;  %v5570_v12 = vld [vmem:[#allocation8 + $0x450] sm:$0xf0]  ;;  %v2710_v32 = vpop.f32.mrf.mxu0  ;;  %v4894_v50 = vld [vmem:[#allocation8 + $0x87c] sm:$0xf0] }
 0x15c   :  { %v4361_v24 = vor.u32 %v5570_v12, %v4360_v7  ;;  %v5651_v7 = vld [vmem:[#allocation8 + $0x6dc] sm:$0xf]  ;;  %v5200_v10 = vld [vmem:[#allocation8 + $0xac8] sm:$0xf]  ;;  %v5780_v12 = vld [vmem:[#allocation8 + $0xae0] sm:$0xf0] }
 0x15d   :  { %2960 = vmatpush.bf16.msrb.mxu1 %v4445_v35  ;;  %v5455_v35 = vld [vmem:[#allocation8 + $0xbc] sm:$0xf]  ;;  %v5172_v32 = vld [vmem:[#allocation8 + $0xa90] sm:$0xf] }
 0x15e   :  { %2986 = vmatpush.bf16.msrb.mxu2 %v4893_v42 }
 0x15f   :  { %2979 = vmatpush.bf16.msrb.mxu3 %v4501_v31  ;;  %2999 = vmatpush.bf16.msra.mxu0 %v5117_v34  ;;  %v2696_v31 = vadd.f32 %v2695_v17, %v2683_v21  ;;  %v5563_v34 = vld [vmem:[#allocation8 + $0x418] sm:$0xf0]  ;;  %v2697_v55 = vpop.f32.mrf.mxu3  ;;  %v3861_v17 = vor.u32 %v5441_v5, %v3858_v6  ;;  %v4390_v5 = vld [vmem:[#allocation8 + $0x48c] sm:$0xf0]  ;;  %v5525_v6 = vld [vmem:[#allocation8 + $0x2ec] sm:$0xf] }
 0x160   :  { %v4333_v41 = vor.u32 %v5563_v34, %v4332_v29  ;;  %v5201_v29 = vor.u32 %v5780_v12, %v5200_v10  ;;  %v4922_v34 = vld [vmem:[#allocation8 + $0x8b4] sm:$0xf0]  ;;  %v5532_v55 = vld [vmem:[#allocation8 + $0x324] sm:$0xf] }
 0x161   :  { %2961 = vmatpush.bf16.msrb.mxu1 %v4417_v53  ;;  %v2709_v40 = vadd.f32 %v2708_v59, %v2696_v31  ;;  %v4977_v59 = vor.u32 %v5724_v45, %v4976_v44  ;;  %v4477_v31 = vor.u32 %v5595_v13, %v4474_v14  ;;  %v5637_v44 = vld [vmem:[#allocation8 + $0x66c] sm:$0xf]  ;;  %v4586_v13 = vld [vmem:[#allocation8 + $0x614] sm:$0xf0]  ;;  %v5686_v14 = vld [vmem:[#allocation8 + $0x7f4] sm:$0xf] }
 0x162   :  { %2980 = vmatmul.bf16.vlgmr.msrb.gmra.mxu3 %v6153_v15  ;;  %2987 = vmatpush.bf16.msrb.mxu2 %v4865_v60  ;;  %v4948_v60 = vld [vmem:[#allocation8 + $0x8d0] sm:$0xf] }
 0x163   :  { %3024 = vmatpush.bf16.msra.mxu3 %v4029_v36  ;;  %3000 = vmatpush.bf16.msra.mxu0 %v5089_v52  ;;  %v3914_v36 = vld [vmem:[#allocation8 + $0xd4] sm:$0xf0]  ;;  %v2721_v47 = vpop.f32.mrf.mxu2  ;;  %v3886_v52 = vld [vmem:[#allocation8 + $0x9c] sm:$0xf0] }
 0x164   :  { %v3917_v42 = vor.u32 %v5455_v35, %v3914_v36  ;;  %v6201_v53 = vadd.f32 %v2721_v47, %v2709_v40  ;;  %v3889_v63 = vor.u32 %v5448_v51, %v3886_v52  ;;  %v5773_v35 = vld [vmem:[#allocation8 + $0xaa8] sm:$0xf0]  ;;  %v5588_v36 = vld [vmem:[#allocation8 + $0x4e4] sm:$0xf]  ;;  %v5539_v40 = vld [vmem:[#allocation8 + $0x35c] sm:$0xf] }
 0x165   :  { %2962 = vmatpush.bf16.msrb.mxu1 %v4389_v3  ;;  %v4753_v3 = vor.u32 %v5668_v57, %v4752_v56  ;;  %v5173_v45 = vor.u32 %v5773_v35, %v5172_v32  ;;  %v4449_v46 = vor.u32 %v5588_v36, %v4446_v37  ;;  %v4642_v47 = vld [vmem:[#allocation8 + $0x684] sm:$0xf0]  ;;  %v5581_v52 = vld [vmem:[#allocation8 + $0x4ac] sm:$0xf]  ;;  %v4222_v56 = vld [vmem:[#allocation8 + $0x33c] sm:$0xf0] }
 0x166   :  { %2988 = vmatpush.bf16.msrb.mxu2 %v4837_v11  ;;  %v4949_v11 = vor.u32 %v5717_v61, %v4948_v60  ;;  %v5630_v61 = vld [vmem:[#allocation8 + $0x634] sm:$0xf]  ;;  %v4558_v36 = vld [vmem:[#allocation8 + $0x5dc] sm:$0xf0]  ;;  %v5679_v37 = vld [vmem:[#allocation8 + $0x7bc] sm:$0xf] }
 0x167   :  { %3025 = vmatpush.bf16.msra.mxu3 %v4001_v54  ;;  %3001 = vmatpush.bf16.msra.mxu0 %v5061_v2  ;;  %v2684_v54 = vpop.f32.mrf.mxu1  ;;  %v4724_v2 = vld [vmem:[#allocation8 + $0x710] sm:$0xf]  ;;  %v6203_v28 = vpop.f32.mrf.mxu3 }
 0x168   :  { %v4418_v54 = vld [vmem:[#allocation8 + $0x4c4] sm:$0xf0] }
 0x169   :  { %2963 = vmatpush.bf16.msrb.mxu1 %v4361_v24  ;;  %v3830_v24 = vld [vmem:[#allocation8 + $0x2c] sm:$0xf0] }
 0x16a   :  { %2989 = vmatpush.bf16.msrb.mxu2 %v4809_v33  ;;  %v5707_v33 = vld [vmem:[#allocation8 + $0x89c] sm:$0xf]  ;;  %v3833_v38 = vor.u32 %v5434_v19, %v3830_v24  ;;  %v5518_v24 = vld [vmem:[#allocation8 + $0x2b4] sm:$0xf] }
 0x16b   :  { %3026 = vmatpush.bf16.msra.mxu3 %v3973_v4  ;;  %3002 = vmatpush.bf16.msra.mxu0 %v5033_v22  ;;  %v5661_v4 = vld [vmem:[#allocation8 + $0x728] sm:$0xf0]  ;;  %v2723_v20 = vpop.f32.mrf.mxu2  ;;  %v4701_v22 = vor.u32 %v5651_v7, %v4698_v8  ;;  %v4194_v7 = vld [vmem:[#allocation8 + $0x304] sm:$0xf0]  ;;  %v4617_v8 = vor.u32 %v5630_v61, %v4614_v0  ;;  %v4110_v61 = vld [vmem:[#allocation8 + $0x25c] sm:$0xf0] }
 0x16c   :  { %v4725_v21 = vor.u32 %v5661_v4, %v4724_v2  ;;  %v4866_v2 = vld [vmem:[#allocation8 + $0x844] sm:$0xf0]  ;;  %v5574_v4 = vld [vmem:[#allocation8 + $0x474] sm:$0xf]  ;;  %v4197_v19 = vor.u32 %v5525_v6, %v4194_v7  ;;  %v5567_v20 = vld [vmem:[#allocation8 + $0x43c] sm:$0xf] }
 0x16d   :  { %2964 = vmatpush.bf16.msrb.mxu1 %v4333_v41  ;;  %v4869_v10 = vor.u32 %v5693_v1, %v4866_v2  ;;  %v4393_v12 = vor.u32 %v5574_v4, %v4390_v5  ;;  %v5602_v0 = vld [vmem:[#allocation8 + $0x554] sm:$0xf]  ;;  %v4502_v1 = vld [vmem:[#allocation8 + $0x56c] sm:$0xf0]  ;;  %v5665_v6 = vld [vmem:[#allocation8 + $0x74c] sm:$0xf] }
 0x16e   :  { %2990 = vmatpush.bf16.msrb.mxu2 %v4781_v49  ;;  %v5700_v49 = vld [vmem:[#allocation8 + $0x864] sm:$0xf]  ;;  %v5546_v2 = vld [vmem:[#allocation8 + $0x394] sm:$0xf]  ;;  %v4278_v5 = vld [vmem:[#allocation8 + $0x3ac] sm:$0xf0] }
 0x16f   :  { %3027 = vmatpush.bf16.msra.mxu3 %v3945_v25  ;;  %3003 = vmatpush.bf16.msra.mxu0 %v5005_v23  ;;  %v5644_v25 = vld [vmem:[#allocation8 + $0x6a4] sm:$0xf]  ;;  %v4250_v23 = vld [vmem:[#allocation8 + $0x374] sm:$0xf0]  ;;  %v2760_v57 = vpop.f32.mrf.mxu0  ;;  %v4897_v60 = vor.u32 %v5700_v49, %v4894_v50  ;;  %v4530_v50 = vld [vmem:[#allocation8 + $0x5a4] sm:$0xf0] }
 0x170   :  { %v4673_v41 = vor.u32 %v5644_v25, %v4670_v27  ;;  %v4253_v51 = vor.u32 %v5539_v40, %v4250_v23  ;;  %v4166_v25 = vld [vmem:[#allocation8 + $0x2cc] sm:$0xf0]  ;;  %v754_v27 = vperm.slane %v6186_v39, 2  ;;  %v5560_v40 = vld [vmem:[#allocation8 + $0x404] sm:$0xf] }
 0x171   :  { %2965 = vmatpush.bf16.msrb.mxu1 %v4305_v62  ;;  %v2749_v62 = vpop.f32.mrf.mxu3  ;;  %v4334_v23 = vld [vmem:[#allocation8 + $0x41c] sm:$0xf0]  ;;  %v5511_v39 = vld [vmem:[#allocation8 + $0x27c] sm:$0xf]  ;;  %v4754_v7 = vld [vmem:[#allocation8 + $0x764] sm:$0xf0] }
 0x172   :  { %2991 = vmatpush.bf16.msrb.mxu2 %v4753_v3  ;;  %v4225_v3 = vor.u32 %v5532_v55, %v4222_v56  ;;  %v4337_v49 = vor.u32 %v5560_v40, %v4334_v23  ;;  %v5174_v40 = vld [vmem:[#allocation8 + $0xaac] sm:$0xf0]  ;;  %v5763_v23 = vld [vmem:[#allocation8 + $0xa5c] sm:$0xf] }
 0x173   :  { %3028 = vmatpush.bf16.msra.mxu3 %v3917_v42  ;;  %3004 = vmatpush.bf16.msra.mxu0 %v4977_v59  ;;  %v4925_v42 = vor.u32 %v5707_v33, %v4922_v34  ;;  %v4645_v59 = vor.u32 %v5637_v44, %v4642_v47  ;;  %v5616_v33 = vld [vmem:[#allocation8 + $0x5c4] sm:$0xf]  ;;  %v2761_v44 = vadd.f32 %v2760_v57, %v754_v27  ;;  %v5609_v47 = vld [vmem:[#allocation8 + $0x58c] sm:$0xf] }
 0x174   :  { %v5504_v57 = vld [vmem:[#allocation8 + $0x244] sm:$0xf]  ;;  %v4533_v62 = vor.u32 %v5609_v47, %v4530_v50  ;;  %v5473_v50 = vld [vmem:[#allocation8 + $0x148] sm:$0xf0] }
 0x175   :  { %2966 = vmatpush.bf16.msrb.mxu1 %v4277_v16  ;;  %v4838_v16 = vld [vmem:[#allocation8 + $0x80c] sm:$0xf0] }
 0x176   :  { %2992 = vmatpush.bf16.msrb.mxu2 %v4725_v21  ;;  %v4362_v21 = vld [vmem:[#allocation8 + $0x454] sm:$0xf0]  ;;  %v4841_v32 = vor.u32 %v5686_v14, %v4838_v16  ;;  %v4082_v14 = vld [vmem:[#allocation8 + $0x224] sm:$0xf0]  ;;  %v5777_v16 = vld [vmem:[#allocation8 + $0xacc] sm:$0xf] }
 0x177   :  { %3029 = vmatpush.bf16.msra.mxu3 %v3889_v63  ;;  %3005 = vmatpush.bf16.msra.mxu0 %v4949_v11  ;;  %v4421_v63 = vor.u32 %v5581_v52, %v4418_v54  ;;  %v5623_v11 = vld [vmem:[#allocation8 + $0x5fc] sm:$0xf]  ;;  %v4365_v35 = vor.u32 %v5567_v20, %v4362_v21  ;;  %v4782_v52 = vld [vmem:[#allocation8 + $0x79c] sm:$0xf0]  ;;  %v4757_v20 = vor.u32 %v5665_v6, %v4754_v7  ;;  %v5658_v21 = vld [vmem:[#allocation8 + $0x714] sm:$0xf] }
 0x178   :  { %2967 = vmatmul.bf16.vlgmr.msrb.gmra.mxu1 %v6151_v9  ;;  %v4424_v6 = vld [vmem:[#allocation8 + $0x4b0] sm:$0xf]  ;;  %v5585_v7 = vld [vmem:[#allocation8 + $0x4c8] sm:$0xf0] }
 0x179   :  { %3017 = vmatpush.bf16.msra.mxu1 %v5201_v29  ;;  %2993 = vmatmul.bf16.vlgmr.msrb.gmra.mxu2 %v6158_v26  ;;  %v2762_v29 = vpop.f32.mrf.mxu0 }
 0x17a   :  { %3050 = vmatpush.bf16.msra.mxu2 %v4477_v31  ;;  %3006 = vmatmul.bf16.vlgmr.msra.gmra.mxu0 %v6160_v58  ;;  %v4589_v31 = vor.u32 %v5623_v11, %v4586_v13  ;;  %v5487_v11 = vld [vmem:[#allocation8 + $0x1b8] sm:$0xf0]  ;;  %v4004_v29 = vld [vmem:[#allocation8 + $0x168] sm:$0xf] }
 0x17b   :  { %3030 = vmatpush.bf16.msra.mxu3 %v3861_v17  ;;  %3063 = vmatpush.bf16.msrb.mxu0 %v4701_v22  ;;  %v2734_v17 = vpop.f32.mrf.mxu1 }
 0x17c   :  { %v2735_v22 = vadd.f32 %v2734_v17, %v6201_v53  ;;  %v4169_v53 = vor.u32 %v5518_v24, %v4166_v25  ;;  %v5202_v17 = vld [vmem:[#allocation8 + $0xae4] sm:$0xf0]  ;;  %v4281_v25 = vor.u32 %v5546_v2, %v4278_v5  ;;  %v5466_v2 = vld [vmem:[#allocation8 + $0x110] sm:$0xf0] }
 0x17d   :  { %3018 = vmatpush.bf16.msra.mxu1 %v5173_v45  ;;  %v4561_v45 = vor.u32 %v5616_v33, %v4558_v36  ;;  %v4054_v36 = vld [vmem:[#allocation8 + $0x1ec] sm:$0xf0] }
 0x17e   :  { %3051 = vmatpush.bf16.msra.mxu2 %v4449_v46  ;;  %v6212_v34 = vadd.f32 %v6203_v28, %v2735_v22  ;;  %v2773_v28 = vpop.f32.mrf.mxu2  ;;  %v4726_v22 = vld [vmem:[#allocation8 + $0x72c] sm:$0xf0] }
 0x17f   :  { %3031 = vmatpush.bf16.msra.mxu3 %v3833_v38  ;;  %3064 = vmatpush.bf16.msrb.mxu0 %v4673_v41  ;;  %v4810_v38 = vld [vmem:[#allocation8 + $0x7d4] sm:$0xf0]  ;;  %v2786_v41 = vpop.f32.mrf.mxu3  ;;  %v2774_v54 = vadd.f32 %v2773_v28, %v2761_v44  ;;  %v5543_v44 = vld [vmem:[#allocation8 + $0x378] sm:$0xf0] }
 0x180   :  { %v4813_v46 = vor.u32 %v5679_v37, %v4810_v38  ;;  %v4480_v37 = vld [vmem:[#allocation8 + $0x520] sm:$0xf]  ;;  %v5599_v38 = vld [vmem:[#allocation8 + $0x538] sm:$0xf0] }
 0x181   :  { %3037 = vmatpush.bf16.msrb.mxu1 %v4253_v51  ;;  %v5672_v51 = vld [vmem:[#allocation8 + $0x784] sm:$0xf] }
 0x182   :  { %3032 = vmatmul.bf16.vlgmr.msra.gmra.mxu3 %v6143_v43  ;;  %3052 = vmatpush.bf16.msra.mxu2 %v4421_v63  ;;  %v4785_v63 = vor.u32 %v5672_v51, %v4782_v52 }
 0x183   :  { %3076 = vmatpush.bf16.msrb.mxu3 %v4925_v42  ;;  %3065 = vmatpush.bf16.msrb.mxu0 %v4645_v59  ;;  %v4138_v42 = vld [vmem:[#allocation8 + $0x294] sm:$0xf0]  ;;  %v2736_v55 = vpop.f32.mrf.mxu1  ;;  %v5553_v59 = vld [vmem:[#allocation8 + $0x3cc] sm:$0xf] }
 0x184   :  { %v4141_v56 = vor.u32 %v5511_v39, %v4138_v42  ;;  %v5146_v39 = vld [vmem:[#allocation8 + $0xa74] sm:$0xf0]  ;;  %v4256_v42 = vld [vmem:[#allocation8 + $0x360] sm:$0xf]  ;;  %v4452_v55 = vld [vmem:[#allocation8 + $0x4e8] sm:$0xf] }
 0x185   :  { %3038 = vmatpush.bf16.msrb.mxu1 %v4225_v3  ;;  %v6216_v3 = vadd.f32 %v2786_v41, %v2774_v54  ;;  %v4729_v41 = vor.u32 %v5658_v21, %v4726_v22  ;;  %v5149_v52 = vor.u32 %v5763_v23, %v5146_v39  ;;  %v4257_v54 = vor.u32 %v5543_v44, %v4256_v42  ;;  %v4368_v39 = vld [vmem:[#allocation8 + $0x440] sm:$0xf]  ;;  %v5571_v42 = vld [vmem:[#allocation8 + $0x458] sm:$0xf0] }
 0x186   :  { %3053 = vmatpush.bf16.msra.mxu2 %v4393_v12  ;;  %v5497_v12 = vld [vmem:[#allocation8 + $0x20c] sm:$0xf]  ;;  %v2775_v24 = vpop.f32.mrf.mxu2  ;;  %v5735_v44 = vld [vmem:[#allocation8 + $0x97c] sm:$0xf] }
 0x187   :  { %3077 = vmatpush.bf16.msrb.mxu3 %v4897_v60  ;;  %3066 = vmatpush.bf16.msrb.mxu0 %v4617_v8  ;;  %v4306_v60 = vld [vmem:[#allocation8 + $0x3e4] sm:$0xf0]  ;;  %v4113_v8 = vor.u32 %v5504_v57, %v4110_v61  ;;  %v2788_v13 = vpop.f32.mrf.mxu3  ;;  %v4085_v33 = vor.u32 %v5497_v12, %v4082_v14  ;;  %v5536_v61 = vld [vmem:[#allocation8 + $0x340] sm:$0xf0]  ;;  %v5529_v12 = vld [vmem:[#allocation8 + $0x308] sm:$0xf0]  ;;  %v4425_v14 = vor.u32 %v5585_v7, %v4424_v6 }
 0x188   :  { %5214 = vmatmul.msk.bf16.vlgmr.msra.gmra.mxu1 %vm234_vm0, %v6164_v18  ;;  %v4309_v4 = vor.u32 %v5553_v59, %v4306_v60  ;;  %v5756_v59 = vld [vmem:[#allocation8 + $0xa24] sm:$0xf]  ;;  %v5118_v60 = vld [vmem:[#allocation8 + $0xa3c] sm:$0xf0]  ;;  %v4228_v57 = vld [vmem:[#allocation8 + $0x328] sm:$0xf] }
 0x189   :  { %3039 = vmatpush.bf16.msrb.mxu1 %v4197_v19  ;;  %v4505_v19 = vor.u32 %v5602_v0, %v4502_v1  ;;  %v3948_v1 = vld [vmem:[#allocation8 + $0xf8] sm:$0xf]  ;;  %v4229_v5 = vor.u32 %v5536_v61, %v4228_v57  ;;  %v5564_v57 = vld [vmem:[#allocation8 + $0x420] sm:$0xf0]  ;;  %v5438_v7 = vld [vmem:[#allocation8 + $0x30] sm:$0xf0] }
 0x18a   :  { %3054 = vmatpush.bf16.msra.mxu2 %v4365_v35  ;;  %v5205_v35 = vor.u32 %v5777_v16, %v5202_v17  ;;  %v3949_v13 = vor.u32 %v5466_v2, %v3948_v1  ;;  %v3920_v16 = vld [vmem:[#allocation8 + $0xc0] sm:$0xf]  ;;  %v5459_v17 = vld [vmem:[#allocation8 + $0xd8] sm:$0xf0]  ;;  %v4396_v24 = vld [vmem:[#allocation8 + $0x478] sm:$0xf] }
 0x18b   :  { %3078 = vmatpush.bf16.msrb.mxu3 %v4869_v10  ;;  %3067 = vmatpush.bf16.msrb.mxu0 %v4589_v31  ;;  %v4032_v10 = vld [vmem:[#allocation8 + $0x1a0] sm:$0xf]  ;;  %v5480_v31 = vld [vmem:[#allocation8 + $0x180] sm:$0xf0] }
 0x18c   :  { %v4033_v27 = vor.u32 %v5487_v11, %v4032_v10  ;;  %v5090_v10 = vld [vmem:[#allocation8 + $0xa04] sm:$0xf0]  ;;  %v4200_v11 = vld [vmem:[#allocation8 + $0x2f0] sm:$0xf]  ;;  %v5728_v61 = vld [vmem:[#allocation8 + $0x944] sm:$0xf] }
 0x18d   :  { %3040 = vmatpush.bf16.msrb.mxu1 %v4169_v53  ;;  %v5770_v53 = vld [vmem:[#allocation8 + $0xa94] sm:$0xf]  ;;  %v4201_v22 = vor.u32 %v5529_v12, %v4200_v11 }
 0x18e   :  { %3055 = vmatpush.bf16.msra.mxu2 %v4337_v49  ;;  %v5177_v28 = vor.u32 %v5770_v53, %v5174_v40  ;;  %v3976_v49 = vld [vmem:[#allocation8 + $0x130] sm:$0xf]  ;;  %v3892_v53 = vld [vmem:[#allocation8 + $0x88] sm:$0xf]  ;;  %v5452_v40 = vld [vmem:[#allocation8 + $0xa0] sm:$0xf0] }
 0x18f   :  { %3079 = vmatpush.bf16.msrb.mxu3 %v4841_v32  ;;  %3068 = vmatpush.bf16.msrb.mxu0 %v4561_v45  ;;  %v5490_v32 = vld [vmem:[#allocation8 + $0x1d4] sm:$0xf]  ;;  %v4005_v45 = vor.u32 %v5480_v31, %v4004_v29  ;;  %v6219_v51 = vpop.f32.mrf.mxu3  ;;  %v5062_v31 = vld [vmem:[#allocation8 + $0x9cc] sm:$0xf0] }
 0x190   :  { %v4057_v47 = vor.u32 %v5490_v32, %v4054_v36  ;;  %v4172_v32 = vld [vmem:[#allocation8 + $0x2b8] sm:$0xf]  ;;  %v3921_v36 = vor.u32 %v5459_v17, %v3920_v16  ;;  %v5721_v16 = vld [vmem:[#allocation8 + $0x90c] sm:$0xf]  ;;  %v4978_v17 = vld [vmem:[#allocation8 + $0x924] sm:$0xf0] }
 0x191   :  { %3041 = vmatpush.bf16.msrb.mxu1 %v4141_v56  ;;  %v5592_v56 = vld [vmem:[#allocation8 + $0x500] sm:$0xf0] }
 0x192   :  { %3056 = vmatpush.bf16.msra.mxu2 %v4309_v4  ;;  %v4453_v0 = vor.u32 %v5592_v56, %v4452_v55  ;;  %v5121_v4 = vor.u32 %v5756_v59, %v5118_v60  ;;  %v4340_v60 = vld [vmem:[#allocation8 + $0x408] sm:$0xf] }
 0x193   :  { %3080 = vmatpush.bf16.msrb.mxu3 %v4813_v46  ;;  %3069 = vmatpush.bf16.msrb.mxu0 %v4533_v62  ;;  %v4481_v46 = vor.u32 %v5599_v38, %v4480_v37  ;;  %v2812_v62 = vpop.f32.mrf.mxu0  ;;  %v4341_v6 = vor.u32 %v5564_v57, %v4340_v60  ;;  %v5648_v60 = vld [vmem:[#allocation8 + $0x6c0] sm:$0xf0] }
 0x195   :  { %3042 = vmatpush.bf16.msrb.mxu1 %v4113_v8  ;;  %v5749_v8 = vld [vmem:[#allocation8 + $0x9ec] sm:$0xf] }
 0x196   :  { %3057 = vmatpush.bf16.msra.mxu2 %v4281_v25  ;;  %v5093_v21 = vor.u32 %v5749_v8, %v5090_v10  ;;  %v5578_v25 = vld [vmem:[#allocation8 + $0x490] sm:$0xf0]  ;;  %v4312_v8 = vld [vmem:[#allocation8 + $0x3d0] sm:$0xf]  ;;  %v5557_v10 = vld [vmem:[#allocation8 + $0x3e8] sm:$0xf0] }
 0x197   :  { %3081 = vmatpush.bf16.msrb.mxu3 %v4785_v63  ;;  %3070 = vmatpush.bf16.msrb.mxu0 %v4505_v19  ;;  %v3977_v63 = vor.u32 %v5473_v50, %v3976_v49  ;;  %v2799_v19 = vpop.f32.mrf.mxu1  ;;  %v4397_v37 = vor.u32 %v5578_v25, %v4396_v24  ;;  %v4369_v49 = vor.u32 %v5571_v42, %v4368_v39  ;;  %v3864_v50 = vld [vmem:[#allocation8 + $0x50] sm:$0xf]  ;;  %v4284_v25 = vld [vmem:[#allocation8 + $0x398] sm:$0xf]  ;;  %v5655_v39 = vld [vmem:[#allocation8 + $0x6f8] sm:$0xf0] }
 0x198   :  { %v2800_v29 = vadd.f32 %v2799_v19, %v6216_v3  ;;  %v4144_v3 = vld [vmem:[#allocation8 + $0x280] sm:$0xf]  ;;  %v5501_v19 = vld [vmem:[#allocation8 + $0x228] sm:$0xf0] }
 0x199   :  { %3043 = vmatpush.bf16.msrb.mxu1 %v4085_v33  ;;  %3058 = vmatmul.bf16.vlgmr.msra.gmra.mxu2 %v6151_v9  ;;  %v5522_v33 = vld [vmem:[#allocation8 + $0x2d0] sm:$0xf0] }
 0x19a   :  { %3108 = vmatpush.bf16.msrb.mxu2 %v5205_v35  ;;  %3071 = vmatmul.bf16.vlgmr.msrb.gmra.mxu0 %v6153_v15  ;;  %v2813_v38 = vadd.f32 %v2812_v62, %v2800_v29  ;;  %v5006_v62 = vld [vmem:[#allocation8 + $0x95c] sm:$0xf0]  ;;  %v4900_v29 = vld [vmem:[#allocation8 + $0x868] sm:$0xf] }
 0x19b   :  { %3082 = vmatpush.bf16.msrb.mxu3 %v4757_v20  ;;  %3115 = vmatpush.bf16.msra.mxu0 %v4033_v27  ;;  %v2840_v20 = vpop.f32.mrf.mxu3  ;;  %v5742_v27 = vld [vmem:[#allocation8 + $0x9b4] sm:$0xf]  ;;  %v2814_v35 = vpop.f32.mrf.mxu0  ;;  %v5009_v11 = vor.u32 %v5728_v61, %v5006_v62  ;;  %v5124_v61 = vld [vmem:[#allocation8 + $0xa28] sm:$0xf]  ;;  %v5760_v62 = vld [vmem:[#allocation8 + $0xa40] sm:$0xf0] }
 0x19c   :  { %v5065_v23 = vor.u32 %v5742_v27, %v5062_v31  ;;  %v5550_v27 = vld [vmem:[#allocation8 + $0x3b0] sm:$0xf0]  ;;  %v4981_v31 = vor.u32 %v5721_v16, %v4978_v17  ;;  %v4816_v17 = vld [vmem:[#allocation8 + $0x7c0] sm:$0xf] }
 0x19d   :  { %3044 = vmatpush.bf16.msrb.mxu1 %v4057_v47  ;;  %v3893_v47 = vor.u32 %v5452_v40, %v3892_v53  ;;  %v5714_v35 = vld [vmem:[#allocation8 + $0x8d4] sm:$0xf]  ;;  %v5208_v53 = vld [vmem:[#allocation8 + $0xad0] sm:$0xf]  ;;  %v4285_v42 = vor.u32 %v5550_v27, %v4284_v25 }
 0x19e   :  { %3109 = vmatpush.bf16.msrb.mxu2 %v5177_v28  ;;  %v2825_v28 = vpop.f32.mrf.mxu2 }
 0x19f   :  { %3083 = vmatpush.bf16.msrb.mxu3 %v4729_v41  ;;  %3116 = vmatpush.bf16.msra.mxu0 %v4005_v45  ;;  %v4173_v41 = vor.u32 %v5522_v33, %v4172_v32  ;;  %v5034_v45 = vld [vmem:[#allocation8 + $0x994] sm:$0xf0]  ;;  %v2801_v55 = vpop.f32.mrf.mxu1  ;;  %v5704_v33 = vld [vmem:[#allocation8 + $0x880] sm:$0xf0] }
 0x1a0   :  { %3045 = vmatmul.bf16.vlgmr.msrb.gmra.mxu1 %v6145_v48  ;;  %v5037_v56 = vor.u32 %v5735_v44, %v5034_v45  ;;  %v4901_v44 = vor.u32 %v5704_v33, %v4900_v29  ;;  %v5152_v45 = vld [vmem:[#allocation8 + $0xa60] sm:$0xf]  ;;  %v4788_v29 = vld [vmem:[#allocation8 + $0x788] sm:$0xf] }
 0x1a1   :  { %3089 = vmatpush.bf16.msra.mxu1 %v5149_v52  ;;  %v5445_v52 = vld [vmem:[#allocation8 + $0x68] sm:$0xf0]  ;;  %v5795_v33 = vld [vmem:[#allocation11 + $0x68] sm:$0xff] }
 0x1a2   :  { %3128 = vmatpush.bf16.msra.mxu2 %v4257_v54  ;;  %3084 = vmatmul.bf16.vlgmr.msrb.gmra.mxu3 %v6158_v26  ;;  %v2826_v54 = vadd.f32 %v2825_v28, %v2813_v38  ;;  %v5494_v38 = vld [vmem:[#allocation8 + $0x1f0] sm:$0xf0] }
 0x1a3   :  { %3141 = vmatpush.bf16.msra.mxu3 %v4481_v46  ;;  %3117 = vmatpush.bf16.msra.mxu0 %v3977_v63  ;;  %v5515_v46 = vld [vmem:[#allocation8 + $0x298] sm:$0xf0]  ;;  %v4116_v63 = vld [vmem:[#allocation8 + $0x248] sm:$0xf] }
 0x1a4   :  { %v4145_v59 = vor.u32 %v5515_v46, %v4144_v3  ;;  %v6228_v1 = vadd.f32 %v6219_v51, %v2826_v54  ;;  %v4088_v51 = vld [vmem:[#allocation8 + $0x210] sm:$0xf]  ;;  %v5767_v3 = vld [vmem:[#allocation8 + $0xa78] sm:$0xf0]  ;;  %v5180_v54 = vld [vmem:[#allocation8 + $0xa98] sm:$0xf] }
 0x1a5   :  { %3090 = vmatpush.bf16.msra.mxu1 %v5121_v4  ;;  %v6230_v2 = vpop.f32.mrf.mxu3  ;;  %v3865_v4 = vor.u32 %v5445_v52, %v3864_v50  ;;  %v4089_v32 = vor.u32 %v5501_v19, %v4088_v51  ;;  %v4872_v50 = vld [vmem:[#allocation8 + $0x830] sm:$0xf]  ;;  %v5697_v52 = vld [vmem:[#allocation8 + $0x848] sm:$0xf0]  ;;  %v5153_v55 = vor.u32 %v5767_v3, %v5152_v45  ;;  %v5683_v51 = vld [vmem:[#allocation8 + $0x7d8] sm:$0xf0] }
 0x1a6   :  { %3129 = vmatpush.bf16.msra.mxu2 %v4229_v5  ;;  %v3836_v5 = vld [vmem:[#allocation8 + $0x18] sm:$0xf]  ;;  %v5796_v19 = vld [vmem:[#allocation11 + $0x70] sm:$0xff]  ;;  %v4817_v25 = vor.u32 %v5683_v51, %v4816_v17  ;;  %v5718_v17 = vld [vmem:[#allocation8 + $0x8f0] sm:$0xf0] }
 0x1a7   :  { %3142 = vmatpush.bf16.msra.mxu3 %v4453_v0  ;;  %3118 = vmatpush.bf16.msra.mxu0 %v3949_v13  ;;  %v5508_v0 = vld [vmem:[#allocation8 + $0x260] sm:$0xf0]  ;;  %v4928_v13 = vld [vmem:[#allocation8 + $0x8a0] sm:$0xf]  ;;  %v3837_v20 = vor.u32 %v5438_v7, %v3836_v5  ;;  %v5690_v5 = vld [vmem:[#allocation8 + $0x810] sm:$0xf0] }
 0x1a8   :  { %v4117_v12 = vor.u32 %v5508_v0, %v4116_v63  ;;  %v4873_v63 = vor.u32 %v5697_v52, %v4872_v50  ;;  %v5797_v7 = vld [vmem:[#allocation11 + $0x78] sm:$0xff]  ;;  %v5794_v45 = vld [vmem:[#allocation11 + $0x60] sm:$0xff]  ;;  %v4564_v3 = vld [vmem:[#allocation8 + $0x5c8] sm:$0xf] }
 0x1a9   :  { %3091 = vmatpush.bf16.msra.mxu1 %v5093_v21  ;;  %5215 = vmatmul.msk.bf16.vlgmr.msrb.gmra.mxu2 %vm234_vm0, %v6164_v18  ;;  %v2827_v21 = vpop.f32.mrf.mxu2 }
 0x1aa   :  { %3130 = vmatpush.bf16.msra.mxu2 %v4201_v22  ;;  %v4313_v22 = vor.u32 %v5557_v10, %v4312_v8  ;;  %v4648_v8 = vld [vmem:[#allocation8 + $0x670] sm:$0xf]  ;;  %v5641_v10 = vld [vmem:[#allocation8 + $0x688] sm:$0xf0]  ;;  %v5634_v21 = vld [vmem:[#allocation8 + $0x650] sm:$0xf0] }
 0x1ab   :  { %3143 = vmatpush.bf16.msra.mxu3 %v4425_v14  ;;  %3119 = vmatpush.bf16.msra.mxu0 %v3921_v36  ;;  %v5711_v14 = vld [vmem:[#allocation8 + $0x8b8] sm:$0xf0]  ;;  %v4950_v36 = vld [vmem:[#allocation8 + $0x8ec] sm:$0xf0]  ;;  %v4649_v16 = vor.u32 %v5641_v10, %v4648_v8 }
 0x1ac   :  { %v4929_v24 = vor.u32 %v5711_v14, %v4928_v13  ;;  %v4953_v46 = vor.u32 %v5714_v35, %v4950_v36  ;;  %v4592_v35 = vld [vmem:[#allocation8 + $0x600] sm:$0xf]  ;;  %v5627_v36 = vld [vmem:[#allocation8 + $0x618] sm:$0xf0] }
 0x1ad   :  { %3092 = vmatpush.bf16.msra.mxu1 %v5065_v23  ;;  %v2866_v40 = vpop.f32.mrf.mxu3  ;;  %v5781_v23 = vld [vmem:[#allocation8 + $0xae8] sm:$0xf0] }
 0x1ae   :  { %3131 = vmatpush.bf16.msra.mxu2 %v4173_v41  ;;  %v4704_v41 = vld [vmem:[#allocation8 + $0x6e0] sm:$0xf]  ;;  %v5209_v28 = vor.u32 %v5781_v23, %v5208_v53 }
 0x1af   :  { %3144 = vmatpush.bf16.msra.mxu3 %v4397_v37  ;;  %3120 = vmatpush.bf16.msra.mxu0 %v3893_v47  ;;  %v4060_v37 = vld [vmem:[#allocation8 + $0x1d8] sm:$0xf]  ;;  %v6233_v57 = vpop.f32.mrf.mxu0 }
 0x1b0   :  { %v4061_v47 = vor.u32 %v5494_v38, %v4060_v37  ;;  %v5040_v37 = vld [vmem:[#allocation8 + $0x980] sm:$0xf]  ;;  %v5739_v38 = vld [vmem:[#allocation8 + $0x998] sm:$0xf0] }
 0x1b1   :  { %3093 = vmatpush.bf16.msra.mxu1 %v5037_v56  ;;  %v5774_v56 = vld [vmem:[#allocation8 + $0xab0] sm:$0xf0] }
 0x1b2   :  { %3132 = vmatpush.bf16.msra.mxu2 %v4145_v59  ;;  %v4676_v59 = vld [vmem:[#allocation8 + $0x6a8] sm:$0xf] }
 0x1b3   :  { %3145 = vmatpush.bf16.msra.mxu3 %v4369_v49  ;;  %3121 = vmatpush.bf16.msra.mxu0 %v3865_v4  ;;  %v4705_v49 = vor.u32 %v5655_v39, %v4704_v41  ;;  %v4677_v0 = vor.u32 %v5648_v60, %v4676_v59  ;;  %v4844_v4 = vld [vmem:[#allocation8 + $0x7f8] sm:$0xf]  ;;  %v4593_v41 = vor.u32 %v5627_v36, %v4592_v35  ;;  %v4760_v39 = vld [vmem:[#allocation8 + $0x750] sm:$0xf] }
 0x1b4   :  { %v4845_v13 = vor.u32 %v5690_v5, %v4844_v4  ;;  %v5793_v60 = vld [vmem:[#allocation11 + $0x58] sm:$0xff] }
 0x1b5   :  { %3094 = vmatpush.bf16.msra.mxu1 %v5009_v11  ;;  %v5096_v11 = vld [vmem:[#allocation8 + $0x9f0] sm:$0xf]  ;;  %v6238_v14 = vpop.f32.mrf.mxu1 }
 0x1b6   :  { %3133 = vmatpush.bf16.msra.mxu2 %v4117_v12  ;;  %v5753_v12 = vld [vmem:[#allocation8 + $0xa08] sm:$0xf0]  ;;  %v5805_v5 = vld [vmem:[#allocation11 + $0xb8] sm:$0xff] }
 0x1b7   :  { %3146 = vmatpush.bf16.msra.mxu3 %v4341_v6  ;;  %3122 = vmatpush.bf16.msra.mxu0 %v3837_v20  ;;  %v5125_v6 = vor.u32 %v5760_v62, %v5124_v61  ;;  %v4620_v20 = vld [vmem:[#allocation8 + $0x638] sm:$0xf]  ;;  %v4536_v61 = vld [vmem:[#allocation8 + $0x590] sm:$0xf]  ;;  %v5613_v62 = vld [vmem:[#allocation8 + $0x5a8] sm:$0xf0] }
 0x1b8   :  { %v4621_v27 = vor.u32 %v5634_v21, %v4620_v20 }
 0x1b9   :  { %3095 = vmatpush.bf16.msra.mxu1 %v4981_v31  ;;  %v5676_v31 = vld [vmem:[#allocation8 + $0x7a0] sm:$0xf0] }
 0x1ba   :  { %3134 = vmatpush.bf16.msra.mxu2 %v4089_v32  ;;  %3123 = vmatmul.bf16.vlgmr.msra.gmra.mxu0 %v6143_v43  ;;  %v5181_v43 = vor.u32 %v5774_v56, %v5180_v54  ;;  %v4789_v40 = vor.u32 %v5676_v31, %v4788_v29  ;;  %v5662_v56 = vld [vmem:[#allocation8 + $0x730] sm:$0xf0]  ;;  %v5790_v31 = vld [vmem:[#allocation11 + $0x40] sm:$0xff] }
 0x1bb   :  { %3147 = vmatpush.bf16.msra.mxu3 %v4313_v22  ;;  %3167 = vmatpush.bf16.msrb.mxu0 %v4929_v24  ;;  %v2879_v22 = vpop.f32.mrf.mxu0  ;;  %v5068_v24 = vld [vmem:[#allocation8 + $0x9b8] sm:$0xf] }
 0x1bc   :  { %v6240_v53 = vpop.f32.mrf.mxu2  ;;  %v5791_v22 = vld [vmem:[#allocation11 + $0x48] sm:$0xff] }
 0x1bd   :  { %3096 = vmatpush.bf16.msra.mxu1 %v4953_v46  ;;  %v2853_v23 = vpop.f32.mrf.mxu1  ;;  %v5620_v46 = vld [vmem:[#allocation8 + $0x5e0] sm:$0xf0] }
 0x1be   :  { %3135 = vmatpush.bf16.msra.mxu2 %v4061_v47  ;;  %v4565_v54 = vor.u32 %v5620_v46, %v4564_v3  ;;  %v5810_v23 = vld [vmem:[#allocation11 + $0xe0] sm:$0xff]  ;;  %v5809_v3 = vld [vmem:[#allocation11 + $0xd8] sm:$0xff] }
 0x1bf   :  { %3148 = vmatpush.bf16.msra.mxu3 %v4285_v42  ;;  %3168 = vmatpush.bf16.msrb.mxu0 %v4901_v44  ;;  %v5669_v42 = vld [vmem:[#allocation8 + $0x768] sm:$0xf0]  ;;  %v5041_v44 = vor.u32 %v5739_v38, %v5040_v37  ;;  %v5811_v38 = vld [vmem:[#allocation11 + $0xe8] sm:$0xff] }
 0x1c0   :  { %3097 = vmatmul.bf16.vlgmr.msra.gmra.mxu1 %v6160_v58  ;;  %v4761_v52 = vor.u32 %v5669_v42, %v4760_v39 }
 0x1c1   :  { %3154 = vmatpush.bf16.msrb.mxu1 %v4705_v49  ;;  %3136 = vmatmul.bf16.vlgmr.msra.gmra.mxu2 %v6145_v48  ;;  %v5746_v48 = vld [vmem:[#allocation8 + $0x9d0] sm:$0xf0]  ;;  %v5732_v49 = vld [vmem:[#allocation8 + $0x960] sm:$0xf0] }
 0x1c2   :  { %3180 = vmatpush.bf16.msrb.mxu2 %v5153_v55  ;;  %3149 = vmatmul.bf16.vlgmr.msra.gmra.mxu3 %v6151_v9  ;;  %v5097_v9 = vor.u32 %v5753_v12, %v5096_v11  ;;  %v5069_v32 = vor.u32 %v5746_v48, %v5068_v24  ;;  %v4732_v55 = vld [vmem:[#allocation8 + $0x718] sm:$0xf]  ;;  %v5792_v11 = vld [vmem:[#allocation11 + $0x50] sm:$0xff]  ;;  %v3207_v24 = vmul.f32 0.01, %v6212_v34  ;;  %v5789_v48 = vld [vmem:[#allocation11 + $0x38] sm:$0xff] }
 0x1c3   :  { %3199 = vmatpush.bf16.msrb.mxu3 %v5209_v28  ;;  %3169 = vmatpush.bf16.msrb.mxu0 %v4873_v63  ;;  %v5012_v28 = vld [vmem:[#allocation8 + $0x948] sm:$0xf]  ;;  %v6244_v50 = vpop.f32.mrf.mxu0  ;;  %v4984_v63 = vld [vmem:[#allocation8 + $0x910] sm:$0xf]  ;;  %v4733_v4 = vor.u32 %v5662_v56, %v4732_v55  ;;  %v4508_v12 = vld [vmem:[#allocation8 + $0x558] sm:$0xf] }
 0x1c4   :  { %v5013_v59 = vor.u32 %v5732_v49, %v5012_v28  ;;  %v5799_v49 = vld [vmem:[#allocation11 + $0x88] sm:$0xff]  ;;  %v5798_v56 = vld [vmem:[#allocation11 + $0x80] sm:$0xff] }
 0x1c5   :  { %3155 = vmatpush.bf16.msrb.mxu1 %v4677_v0  ;;  %v6242_v47 = vpop.f32.mrf.mxu3  ;;  %v2892_v0 = vpop.f32.mrf.mxu2 }
 0x1c6   :  { %3181 = vmatpush.bf16.msrb.mxu2 %v5125_v6  ;;  %v4537_v6 = vor.u32 %v5613_v62, %v4536_v61  ;;  %v5783_v61 = vld [vmem:[#allocation11 + $0x8] sm:$0xff]  ;;  %v3206_v62 = vmul.f32 0.01, %v6194_v30 }
 0x1c7   :  { %3200 = vmatpush.bf16.msrb.mxu3 %v5181_v43  ;;  %3170 = vmatpush.bf16.msrb.mxu0 %v4845_v13  ;;  %v5725_v43 = vld [vmem:[#allocation8 + $0x928] sm:$0xf0]  ;;  %v5606_v13 = vld [vmem:[#allocation8 + $0x570] sm:$0xf0] }
 0x1c8   :  { %v4985_v10 = vor.u32 %v5725_v43, %v4984_v63 }
 0x1c9   :  { %3156 = vmatpush.bf16.msrb.mxu1 %v4649_v16 }
 0x1ca   :  { %3182 = vmatpush.bf16.msrb.mxu2 %v5097_v9  ;;  %v5804_v9 = vld [vmem:[#allocation11 + $0xb0] sm:$0xff] }
 0x1cb   :  { %3647 = vmatpush.bf16.msra.mxu3 %v5797_v7  ;;  %3171 = vmatpush.bf16.msrb.mxu0 %v4817_v25  ;;  %v6248_v7 = vld [vmem:[#allocation10] sm:$0x7f]  ;;  %v2931_v51 = vpop.f32.mrf.mxu0 }
 0x1cc   :  { %v755_v8 = vperm.slane %v6248_v7, 3  ;;  %v5813_v25 = vld [vmem:[#allocation11 + $0xf8] sm:$0xff]  ;;  %v5818_v51 = vld [vmem:[#allocation11 + $0x120] sm:$0xff] }
 0x1cd   :  { %3157 = vmatpush.bf16.msrb.mxu1 %v4621_v27  ;;  %v2918_v16 = vpop.f32.mrf.mxu3  ;;  %v5803_v27 = vld [vmem:[#allocation11 + $0xa8] sm:$0xff] }
 0x1ce   :  { %3183 = vmatpush.bf16.msrb.mxu2 %v5069_v32  ;;  %v2852_v20 = vadd.f32 %v6238_v14, %v755_v8  ;;  %v3214_v14 = vmax.f32 %v6212_v34, %v3207_v24  ;;  %v5788_v32 = vld [vmem:[#allocation11 + $0x30] sm:$0xff]  ;;  %v5787_v34 = vld [vmem:[#allocation11 + $0x28] sm:$0xff] }
 0x1cf   :  { %3648 = vmatpush.bf16.msra.mxu3 %v5796_v19  ;;  %3172 = vmatpush.bf16.msrb.mxu0 %v4789_v40  ;;  %v4509_v19 = vor.u32 %v5606_v13, %v4508_v12  ;;  %v5801_v40 = vld [vmem:[#allocation11 + $0x98] sm:$0xff]  ;;  %v5820_v12 = vld [vmem:[#allocation11 + $0x130] sm:$0xff] }
 0x1d0   :  { %v2865_v29 = vadd.f32 %v6230_v2, %v2852_v20  ;;  %v3221_v2 = vpack.c.bf16 %v3214_v14, %v3214_v14  ;;  %v5828_v14 = vld [vmem:[#allocation11 + $0x170] sm:$0xff] }
 0x1d1   :  { %3158 = vmatpush.bf16.msrb.mxu1 %v4593_v41 }
 0x1d2   :  { %3184 = vmatpush.bf16.msrb.mxu2 %v5041_v44  ;;  %5216 = vmatmul.msk.bf16.vlgmr.msrb.gmra.mxu3 %vm234_vm0, %v6164_v18  ;;  %v4956_v18 = vld [vmem:[#allocation8 + $0x8d8] sm:$0xf]  ;;  %v2878_v35 = vadd.f32 %v6233_v57, %v2865_v29  ;;  %v5800_v57 = vld [vmem:[#allocation11 + $0x90] sm:$0xff] }
 0x1d3   :  { %3649 = vmatpush.bf16.msra.mxu3 %v5795_v33  ;;  %3173 = vmatpush.bf16.msrb.mxu0 %v4761_v52  ;;  %v4957_v21 = vor.u32 %v5718_v17, %v4956_v18  ;;  %v5812_v33 = vld [vmem:[#allocation11 + $0xf0] sm:$0xff]  ;;  %v5819_v17 = vld [vmem:[#allocation11 + $0x128] sm:$0xff] }
 0x1d4   :  { %v5784_v52 = vld [vmem:[#allocation11 + $0x10] sm:$0xff] }
 0x1d5   :  { %3159 = vmatpush.bf16.msrb.mxu1 %v4565_v54  ;;  %v2903_v37 = vpop.f32.mrf.mxu1  ;;  %v5808_v54 = vld [vmem:[#allocation11 + $0xd0] sm:$0xff] }
 0x1d6   :  { %3185 = vmatpush.bf16.msrb.mxu2 %v5013_v59  ;;  %v5816_v29 = vld [vmem:[#allocation11 + $0x110] sm:$0xff] }
 0x1d7   :  { %3650 = vmatpush.bf16.msra.mxu3 %v5794_v45  ;;  %3174 = vmatpush.bf16.msrb.mxu0 %v4733_v4  ;;  %v6259_v36 = vpop.f32.mrf.mxu0  ;;  %v5785_v45 = vld [vmem:[#allocation11 + $0x18] sm:$0xff]  ;;  %v5782_v4 = vld [vmem:[#allocation11] sm:$0xff] }
 0x1d9   :  { %3160 = vmatpush.bf16.msrb.mxu1 %v4537_v6 }
 0x1da   :  { %3186 = vmatpush.bf16.msrb.mxu2 %v4985_v10  ;;  %3175 = vmatmul.bf16.vlgmr.msrb.gmra.mxu0 %v6158_v26  ;;  %v5802_v26 = vld [vmem:[#allocation11 + $0xa0] sm:$0xff] }
 0x1db   :  { %3651 = vmatpush.bf16.msra.mxu3 %v5793_v60  ;;  %3660 = vmatpush.bf16.msra.mxu0 %v5805_v5  ;;  %v5806_v5 = vld [vmem:[#allocation11 + $0xc0] sm:$0xff] }
 0x1dc   :  { %v2942_v39 = vpop.f32.mrf.mxu2 }
 0x1dd   :  { %3161 = vmatpush.bf16.msrb.mxu1 %v4509_v19  ;;  %v2905_v44 = vpop.f32.mrf.mxu1 }
 0x1de   :  { %3187 = vmatpush.bf16.msrb.mxu2 %v4957_v21 }
 0x1df   :  { %3652 = vmatpush.bf16.msra.mxu3 %v5792_v11  ;;  %3661 = vmatpush.bf16.msra.mxu0 %v5804_v9  ;;  %v2957_v42 = vpop.f32.mrf.mxu0  ;;  %v756_v11 = vperm.slane %v6248_v7, 4 }
 0x1e0   :  { %3162 = vmatmul.bf16.vlgmr.msrb.gmra.mxu1 %v6153_v15  ;;  %v2891_v15 = vadd.f32 %v6240_v53, %v2878_v35  ;;  %v3208_v53 = vmul.f32 0.01, %v6228_v1  ;;  %v5823_v42 = vld [vmem:[#allocation11 + $0x148] sm:$0xff] }
 0x1e1   :  { %3634 = vmatpush.bf16.msra.mxu1 %v5789_v48  ;;  %3188 = vmatmul.bf16.vlgmr.msrb.gmra.mxu2 %v6160_v58  ;;  %v5786_v58 = vld [vmem:[#allocation11 + $0x20] sm:$0xff]  ;;  %v2943_v13 = vadd.f32 %v2942_v39, %v756_v11 }
 0x1e2   :  { %3673 = vmatpush.bf16.msra.mxu2 %v5813_v25  ;;  %v2904_v41 = vadd.f32 %v2903_v37, %v2891_v15  ;;  %v3215_v59 = vmax.f32 %v6228_v1, %v3208_v53  ;;  %v5821_v1 = vld [vmem:[#allocation11 + $0x138] sm:$0xff]  ;;  %v757_v53 = vperm.slane %v6248_v7, 5 }
 0x1e3   :  { %3653 = vmatpush.bf16.msra.mxu3 %v5791_v22  ;;  %3662 = vmatpush.bf16.msra.mxu0 %v5803_v27  ;;  %v5817_v22 = vld [vmem:[#allocation11 + $0x118] sm:$0xff] }
 0x1e4   :  { %v2917_v46 = vadd.f32 %v6242_v47, %v2904_v41  ;;  %v2944_v60 = vpop.f32.mrf.mxu2  ;;  %v5807_v47 = vld [vmem:[#allocation11 + $0xc8] sm:$0xff]  ;;  %v3222_v0 = vpack.c.bf16 %v3215_v59, %v3215_v59  ;;  %v5829_v25 = vld [vmem:[#allocation11 + $0x178] sm:$0xff] }
 0x1e5   :  { %3635 = vmatpush.bf16.msra.mxu1 %v5788_v32  ;;  %v2981_v28 = vpop.f32.mrf.mxu3 }
 0x1e6   :  { %3674 = vmatpush.bf16.msra.mxu2 %v5812_v33  ;;  %v2930_v55 = vadd.f32 %v6244_v50, %v2917_v46  ;;  %v3213_v50 = vmax.f32 %v6194_v30, %v3206_v62  ;;  %v2956_v30 = vadd.f32 %v6259_v36, %v2943_v13  ;;  %v5815_v33 = vld [vmem:[#allocation11 + $0x108] sm:$0xff] }
 0x1e7   :  { %3654 = vmatpush.bf16.msra.mxu3 %v5790_v31  ;;  %3663 = vmatpush.bf16.msra.mxu0 %v5802_v26  ;;  %v5831_v62 = vld [vmem:[#allocation11 + $0x188] sm:$0xff] }
 0x1e8   :  { %v3209_v63 = vmul.f32 0.01, %v2930_v55  ;;  %v3220_v8 = vpack.c.bf16 %v3213_v50, %v3213_v50 }
 0x1e9   :  { %3636 = vmatpush.bf16.msra.mxu1 %v5787_v34  ;;  %v5814_v34 = vld [vmem:[#allocation11 + $0x100] sm:$0xff] }
 0x1ea   :  { %3655 = vmatmul.bf16.vlgmr.msra.gmra.mxu3 %v3221_v2  ;;  %3675 = vmatpush.bf16.msra.mxu2 %v5811_v38  ;;  %v3216_v6 = vmax.f32 %v2930_v55, %v3209_v63  ;;  %v5827_v2 = vld [vmem:[#allocation11 + $0x168] sm:$0xff]  ;;  %v5826_v38 = vld [vmem:[#allocation11 + $0x160] sm:$0xff] }
 0x1eb   :  { %3664 = vmatpush.bf16.msra.mxu0 %v5801_v40  ;;  %3699 = vmatpush.bf16.msrb.mxu3 %v5829_v25 }
 0x1ec   :  { %v3223_v10 = vpack.c.bf16 %v3216_v6, %v3216_v6 }
 0x1ed   :  { %3637 = vmatpush.bf16.msra.mxu1 %v5786_v58  ;;  %v2983_v43 = vpop.f32.mrf.mxu3 }
 0x1ee   :  { %3676 = vmatpush.bf16.msra.mxu2 %v5810_v23  ;;  %v5825_v23 = vld [vmem:[#allocation11 + $0x158] sm:$0xff] }
 0x1ef   :  { %3665 = vmatpush.bf16.msra.mxu0 %v5800_v57  ;;  %3700 = vmatpush.bf16.msrb.mxu3 %v5828_v14  ;;  %v5824_v57 = vld [vmem:[#allocation11 + $0x150] sm:$0xff] }
 0x1f1   :  { %3638 = vmatpush.bf16.msra.mxu1 %v5785_v45 }
 0x1f2   :  { %3677 = vmatpush.bf16.msra.mxu2 %v5809_v3  ;;  %v5822_v3 = vld [vmem:[#allocation11 + $0x140] sm:$0xff] }
 0x1f3   :  { %3666 = vmatpush.bf16.msra.mxu0 %v5799_v49  ;;  %3701 = vmatpush.bf16.msrb.mxu3 %v5827_v2  ;;  %v5844_v2 = vld [vmem:[#allocation13] ss:$0 sm:$0xff] }
 0x1f5   :  { %3639 = vmatpush.bf16.msra.mxu1 %v5784_v52  ;;  %v2968_v18 = vpop.f32.mrf.mxu1 }
 0x1f6   :  { %3678 = vmatpush.bf16.msra.mxu2 %v5808_v54  ;;  %v2969_v9 = vadd.f32 %v2968_v18, %v2956_v30  ;;  %v758_v18 = vperm.slane %v6248_v7, 6 }
 0x1f7   :  { %3667 = vmatpush.bf16.msra.mxu0 %v5798_v56  ;;  %v3007_v16 = vpop.f32.mrf.mxu0  ;;  %3702 = vmatpush.bf16.msrb.mxu3 %v5826_v38 }
 0x1f8   :  { %v2982_v24 = vadd.f32 %v2981_v28, %v2969_v9 }
 0x1f9   :  { %3640 = vmatpush.bf16.msra.mxu1 %v5783_v61 }
 0x1fa   :  { %3679 = vmatpush.bf16.msra.mxu2 %v5807_v47  ;;  %3668 = vmatmul.bf16.vlgmr.msra.gmra.mxu0 %v3222_v0 }
 0x1fb   :  { %3703 = vmatpush.bf16.msrb.mxu3 %v5825_v23  ;;  %3718 = vmatpush.bf16.msrb.mxu0 %v5831_v62 }
 0x1fc   :  { %v2994_v19 = vpop.f32.mrf.mxu2 }
 0x1fd   :  { %3641 = vmatpush.bf16.msra.mxu1 %v5782_v4  ;;  %v2970_v21 = vpop.f32.mrf.mxu1  ;;  %v2995_v27 = vadd.f32 %v2994_v19, %v2982_v24 }
 0x1fe   :  { %3680 = vmatpush.bf16.msra.mxu2 %v5806_v5 }
 0x1ff   :  { %v3009_v20 = vpop.f32.mrf.mxu0  ;;  %v3008_v32 = vadd.f32 %v3007_v16, %v2995_v27  ;;  %3704 = vmatpush.bf16.msrb.mxu3 %v5824_v57 }
 0x200   :  { %3642 = vmatmul.bf16.vlgmr.msra.gmra.mxu1 %v3220_v8 }
 0x201   :  { %3686 = vmatpush.bf16.msrb.mxu1 %v5821_v1  ;;  %3681 = vmatmul.bf16.vlgmr.msra.gmra.mxu2 %v3223_v10 }
 0x203   :  { %3705 = vmatpush.bf16.msrb.mxu3 %v5823_v42 }
 0x204   :  { %v2996_v31 = vpop.f32.mrf.mxu2 }
 0x205   :  { %3687 = vmatpush.bf16.msrb.mxu1 %v5820_v12  ;;  %v3033_v48 = vpop.f32.mrf.mxu3  ;;  %v3020_v26 = vpop.f32.mrf.mxu1  ;;  %v5830_v12 = vld [vmem:[#allocation11 + $0x180] sm:$0xff] }
 0x206   :  { %v3021_v35 = vadd.f32 %v3020_v26, %v3008_v32  ;;  %v3034_v54 = vadd.f32 %v3033_v48, %v757_v53  ;;  %3719 = vmatpush.bf16.msrb.mxu0 %v5830_v12 }
 0x207   :  { %3706 = vmatpush.bf16.msrb.mxu3 %v5822_v3 }
 0x208   :  { %v3210_v37 = vmul.f32 0.01, %v3021_v35 }
 0x209   :  { %3688 = vmatpush.bf16.msrb.mxu1 %v5819_v17 }
 0x20a   :  { %v3217_v40 = vmax.f32 %v3021_v35, %v3210_v37 }
 0x20c   :  { %v3224_v15 = vpack.c.bf16 %v3217_v40, %v3217_v40 }
 0x20d   :  { %3689 = vmatpush.bf16.msrb.mxu1 %v5818_v51  ;;  %v3035_v36 = vpop.f32.mrf.mxu3  ;;  %v3022_v58 = vpop.f32.mrf.mxu1 }
 0x211   :  { %3690 = vmatpush.bf16.msrb.mxu1 %v5817_v22 }
 0x215   :  { %3691 = vmatpush.bf16.msrb.mxu1 %v5816_v29 }
 0x217   :  { %v3072_v41 = vpop.f32.mrf.mxu0 }
 0x219   :  { %3692 = vmatpush.bf16.msrb.mxu1 %v5815_v33 }
 0x21c   :  { %v3059_v44 = vpop.f32.mrf.mxu2 }
 0x21d   :  { %3693 = vmatpush.bf16.msrb.mxu1 %v5814_v34  ;;  %v3046_v39 = vpop.f32.mrf.mxu1 }
 0x21e   :  { %v3047_v55 = vadd.f32 %v3046_v39, %v3034_v54 }
 0x21f   :  { %v3074_v45 = vpop.f32.mrf.mxu0 }
 0x220   :  { %3694 = vmatmul.bf16.vlgmr.msrb.gmra.mxu1 %v3224_v15  ;;  %v3060_v59 = vadd.f32 %v3059_v44, %v3047_v55 }
 0x222   :  { %v3073_v61 = vadd.f32 %v3072_v41, %v3060_v59 }
 0x224   :  { %v3061_v49 = vpop.f32.mrf.mxu2 }
 0x225   :  { %v3085_v46 = vpop.f32.mrf.mxu3  ;;  %v3048_v28 = vpop.f32.mrf.mxu1 }
 0x226   :  { %v3086_v63 = vadd.f32 %v3085_v46, %v3073_v61 }
 0x22c   :  { %v3111_v56 = vpop.f32.mrf.mxu2 }
 0x22d   :  { %v3087_v52 = vpop.f32.mrf.mxu3 }
 0x234   :  { %v3113_v47 = vpop.f32.mrf.mxu2 }
 0x237   :  { %v3124_v60 = vpop.f32.mrf.mxu0 }
 0x238   :  { %v3125_v30 = vadd.f32 %v3124_v60, %v758_v18 }
 0x23d   :  { %v3098_v43 = vpop.f32.mrf.mxu1 }
 0x23e   :  { %v3099_v0 = vadd.f32 %v3098_v43, %v3086_v63 }
 0x23f   :  { %v3126_v4 = vpop.f32.mrf.mxu0 }
 0x240   :  { %v3112_v5 = vadd.f32 %v3111_v56, %v3099_v0 }
 0x242   :  { %v3211_v50 = vmul.f32 0.01, %v3112_v5 }
 0x244   :  { %v3137_v1 = vpop.f32.mrf.mxu2  ;;  %v3218_v8 = vmax.f32 %v3112_v5, %v3211_v50 }
 0x245   :  { %v3150_v6 = vpop.f32.mrf.mxu3  ;;  %v3100_v10 = vpop.f32.mrf.mxu1  ;;  %v3138_v9 = vadd.f32 %v3137_v1, %v3125_v30 }
 0x246   :  { %v3225_v11 = vpack.c.bf16 %v3218_v8, %v3218_v8 }
 0x247   :  { %v3151_v19 = vadd.f32 %v3150_v6, %v3138_v9 }
 0x248   :  { %3707 = vmatmul.bf16.vlgmr.msrb.gmra.mxu3 %v3225_v11 }
 0x24c   :  { %v3139_v16 = vpop.f32.mrf.mxu2 }
 0x24d   :  { %v3152_v13 = vpop.f32.mrf.mxu3 }
 0x255   :  { %v3202_v17 = vpop.f32.mrf.mxu3 }
 0x257   :  { %v3176_v51 = vpop.f32.mrf.mxu0 }
 0x25d   :  { %v3163_v20 = vpop.f32.mrf.mxu1  ;;  %v3204_v21 = vpop.f32.mrf.mxu3 }
 0x25e   :  { %v3164_v22 = vadd.f32 %v3163_v20, %v3151_v19 }
 0x25f   :  { %v3178_v24 = vpop.f32.mrf.mxu0 }
 0x260   :  { %v3177_v48 = vadd.f32 %v3176_v51, %v3164_v22 }
 0x264   :  { %v3189_v25 = vpop.f32.mrf.mxu2 }
 0x265   :  { %v3190_v27 = vadd.f32 %v3189_v25, %v3177_v48  ;;  %v3165_v29 = vpop.f32.mrf.mxu1 }
 0x267   :  { %v3203_v31 = vadd.f32 %v3202_v17, %v3190_v27 }
 0x269   :  { %v3212_v32 = vmul.f32 0.01, %v3203_v31 }
 0x26b   :  { %v3219_v33 = vmax.f32 %v3203_v31, %v3212_v32 }
 0x26c   :  { %v3191_v26 = vpop.f32.mrf.mxu2 }
 0x26d   :  { %v3656_v14 = vpop.f32.mrf.mxu3  ;;  %v3226_v35 = vpack.c.bf16 %v3219_v33, %v3219_v33 }
 0x26f   :  { %5417 = vmatmul.msk.bf16.vlgmr.msrb.gmra.mxu0 %vm234_vm0, %v3226_v35 }
 0x275   :  { %v3658_v7 = vpop.f32.mrf.mxu3 }
 0x277   :  { %v3669_v36 = vpop.f32.mrf.mxu0 }
 0x27d   :  { %v3643_v37 = vpop.f32.mrf.mxu1 }
 0x27e   :  { %v3644_v34 = vadd.f32 %v5844_v2, %v3643_v37 }
 0x27f   :  { %v3671_v38 = vpop.f32.mrf.mxu0 }
 0x280   :  { %v3657_v40 = vadd.f32 %v3656_v14, %v3644_v34 }
 0x282   :  { %v3670_v15 = vadd.f32 %v3669_v36, %v3657_v40 }
 0x284   :  { %v3682_v58 = vpop.f32.mrf.mxu2 }
 0x285   :  { %v3683_v23 = vadd.f32 %v3682_v58, %v3670_v15  ;;  %v3645_v41 = vpop.f32.mrf.mxu1 }
 0x28c   :  { %v3684_v57 = vpop.f32.mrf.mxu2 }
 0x29d   :  { %v3695_v39 = vpop.f32.mrf.mxu1 }
 0x29e   :  { %v3696_v42 = vadd.f32 %v3695_v39, %v3683_v23 }
 0x2a5   :  { %v3697_v44 = vpop.f32.mrf.mxu1 }
 0x2cb   :  { %v3708_v45 = vpop.f32.mrf.mxu3 }
 0x2cc   :  { %v3709_v46 = vadd.f32 %v3708_v45, %v3696_v42 }
 0x2d3   :  { %v3710_v3 = vpop.f32.mrf.mxu3 }
 0x2ec   :  { %v3721_v28 = vpop.f32.mrf.mxu0 }
 0x2ed   :  { %v3722_v49 = vadd.f32 %v3721_v28, %v3709_v46 }
 0x2ef   :  { %v3725_v53 = vmax.f32 %v3722_v49, 0.0 }
 0x2f1   :  { %3726 = vst [vmem:[#allocation14] sm:$0xff] %v3725_v53 }
 0x2f2   :  { %3737 = dma.vmem_to_hbm [thread:$0]  %s3733_s6, 128, %s3735_s14, [#allocation4]  }
 0x2f4   :  { %v3723_v52 = vpop.f32.mrf.mxu0 }
 0x2f5   :  { %6046 = dma.done.wait [#allocation4], 128  }
 0x2f6   :  { %6047 = vsyncadd [#allocation4], 4294967168 }
 0x2f7   :  { %3742 = vsyncpa [#allocation3], 1 }
 0x2f8   :  { %3743 = vsyncpa [#allocation6], 1 }
 0x2f9   :  { %3744 = vsyncpa [#allocation9], 1 }
 0x2fa   :  { %3745 = vsyncpa [#allocation12], 1 }
 0x2fb   :  { %3746 = vsyncpa [#allocation4], 1 }

</bundles_post_ra>
